<compile_context>
chip_gen: v6e
topology: v6e:2x2x1
jax: 0.10.0
libtpu: 0.0.40
codegen_flags: <defaults>
</compile_context>

<pallas_src>
import jax
import jax.numpy as jnp
import numpy as np
from jax.experimental import pallas as pl
from jax.experimental.pallas import tpu as pltpu


def _encoder2_fused_kernel(x_ref, w1_ref, b1_ref, w2_ref, b2_ref, o_ref,
                           xpad_ref, ys_ref):
    # x_ref:   (1, H, W, Cin)       NHWC input tile for one batch element
    # w1_ref:  (3, 3*Cin, C1)       conv1 weights, [dy, dx*Cin + c, o]
    # b1_ref:  (1, C1)
    # w2_ref:  (3, 3*C1, C2)        conv2 weights, [dy, dx*C1 + c, o]
    # b2_ref:  (1, C2)
    # o_ref:   (1, C2, H*W)         channel-major output (NCHW after free reshape)
    # xpad_ref: VMEM (H+2, W+2, Cin)  zero-padded input staging
    # ys_ref:   VMEM (H+2, W, 3*C1)   dx-fused conv1-output staging (stays on-chip)
    _, H, W, Cin = x_ref.shape
    C1 = b1_ref.shape[-1]
    C2 = b2_ref.shape[-1]
    K1 = 3 * Cin
    K2 = 3 * C1
    f32 = jnp.float32

    # ---- re-zero only the constant halo strips (tiny; interior regions are
    #      fully overwritten below, so no full-buffer zero-fill is needed) ----
    xpad_ref[0:1, :, :] = jnp.zeros((1, W + 2, Cin), f32)
    xpad_ref[H + 1:H + 2, :, :] = jnp.zeros((1, W + 2, Cin), f32)
    xpad_ref[1:H + 1, 0:1, :] = jnp.zeros((H, 1, Cin), f32)
    xpad_ref[1:H + 1, W + 1:W + 2, :] = jnp.zeros((H, 1, Cin), f32)

    ys_ref[0:1, :, :] = jnp.zeros((1, W, K2), f32)
    ys_ref[H + 1:H + 2, :, :] = jnp.zeros((1, W, K2), f32)
    ys_ref[1:H + 1, 0:1, 0:C1] = jnp.zeros((H, 1, C1), f32)               # dx=0 band, w=0
    ys_ref[1:H + 1, W - 1:W, 2 * C1:3 * C1] = jnp.zeros((H, 1, C1), f32)  # dx=2 band, w=W-1

    # ---- stage the zero-padded input interior (SAME padding, pad=1) ----
    xpad_ref[1:H + 1, 1:W + 1, :] = x_ref[0]
    xp = xpad_ref[...]                                        # (H+2, W+2, Cin)

    # ---- conv1: Cin -> C1, 3x3 SAME + ReLU; dx taps fused into K = 3*Cin ----
    # Cin = 3, so these shifted views / the concat are a few KB -- negligible.
    xcat = jnp.concatenate([xp[:, dx:dx + W, :] for dx in range(3)], axis=-1)
    acc1 = jnp.zeros((H * W, C1), f32)
    for dy in range(3):
        lhs = xcat[dy:dy + H].reshape(H * W, K1)              # free reshape (W % 8 == 0)
        acc1 = acc1 + jnp.dot(lhs, w1_ref[dy], preferred_element_type=f32)
    y1 = jnp.maximum(acc1 + b1_ref[...], 0.0)                 # (H*W, C1)
    y1_hw = y1.reshape(H, W, C1)

    # ---- write-time scatter of the conv1 output into the dx-fused K layout ----
    # Invariant: ys[r, w, dx*C1 + c] == y1_padded[r, w + dx, c]; never hits HBM.
    ys_ref[1:H + 1, :, C1:2 * C1] = y1_hw                           # dx = 1
    ys_ref[1:H + 1, 1:W, 0:C1] = y1_hw[:, 0:W - 1, :]               # dx = 0
    ys_ref[1:H + 1, 0:W - 1, 2 * C1:3 * C1] = y1_hw[:, 1:W, :]      # dx = 2

    # ---- conv2: C1 -> C2, 3x3 SAME + ReLU; dy is a free sublane slice ----
    acc2 = jnp.zeros((H * W, C2), f32)
    for dy in range(3):
        lhs = ys_ref[dy:dy + H, :, :].reshape(H * W, K2)      # (H*W, 192)
        acc2 = acc2 + jnp.dot(lhs, w2_ref[dy], preferred_element_type=f32)
    y2 = jnp.maximum(acc2 + b2_ref[...], 0.0)                 # (H*W, C2)

    # ---- in-kernel NHWC->NCHW: lane-dense (C2, H*W) store; wrapper reshape
    #      to (B, C2, H, W) is free, so no XLA output transpose pass. ----
    o_ref[0] = jnp.transpose(y2).astype(o_ref.dtype)          # (C2, H*W)


def encoder2_pallas_nhwc(x_nhwc, w1_packed, b1, w2_packed, b2):
    """Fused Encoder2. x_nhwc: (B,H,W,Cin) f32 -> (B,C2,H*W) f32 (channel-major)."""
    B, H, W, Cin = x_nhwc.shape
    C1 = b1.shape[0]
    C2 = b2.shape[0]
    assert W % 8 == 0 and (H * W) % 128 == 0, "layout assumes W%8==0 and H*W%128==0"

    # NOTE: for large spatial tiles, add pipeline_mode=pl.Buffered(1) to the
    # grid-invariant weight/bias specs to reclaim their second VMEM buffer.
    return pl.pallas_call(
        _encoder2_fused_kernel,
        out_shape=jax.ShapeDtypeStruct((B, C2, H * W), jnp.float32),
        grid_spec=pltpu.PrefetchScalarGridSpec(
            num_scalar_prefetch=0,
            grid=(B,),
            in_specs=[
                pl.BlockSpec((1, H, W, Cin), lambda b: (b, 0, 0, 0)),
                pl.BlockSpec((3, 3 * Cin, C1), lambda b: (0, 0, 0)),
                pl.BlockSpec((1, C1), lambda b: (0, 0)),
                pl.BlockSpec((3, 3 * C1, C2), lambda b: (0, 0, 0)),
                pl.BlockSpec((1, C2), lambda b: (0, 0)),
            ],
            out_specs=pl.BlockSpec((1, C2, H * W), lambda b: (b, 0, 0)),
            scratch_shapes=[
                pltpu.VMEM((H + 2, W + 2, Cin), jnp.float32),
                pltpu.VMEM((H + 2, W, 3 * C1), jnp.float32),
            ],
        ),
        compiler_params=pltpu.CompilerParams(
            dimension_semantics=("parallel",)),
    )(x_nhwc, w1_packed, b1.reshape(1, C1), w2_packed, b2.reshape(1, C2))


# --- weight repacking (done ONCE at setup, outside the jitted forward) ---

def pack_conv3x3_weights(w_oihw):
    """torch (Cout, Cin, 3, 3) -> (3, 3*Cin, Cout); row = dy, K index = dx*Cin + c."""
    c_out, c_in = w_oihw.shape[0], w_oihw.shape[1]
    return jnp.transpose(w_oihw, (2, 3, 1, 0)).reshape(3, 3 * c_in, c_out)


@jax.jit
def encoder2_forward(x_nchw, w1_packed, b1, w2_packed, b2):
    """Pallas implementation of Encoder2.forward. (B,3,H,W) f32 -> (B,128,H,W) f32."""
    B, _, H, W = x_nchw.shape
    x = jnp.transpose(x_nchw, (0, 2, 3, 1))                   # NCHW -> NHWC (tiny, Cin=3)
    y = encoder2_pallas_nhwc(x, w1_packed, b1, w2_packed, b2)  # (B, C2, H*W)
    return y.reshape(B, -1, H, W)                              # free: already channel-major


# --- reference / setup helpers ---

def _init_conv_params(key, cout, cin, k=3):
    # Deterministic init mimicking torch's default (uniform in +-1/sqrt(fan_in)).
    kw, kb = jax.random.split(key)
    bound = 1.0 / np.sqrt(cin * k * k)
    w = jax.random.uniform(kw, (cout, cin, k, k), jnp.float32, -bound, bound)
    b = jax.random.uniform(kb, (cout,), jnp.float32, -bound, bound)
    return w, b


def _reference_forward(x_nchw, w1, b1, w2, b2):
    def conv(x, w, b):
        y = jax.lax.conv_general_dilated(
            x, w, window_strides=(1, 1), padding="SAME",
            dimension_numbers=("NCHW", "OIHW", "NCHW"))
        return jax.nn.relu(y + b[None, :, None, None])
    return conv(conv(x_nchw, w1, b1), w2, b2)


if __name__ == "__main__":
    key = jax.random.PRNGKey(0)
    kx, k1, k2 = jax.random.split(key, 3)

    B, Cin, H, W = 2, 3, 16, 16
    x = jax.random.normal(kx, (B, Cin, H, W), jnp.float32)

    w1, b1 = _init_conv_params(k1, 64, 3)
    w2, b2 = _init_conv_params(k2, 128, 64)

    # Repack weights once, outside the jitted forward.
    w1_packed = jax.block_until_ready(pack_conv3x3_weights(w1))
    w2_packed = jax.block_until_ready(pack_conv3x3_weights(w2))

    out = jax.block_until_ready(encoder2_forward(x, w1_packed, b1, w2_packed, b2))
    assert out.shape == (B, 128, H, W), out.shape

    ref = jax.block_until_ready(_reference_forward(x, w1, b1, w2, b2))
    np.testing.assert_allclose(np.asarray(out), np.asarray(ref), rtol=1e-4, atol=1e-4)

    print("KERNEL_OK")
</pallas_src>

<mosaic_0001>
module attributes {stable_mosaic.version = 11 : i64} {
  func.func @_encoder2_fused_kernel(%arg0: i32, %arg1: memref<1x16x16x3xf32, #tpu.memory_space<vmem>>, %arg2: memref<3x9x64xf32, #tpu.memory_space<vmem>>, %arg3: memref<1x64xf32, #tpu.memory_space<vmem>>, %arg4: memref<3x192x128xf32, #tpu.memory_space<vmem>>, %arg5: memref<1x128xf32, #tpu.memory_space<vmem>>, %arg6: memref<1x128x256xf32, #tpu.memory_space<vmem>>, %arg7: memref<18x18x3xf32, #tpu.memory_space<vmem>>, %arg8: memref<18x16x192xf32, #tpu.memory_space<vmem>>) attributes {dimension_semantics = [#tpu.dimension_semantics<parallel>], iteration_bounds = array<i64: 2>, scalar_prefetch = 0 : i64, scratch_operands = 2 : i64, tpu.core_type = #tpu.core_type<tc>, window_params = [{transform_indices = @transform_0, window_bounds = array<i64: 1, 16, 16, 3>}, {pipeline_mode = #tpu.pipeline_mode<synchronous>, transform_indices = @transform_1, window_bounds = array<i64: 3, 9, 64>}, {pipeline_mode = #tpu.pipeline_mode<synchronous>, transform_indices = @transform_2, window_bounds = array<i64: 1, 64>}, {pipeline_mode = #tpu.pipeline_mode<synchronous>, transform_indices = @transform_3, window_bounds = array<i64: 3, 192, 128>}, {pipeline_mode = #tpu.pipeline_mode<synchronous>, transform_indices = @transform_4, window_bounds = array<i64: 1, 128>}, {transform_indices = @transform_5, window_bounds = array<i64: 1, 128, 256>}]} {
    %cst = arith.constant 0.000000e+00 : f32
    %0 = vector.broadcast %cst : f32 to vector<1x18x3xf32>
    %c0 = arith.constant 0 : index
    %c0_0 = arith.constant 0 : index
    %c0_1 = arith.constant 0 : index
    %1 = vector.load %arg7[%c0, %c0_0, %c0_1] : memref<18x18x3xf32, #tpu.memory_space<vmem>>, vector<1x18x3xf32>
    tpu.vector_store %arg7[%c0, %c0_0, %c0_1], %0 {strides = array<i32>} : memref<18x18x3xf32, #tpu.memory_space<vmem>>, vector<1x18x3xf32>,
    %cst_2 = arith.constant 0.000000e+00 : f32
    %2 = vector.broadcast %cst_2 : f32 to vector<1x18x3xf32>
    %c17 = arith.constant 17 : index
    %c0_3 = arith.constant 0 : index
    %c0_4 = arith.constant 0 : index
    %3 = vector.load %arg7[%c17, %c0_3, %c0_4] : memref<18x18x3xf32, #tpu.memory_space<vmem>>, vector<1x18x3xf32>
    tpu.vector_store %arg7[%c17, %c0_3, %c0_4], %2 {strides = array<i32>} : memref<18x18x3xf32, #tpu.memory_space<vmem>>, vector<1x18x3xf32>,
    %cst_5 = arith.constant 0.000000e+00 : f32
    %4 = vector.broadcast %cst_5 : f32 to vector<16x1x3xf32>
    %c1 = arith.constant 1 : index
    %c0_6 = arith.constant 0 : index
    %c0_7 = arith.constant 0 : index
    %5 = vector.load %arg7[%c1, %c0_6, %c0_7] : memref<18x18x3xf32, #tpu.memory_space<vmem>>, vector<16x1x3xf32>
    tpu.vector_store %arg7[%c1, %c0_6, %c0_7], %4 {strides = array<i32>} : memref<18x18x3xf32, #tpu.memory_space<vmem>>, vector<16x1x3xf32>,
    %cst_8 = arith.constant 0.000000e+00 : f32
    %6 = vector.broadcast %cst_8 : f32 to vector<16x1x3xf32>
    %c1_9 = arith.constant 1 : index
    %c17_10 = arith.constant 17 : index
    %c0_11 = arith.constant 0 : index
    %7 = vector.load %arg7[%c1_9, %c17_10, %c0_11] : memref<18x18x3xf32, #tpu.memory_space<vmem>>, vector<16x1x3xf32>
    tpu.vector_store %arg7[%c1_9, %c17_10, %c0_11], %6 {strides = array<i32>} : memref<18x18x3xf32, #tpu.memory_space<vmem>>, vector<16x1x3xf32>,
    %cst_12 = arith.constant 0.000000e+00 : f32
    %8 = vector.broadcast %cst_12 : f32 to vector<1x16x192xf32>
    %c0_13 = arith.constant 0 : index
    %c0_14 = arith.constant 0 : index
    %c0_15 = arith.constant 0 : index
    %9 = vector.load %arg8[%c0_13, %c0_14, %c0_15] : memref<18x16x192xf32, #tpu.memory_space<vmem>>, vector<1x16x192xf32>
    tpu.vector_store %arg8[%c0_13, %c0_14, %c0_15], %8 {strides = array<i32>} : memref<18x16x192xf32, #tpu.memory_space<vmem>>, vector<1x16x192xf32>,
    %cst_16 = arith.constant 0.000000e+00 : f32
    %10 = vector.broadcast %cst_16 : f32 to vector<1x16x192xf32>
    %c17_17 = arith.constant 17 : index
    %c0_18 = arith.constant 0 : index
    %c0_19 = arith.constant 0 : index
    %11 = vector.load %arg8[%c17_17, %c0_18, %c0_19] : memref<18x16x192xf32, #tpu.memory_space<vmem>>, vector<1x16x192xf32>
    tpu.vector_store %arg8[%c17_17, %c0_18, %c0_19], %10 {strides = array<i32>} : memref<18x16x192xf32, #tpu.memory_space<vmem>>, vector<1x16x192xf32>,
    %cst_20 = arith.constant 0.000000e+00 : f32
    %12 = vector.broadcast %cst_20 : f32 to vector<16x1x64xf32>
    %c1_21 = arith.constant 1 : index
    %c0_22 = arith.constant 0 : index
    %c0_23 = arith.constant 0 : index
    %13 = vector.load %arg8[%c1_21, %c0_22, %c0_23] : memref<18x16x192xf32, #tpu.memory_space<vmem>>, vector<16x1x64xf32>
    tpu.vector_store %arg8[%c1_21, %c0_22, %c0_23], %12 {strides = array<i32>} : memref<18x16x192xf32, #tpu.memory_space<vmem>>, vector<16x1x64xf32>,
    %cst_24 = arith.constant 0.000000e+00 : f32
    %14 = vector.broadcast %cst_24 : f32 to vector<16x1x64xf32>
    %c1_25 = arith.constant 1 : index
    %c15 = arith.constant 15 : index
    %c128 = arith.constant 128 : index
    %15 = vector.load %arg8[%c1_25, %c15, %c128] : memref<18x16x192xf32, #tpu.memory_space<vmem>>, vector<16x1x64xf32>
    tpu.vector_store %arg8[%c1_25, %c15, %c128], %14 {strides = array<i32>} : memref<18x16x192xf32, #tpu.memory_space<vmem>>, vector<16x1x64xf32>,
    %c0_26 = arith.constant 0 : index
    %c0_27 = arith.constant 0 : index
    %c0_28 = arith.constant 0 : index
    %c0_29 = arith.constant 0 : index
    %16 = vector.load %arg1[%c0_26, %c0_27, %c0_28, %c0_29] : memref<1x16x16x3xf32, #tpu.memory_space<vmem>>, vector<1x16x16x3xf32>
    %17 = vector.shape_cast %16 : vector<1x16x16x3xf32> to vector<16x16x3xf32>
    %c1_30 = arith.constant 1 : index
    %c1_31 = arith.constant 1 : index
    %c0_32 = arith.constant 0 : index
    %18 = vector.load %arg7[%c1_30, %c1_31, %c0_32] : memref<18x18x3xf32, #tpu.memory_space<vmem>>, vector<16x16x3xf32>
    tpu.vector_store %arg7[%c1_30, %c1_31, %c0_32], %17 {strides = array<i32>} : memref<18x18x3xf32, #tpu.memory_space<vmem>>, vector<16x16x3xf32>,
    %c0_33 = arith.constant 0 : index
    %c0_34 = arith.constant 0 : index
    %c0_35 = arith.constant 0 : index
    %19 = vector.load %arg7[%c0_33, %c0_34, %c0_35] : memref<18x18x3xf32, #tpu.memory_space<vmem>>, vector<18x18x3xf32>
    %20 = vector.extract_strided_slice %19 {offsets = [0, 0, 0], sizes = [18, 16, 3], strides = [1, 1, 1]} : vector<18x18x3xf32> to vector<18x16x3xf32>
    %21 = vector.extract_strided_slice %19 {offsets = [0, 1, 0], sizes = [18, 16, 3], strides = [1, 1, 1]} : vector<18x18x3xf32> to vector<18x16x3xf32>
    %22 = vector.extract_strided_slice %19 {offsets = [0, 2, 0], sizes = [18, 16, 3], strides = [1, 1, 1]} : vector<18x18x3xf32> to vector<18x16x3xf32>
    %23 = tpu.concatenate %20, %21, %22 in 2 : vector<18x16x3xf32>, vector<18x16x3xf32>, vector<18x16x3xf32> -> vector<18x16x9xf32>
    %cst_36 = arith.constant 0.000000e+00 : f32
    %24 = vector.broadcast %cst_36 : f32 to vector<256x64xf32>
    %25 = vector.extract_strided_slice %23 {offsets = [0, 0, 0], sizes = [16, 16, 9], strides = [1, 1, 1]} : vector<18x16x9xf32> to vector<16x16x9xf32>
    %26 = vector.shape_cast %25 : vector<16x16x9xf32> to vector<256x9xf32>
    %c0_37 = arith.constant 0 : index
    %c0_38 = arith.constant 0 : index
    %c0_39 = arith.constant 0 : index
    %27 = vector.load %arg2[%c0_37, %c0_38, %c0_39] : memref<3x9x64xf32, #tpu.memory_space<vmem>>, vector<1x9x64xf32>
    %28 = vector.shape_cast %27 : vector<1x9x64xf32> to vector<9x64xf32>
    %cst_40 = arith.constant dense<0.000000e+00> : vector<256x64xf32>
    %29 = tpu.matmul %26, %28, %cst_40 {dimension_numbers = #tpu.dot_dimension_numbers<[1], [0], [0], [1], [0, 0, 1, 1], [], []>} : vector<256x9xf32>, vector<9x64xf32>, vector<256x64xf32> -> vector<256x64xf32>
    %30 = arith.addf %24, %29 : vector<256x64xf32>
    %31 = vector.extract_strided_slice %23 {offsets = [1, 0, 0], sizes = [16, 16, 9], strides = [1, 1, 1]} : vector<18x16x9xf32> to vector<16x16x9xf32>
    %32 = vector.shape_cast %31 : vector<16x16x9xf32> to vector<256x9xf32>
    %c1_41 = arith.constant 1 : index
    %c0_42 = arith.constant 0 : index
    %c0_43 = arith.constant 0 : index
    %33 = vector.load %arg2[%c1_41, %c0_42, %c0_43] : memref<3x9x64xf32, #tpu.memory_space<vmem>>, vector<1x9x64xf32>
    %34 = vector.shape_cast %33 : vector<1x9x64xf32> to vector<9x64xf32>
    %cst_44 = arith.constant dense<0.000000e+00> : vector<256x64xf32>
    %35 = tpu.matmul %32, %34, %cst_44 {dimension_numbers = #tpu.dot_dimension_numbers<[1], [0], [0], [1], [0, 0, 1, 1], [], []>} : vector<256x9xf32>, vector<9x64xf32>, vector<256x64xf32> -> vector<256x64xf32>
    %36 = arith.addf %30, %35 : vector<256x64xf32>
    %37 = vector.extract_strided_slice %23 {offsets = [2, 0, 0], sizes = [16, 16, 9], strides = [1, 1, 1]} : vector<18x16x9xf32> to vector<16x16x9xf32>
    %38 = vector.shape_cast %37 : vector<16x16x9xf32> to vector<256x9xf32>
    %c2 = arith.constant 2 : index
    %c0_45 = arith.constant 0 : index
    %c0_46 = arith.constant 0 : index
    %39 = vector.load %arg2[%c2, %c0_45, %c0_46] : memref<3x9x64xf32, #tpu.memory_space<vmem>>, vector<1x9x64xf32>
    %40 = vector.shape_cast %39 : vector<1x9x64xf32> to vector<9x64xf32>
    %cst_47 = arith.constant dense<0.000000e+00> : vector<256x64xf32>
    %41 = tpu.matmul %38, %40, %cst_47 {dimension_numbers = #tpu.dot_dimension_numbers<[1], [0], [0], [1], [0, 0, 1, 1], [], []>} : vector<256x9xf32>, vector<9x64xf32>, vector<256x64xf32> -> vector<256x64xf32>
    %42 = arith.addf %36, %41 : vector<256x64xf32>
    %c0_48 = arith.constant 0 : index
    %c0_49 = arith.constant 0 : index
    %43 = vector.load %arg3[%c0_48, %c0_49] : memref<1x64xf32, #tpu.memory_space<vmem>>, vector<1x64xf32>
    %44 = vector.broadcast %43 : vector<1x64xf32> to vector<256x64xf32>
    %45 = arith.addf %42, %44 : vector<256x64xf32>
    %cst_50 = arith.constant 0.000000e+00 : f32
    %46 = vector.broadcast %cst_50 : f32 to vector<256x64xf32>
    %47 = arith.maximumf %45, %46 : vector<256x64xf32>
    %48 = vector.shape_cast %47 : vector<256x64xf32> to vector<16x16x64xf32>
    %c1_51 = arith.constant 1 : index
    %c0_52 = arith.constant 0 : index
    %c64 = arith.constant 64 : index
    %49 = vector.load %arg8[%c1_51, %c0_52, %c64] : memref<18x16x192xf32, #tpu.memory_space<vmem>>, vector<16x16x64xf32>
    tpu.vector_store %arg8[%c1_51, %c0_52, %c64], %48 {strides = array<i32>} : memref<18x16x192xf32, #tpu.memory_space<vmem>>, vector<16x16x64xf32>,
    %50 = vector.extract_strided_slice %48 {offsets = [0, 0, 0], sizes = [16, 15, 64], strides = [1, 1, 1]} : vector<16x16x64xf32> to vector<16x15x64xf32>
    %c1_53 = arith.constant 1 : index
    %c1_54 = arith.constant 1 : index
    %c0_55 = arith.constant 0 : index
    %51 = vector.load %arg8[%c1_53, %c1_54, %c0_55] : memref<18x16x192xf32, #tpu.memory_space<vmem>>, vector<16x15x64xf32>
    tpu.vector_store %arg8[%c1_53, %c1_54, %c0_55], %50 {strides = array<i32>} : memref<18x16x192xf32, #tpu.memory_space<vmem>>, vector<16x15x64xf32>,
    %52 = vector.extract_strided_slice %48 {offsets = [0, 1, 0], sizes = [16, 15, 64], strides = [1, 1, 1]} : vector<16x16x64xf32> to vector<16x15x64xf32>
    %c1_56 = arith.constant 1 : index
    %c0_57 = arith.constant 0 : index
    %c128_58 = arith.constant 128 : index
    %53 = vector.load %arg8[%c1_56, %c0_57, %c128_58] : memref<18x16x192xf32, #tpu.memory_space<vmem>>, vector<16x15x64xf32>
    tpu.vector_store %arg8[%c1_56, %c0_57, %c128_58], %52 {strides = array<i32>} : memref<18x16x192xf32, #tpu.memory_space<vmem>>, vector<16x15x64xf32>,
    %cst_59 = arith.constant 0.000000e+00 : f32
    %54 = vector.broadcast %cst_59 : f32 to vector<256x128xf32>
    %c0_60 = arith.constant 0 : index
    %c0_61 = arith.constant 0 : index
    %c0_62 = arith.constant 0 : index
    %55 = vector.load %arg8[%c0_60, %c0_61, %c0_62] : memref<18x16x192xf32, #tpu.memory_space<vmem>>, vector<16x16x192xf32>
    %56 = vector.shape_cast %55 : vector<16x16x192xf32> to vector<256x192xf32>
    %c0_63 = arith.constant 0 : index
    %c0_64 = arith.constant 0 : index
    %c0_65 = arith.constant 0 : index
    %57 = vector.load %arg4[%c0_63, %c0_64, %c0_65] : memref<3x192x128xf32, #tpu.memory_space<vmem>>, vector<1x192x128xf32>
    %58 = vector.shape_cast %57 : vector<1x192x128xf32> to vector<192x128xf32>
    %cst_66 = arith.constant dense<0.000000e+00> : vector<256x128xf32>
    %59 = tpu.matmul %56, %58, %cst_66 {dimension_numbers = #tpu.dot_dimension_numbers<[1], [0], [0], [1], [0, 0, 1, 1], [], []>} : vector<256x192xf32>, vector<192x128xf32>, vector<256x128xf32> -> vector<256x128xf32>
    %60 = arith.addf %54, %59 : vector<256x128xf32>
    %c1_67 = arith.constant 1 : index
    %c0_68 = arith.constant 0 : index
    %c0_69 = arith.constant 0 : index
    %61 = vector.load %arg8[%c1_67, %c0_68, %c0_69] : memref<18x16x192xf32, #tpu.memory_space<vmem>>, vector<16x16x192xf32>
    %62 = vector.shape_cast %61 : vector<16x16x192xf32> to vector<256x192xf32>
    %c1_70 = arith.constant 1 : index
    %c0_71 = arith.constant 0 : index
    %c0_72 = arith.constant 0 : index
    %63 = vector.load %arg4[%c1_70, %c0_71, %c0_72] : memref<3x192x128xf32, #tpu.memory_space<vmem>>, vector<1x192x128xf32>
    %64 = vector.shape_cast %63 : vector<1x192x128xf32> to vector<192x128xf32>
    %cst_73 = arith.constant dense<0.000000e+00> : vector<256x128xf32>
    %65 = tpu.matmul %62, %64, %cst_73 {dimension_numbers = #tpu.dot_dimension_numbers<[1], [0], [0], [1], [0, 0, 1, 1], [], []>} : vector<256x192xf32>, vector<192x128xf32>, vector<256x128xf32> -> vector<256x128xf32>
    %66 = arith.addf %60, %65 : vector<256x128xf32>
    %c2_74 = arith.constant 2 : index
    %c0_75 = arith.constant 0 : index
    %c0_76 = arith.constant 0 : index
    %67 = vector.load %arg8[%c2_74, %c0_75, %c0_76] : memref<18x16x192xf32, #tpu.memory_space<vmem>>, vector<16x16x192xf32>
    %68 = vector.shape_cast %67 : vector<16x16x192xf32> to vector<256x192xf32>
    %c2_77 = arith.constant 2 : index
    %c0_78 = arith.constant 0 : index
    %c0_79 = arith.constant 0 : index
    %69 = vector.load %arg4[%c2_77, %c0_78, %c0_79] : memref<3x192x128xf32, #tpu.memory_space<vmem>>, vector<1x192x128xf32>
    %70 = vector.shape_cast %69 : vector<1x192x128xf32> to vector<192x128xf32>
    %cst_80 = arith.constant dense<0.000000e+00> : vector<256x128xf32>
    %71 = tpu.matmul %68, %70, %cst_80 {dimension_numbers = #tpu.dot_dimension_numbers<[1], [0], [0], [1], [0, 0, 1, 1], [], []>} : vector<256x192xf32>, vector<192x128xf32>, vector<256x128xf32> -> vector<256x128xf32>
    %72 = arith.addf %66, %71 : vector<256x128xf32>
    %c0_81 = arith.constant 0 : index
    %c0_82 = arith.constant 0 : index
    %73 = vector.load %arg5[%c0_81, %c0_82] : memref<1x128xf32, #tpu.memory_space<vmem>>, vector<1x128xf32>
    %74 = vector.broadcast %73 : vector<1x128xf32> to vector<256x128xf32>
    %75 = arith.addf %72, %74 : vector<256x128xf32>
    %cst_83 = arith.constant 0.000000e+00 : f32
    %76 = vector.broadcast %cst_83 : f32 to vector<256x128xf32>
    %77 = arith.maximumf %75, %76 : vector<256x128xf32>
    %78 = tpu.transpose %77, [1, 0] : vector<256x128xf32> -> vector<128x256xf32>
    %c0_84 = arith.constant 0 : index
    %c0_85 = arith.constant 0 : index
    %c0_86 = arith.constant 0 : index
    %79 = vector.load %arg6[%c0_84, %c0_85, %c0_86] : memref<1x128x256xf32, #tpu.memory_space<vmem>>, vector<1x128x256xf32>
    %80 = vector.shape_cast %79 : vector<1x128x256xf32> to vector<128x256xf32>
    %81 = vector.shape_cast %78 : vector<128x256xf32> to vector<1x128x256xf32>
    tpu.vector_store %arg6[%c0_84, %c0_85, %c0_86], %81 {strides = array<i32>} : memref<1x128x256xf32, #tpu.memory_space<vmem>>, vector<1x128x256xf32>,
    return
  }
  func.func @transform_0(%arg0: i32) -> (i32, i32, i32, i32) {
    %c0_i32 = arith.constant 0 : i32
    %c0_i32_0 = arith.constant 0 : i32
    %c0_i32_1 = arith.constant 0 : i32
    %c0_i32_2 = arith.constant 0 : i32
    return %arg0, %c0_i32, %c0_i32_0, %c0_i32_1 : i32, i32, i32, i32
  }
  func.func @transform_1(%arg0: i32) -> (i32, i32, i32) {
    %c0_i32 = arith.constant 0 : i32
    %c0_i32_0 = arith.constant 0 : i32
    %c0_i32_1 = arith.constant 0 : i32
    %c0_i32_2 = arith.constant 0 : i32
    return %c0_i32, %c0_i32_0, %c0_i32_1 : i32, i32, i32
  }
  func.func @transform_2(%arg0: i32) -> (i32, i32) {
    %c0_i32 = arith.constant 0 : i32
    %c0_i32_0 = arith.constant 0 : i32
    %c0_i32_1 = arith.constant 0 : i32
    return %c0_i32, %c0_i32_0 : i32, i32
  }
  func.func @transform_3(%arg0: i32) -> (i32, i32, i32) {
    %c0_i32 = arith.constant 0 : i32
    %c0_i32_0 = arith.constant 0 : i32
    %c0_i32_1 = arith.constant 0 : i32
    %c0_i32_2 = arith.constant 0 : i32
    return %c0_i32, %c0_i32_0, %c0_i32_1 : i32, i32, i32
  }
  func.func @transform_4(%arg0: i32) -> (i32, i32) {
    %c0_i32 = arith.constant 0 : i32
    %c0_i32_0 = arith.constant 0 : i32
    %c0_i32_1 = arith.constant 0 : i32
    return %c0_i32, %c0_i32_0 : i32, i32
  }
  func.func @transform_5(%arg0: i32) -> (i32, i32, i32) {
    %c0_i32 = arith.constant 0 : i32
    %c0_i32_0 = arith.constant 0 : i32
    %c0_i32_1 = arith.constant 0 : i32
    return %arg0, %c0_i32, %c0_i32_0 : i32, i32, i32
  }
}

</mosaic_0001>

<bundles_post_ra>
// kernel: encoder2_forward.1
= control target key start
LH: loop header
LB: loop body
LE: loop exit
PB: predicated region body
PF: predicated region fallthrough
CT: control target
= control target key end

     0   :  { %s4356_s18 = smov 0   ;;  %s6743_s0 = inlined_call_operand.vmem [shape: f32[2,16,16,3], index: 0, kind: input, shape index: {}]   ;;  %s6744_s1 = inlined_call_operand.vmem [shape: f32[3,9,64], index: 1, kind: input, shape index: {}]   ;;  %s6745_s2 = inlined_call_operand.vmem [shape: f32[1,64], index: 2, kind: input, shape index: {}]   ;;  %s6746_s3 = inlined_call_operand.vmem [shape: f32[3,192,128], index: 3, kind: input, shape index: {}]   ;;  %s6747_s4 = inlined_call_operand.vmem [shape: f32[1,128], index: 4, kind: input, shape index: {}]   ;;  %s6748_s5 = inlined_call_operand.vmem [shape: f32[2,128,256], index: 5, kind: output, shape index: {}]  }
   0x1 LB: > { %s3731_s19 = sadd.s32 4294967295, %s4320_s18   ;;  %p3735_p0 = scmp.ge.s32.totalorder %s4320_s18, 1  ;;  %s4320_s18 = sphi %s4356_s18, %s15_s18  }
   0x2   : > { %p187_p1 = scmp.lt.s32.totalorder %s4320_s18, 3 }
   0x4   : > { %p188_p2 = pnand %p3735_p0, %p187_p1 }
   0x5   : > { %p4366_p3 = scmp.lt.s32.totalorder (!%p188_p2), %s3731_s19, 1  ;;  %s4323_s25 = smov (!%p188_p2), 6  }
   0x6   : > { %191 = sbr.rel (%p188_p2) target bundleno = 1163 (0x48b), region = 40  ;;  %s4324_s26 = smov (!%p188_p2), 3  }
   0x7   : > { %s4325_s27 = smov (!%p188_p2), 64  }
   0xb   : > { %vm225_vm0 = vcmask 23552   ;;  %vm235_vm1 = vcmask 16384   ;;  %v4322_v0 = vmov 0.0   ;;  %s6773_s19 = smov (!%p4366_p3, %s3731_s19), 1  ;;  %vm228_vm2 = vcmask 17408  }
   0xc   : > { %236 = vst.msk [vmem:[#allocation2 + $0x18] sm:$0x1] %vm235_vm1, %v4322_v0  ;;  %237 = vst.msk [vmem:[#allocation2 + $0x30] sm:$0x1] %vm235_vm1, %v4322_v0  ;;  %s3991_s21 = sshll.u32 %s6773_s19, 8  ;;  %vm683_vm3 = vcmask 1045504  }
   0xd   : > { %226 = vst.msk [vmem:[#allocation2] sm:$0xff] %vm225_vm0, %v4322_v0  ;;  %227 = vst.msk [vmem:[#allocation2 + $0x8] sm:$0xff] %vm225_vm0, %v4322_v0  ;;  %s4455_s24 = scalar_lea.vmem %s6743_s0, %s3991_s21  ;;  %vm484_vm4 = vcmask 1046528   ;;  %vm1057_vm5 = vcmask 1040384   ;;  %vm918_vm6 = vcmask 48128   ;;  %vm960_vm7 = vcmask 72704   ;;  %s6706_s11 = scalar_lea.vmem %s6748_s5, %s3991_s21 }
   0xe   : > { %231 = vst.msk [vmem:[#allocation2 + $0x198] sm:$0xff] %vm225_vm0, %v4322_v0  ;;  %232 = vst.msk [vmem:[#allocation2 + $0x1a0] sm:$0xff] %vm225_vm0, %v4322_v0  ;;  %v312_v1 = vld [vmem:[%s4455_s24] sm:$0xff]  ;;  %v313_v2 = vld [vmem:[%s4455_s24 + $0x8] sm:$0xff]  ;;  %vm269_vm8 = vcmask 523264   ;;  %vm279_vm9 = vcmask 516096  }
   0xf   : > { %238 = vst.msk [vmem:[#allocation2 + $0x48] sm:$0x1] %vm235_vm1, %v4322_v0  ;;  %239 = vst.msk [vmem:[#allocation2 + $0x60] sm:$0x1] %vm235_vm1, %v4322_v0  ;;  %v314_v3 = vld [vmem:[%s4455_s24 + $0x10] sm:$0xff]  ;;  %v315_v4 = vld [vmem:[%s4455_s24 + $0x18] sm:$0xff] }
  0x10   : > { %240 = vst.msk [vmem:[#allocation2 + $0x78] sm:$0x1] %vm235_vm1, %v4322_v0  ;;  %241 = vst.msk [vmem:[#allocation2 + $0x90] sm:$0x1] %vm235_vm1, %v4322_v0  ;;  %v316_v5 = vld [vmem:[%s4455_s24 + $0x20] sm:$0xff]  ;;  %v317_v6 = vld [vmem:[%s4455_s24 + $0x28] sm:$0xff] }
  0x11   : > { %242 = vst.msk [vmem:[#allocation2 + $0xa8] sm:$0x1] %vm235_vm1, %v4322_v0  ;;  %243 = vst.msk [vmem:[#allocation2 + $0xc0] sm:$0x1] %vm235_vm1, %v4322_v0  ;;  %v318_v7 = vld [vmem:[%s4455_s24 + $0x30] sm:$0xff]  ;;  %v319_v8 = vld [vmem:[%s4455_s24 + $0x38] sm:$0xff] }
  0x12   : > { %244 = vst.msk [vmem:[#allocation2 + $0xd8] sm:$0x1] %vm235_vm1, %v4322_v0  ;;  %245 = vst.msk [vmem:[#allocation2 + $0xf0] sm:$0x1] %vm235_vm1, %v4322_v0  ;;  %v320_v9 = vld [vmem:[%s4455_s24 + $0x40] sm:$0xff]  ;;  %v321_v10 = vld [vmem:[%s4455_s24 + $0x48] sm:$0xff] }
  0x13   : > { %246 = vst.msk [vmem:[#allocation2 + $0x108] sm:$0x1] %vm235_vm1, %v4322_v0  ;;  %247 = vst.msk [vmem:[#allocation2 + $0x120] sm:$0x1] %vm235_vm1, %v4322_v0  ;;  %v322_v11 = vld [vmem:[%s4455_s24 + $0x50] sm:$0xff]  ;;  %v323_v12 = vld [vmem:[%s4455_s24 + $0x58] sm:$0xff] }
  0x14   : > { %248 = vst.msk [vmem:[#allocation2 + $0x138] sm:$0x1] %vm235_vm1, %v4322_v0  ;;  %249 = vst.msk [vmem:[#allocation2 + $0x150] sm:$0x1] %vm235_vm1, %v4322_v0  ;;  %v324_v13 = vld [vmem:[%s4455_s24 + $0x60] sm:$0xff]  ;;  %v325_v14 = vld [vmem:[%s4455_s24 + $0x68] sm:$0xff] }
  0x15   : > { %250 = vst.msk [vmem:[#allocation2 + $0x168] sm:$0x1] %vm235_vm1, %v4322_v0  ;;  %251 = vst.msk [vmem:[#allocation2 + $0x180] sm:$0x1] %vm235_vm1, %v4322_v0  ;;  %v326_v15 = vld [vmem:[%s4455_s24 + $0x70] sm:$0xff]  ;;  %v327_v16 = vld [vmem:[%s4455_s24 + $0x78] sm:$0xff] }
  0x16   : > { %252 = vst.msk [vmem:[#allocation2 + $0x29] sm:$0x1] %vm235_vm1, %v4322_v0  ;;  %253 = vst.msk [vmem:[#allocation2 + $0x41] sm:$0x1] %vm235_vm1, %v4322_v0  ;;  %v328_v17 = vld [vmem:[%s4455_s24 + $0x80] sm:$0xff]  ;;  %v329_v18 = vld [vmem:[%s4455_s24 + $0x88] sm:$0xff] }
  0x17   : > { %254 = vst.msk [vmem:[#allocation2 + $0x59] sm:$0x1] %vm235_vm1, %v4322_v0  ;;  %255 = vst.msk [vmem:[#allocation2 + $0x71] sm:$0x1] %vm235_vm1, %v4322_v0  ;;  %v330_v19 = vld [vmem:[%s4455_s24 + $0x90] sm:$0xff]  ;;  %v331_v20 = vld [vmem:[%s4455_s24 + $0x98] sm:$0xff] }
  0x18   : > { %256 = vst.msk [vmem:[#allocation2 + $0x89] sm:$0x1] %vm235_vm1, %v4322_v0  ;;  %257 = vst.msk [vmem:[#allocation2 + $0xa1] sm:$0x1] %vm235_vm1, %v4322_v0  ;;  %v332_v21 = vld [vmem:[%s4455_s24 + $0xa0] sm:$0xff]  ;;  %v333_v22 = vld [vmem:[%s4455_s24 + $0xa8] sm:$0xff] }
  0x19   : > { %258 = vst.msk [vmem:[#allocation2 + $0xb9] sm:$0x1] %vm235_vm1, %v4322_v0  ;;  %259 = vst.msk [vmem:[#allocation2 + $0xd1] sm:$0x1] %vm235_vm1, %v4322_v0  ;;  %v334_v23 = vld [vmem:[%s4455_s24 + $0xb0] sm:$0xff]  ;;  %v335_v24 = vld [vmem:[%s4455_s24 + $0xb8] sm:$0xff] }
  0x1a   : > { %260 = vst.msk [vmem:[#allocation2 + $0xe9] sm:$0x1] %vm235_vm1, %v4322_v0  ;;  %261 = vst.msk [vmem:[#allocation2 + $0x101] sm:$0x1] %vm235_vm1, %v4322_v0  ;;  %v336_v57 = vld [vmem:[%s4455_s24 + $0xc0] sm:$0xff]  ;;  %v337_v58 = vld [vmem:[%s4455_s24 + $0xc8] sm:$0xff] }
  0x1b   : > { %262 = vst.msk [vmem:[#allocation2 + $0x119] sm:$0x1] %vm235_vm1, %v4322_v0  ;;  %263 = vst.msk [vmem:[#allocation2 + $0x131] sm:$0x1] %vm235_vm1, %v4322_v0  ;;  %v338_v59 = vld [vmem:[%s4455_s24 + $0xd0] sm:$0xff]  ;;  %v339_v60 = vld [vmem:[%s4455_s24 + $0xd8] sm:$0xff] }
  0x1c   : > { %264 = vst.msk [vmem:[#allocation2 + $0x149] sm:$0x1] %vm235_vm1, %v4322_v0  ;;  %265 = vst.msk [vmem:[#allocation2 + $0x161] sm:$0x1] %vm235_vm1, %v4322_v0  ;;  %v340_v61 = vld [vmem:[%s4455_s24 + $0xe0] sm:$0xff]  ;;  %vm2215_vm10 = vcmask 522240  }
  0x1d   : > { %266 = vst.msk [vmem:[#allocation2 + $0x179] sm:$0x1] %vm235_vm1, %v4322_v0  ;;  %267 = vst.msk [vmem:[#allocation2 + $0x191] sm:$0x1] %vm235_vm1, %v4322_v0  ;;  %vm1988_vm11 = vcmask 1048064   ;;  %vm2101_vm12 = vcmask 523265  }
  0x1e   : > { %268 = vst [vmem:[#allocation3] sm:$0xff] %v4322_v0  ;;  %344 = vst.msk [vmem:[#allocation2 + $0x19] sm:$0xff] %vm225_vm0, %v312_v1  ;;  %v341_v1 = vld [vmem:[%s4455_s24 + $0xe8] sm:$0xff] }
  0x1f   : > { %345 = vst.msk [vmem:[#allocation2 + $0x21] sm:$0xff] %vm225_vm0, %v313_v2  ;;  %346 = vst.msk [vmem:[#allocation2 + $0x31] sm:$0xff] %vm225_vm0, %v314_v3  ;;  %v3741_v2 = vld [vmem:[%s6744_s1 + $0x18] sm:$0x1] }
  0x20   : > { %229 = vst.msk [vmem:[#allocation2 + $0x10] sm:$0x3] %vm228_vm2, %v4322_v0  ;;  %233 = vst.msk [vmem:[#allocation2 + $0x1a8] sm:$0x3] %vm228_vm2, %v4322_v0  ;;  %4095 = vmatprep.subr.msk.mxu0 %vm1057_vm5, %v3741_v2 }
  0x21   : > { %347 = vst.msk [vmem:[#allocation2 + $0x39] sm:$0xff] %vm225_vm0, %v315_v4  ;;  %348 = vst.msk [vmem:[#allocation2 + $0x49] sm:$0xff] %vm225_vm0, %v316_v5  ;;  %4096 = vmatpush3.msk.msra.mxu0 %vm1057_vm5, %v3741_v2 }
  0x22   : > { %349 = vst.msk [vmem:[#allocation2 + $0x51] sm:$0xff] %vm225_vm0, %v317_v6  ;;  %350 = vst.msk [vmem:[#allocation2 + $0x61] sm:$0xff] %vm225_vm0, %v318_v7  ;;  %v3740_v7 = vld [vmem:[%s6744_s1 + $0x10] sm:$0xff] }
  0x23   : > { %351 = vst.msk [vmem:[#allocation2 + $0x69] sm:$0xff] %vm225_vm0, %v319_v8  ;;  %352 = vst.msk [vmem:[#allocation2 + $0x79] sm:$0xff] %vm225_vm0, %v320_v9  ;;  %v342_v8 = vld [vmem:[%s4455_s24 + $0xf0] sm:$0xff]  ;;  %v343_v9 = vld [vmem:[%s4455_s24 + $0xf8] sm:$0xff]  ;;  %4097 = vmatprep.subr.mxu0 %v3740_v7 }
  0x24   : > { %353 = vst.msk [vmem:[#allocation2 + $0x81] sm:$0xff] %vm225_vm0, %v321_v10  ;;  %354 = vst.msk [vmem:[#allocation2 + $0x91] sm:$0xff] %vm225_vm0, %v322_v11  ;;  %4098 = vmatpush3.msra.mxu0 %v3740_v7 }
  0x25   : > { %355 = vst.msk [vmem:[#allocation2 + $0x99] sm:$0xff] %vm225_vm0, %v323_v12  ;;  %356 = vst.msk [vmem:[#allocation2 + $0xa9] sm:$0xff] %vm225_vm0, %v324_v13  ;;  %v4504_v25 = vld [vmem:[#allocation2 + $0x18] sm:$0xff] }
  0x26   : > { %357 = vst.msk [vmem:[#allocation2 + $0xb1] sm:$0xff] %vm225_vm0, %v325_v14  ;;  %358 = vst.msk [vmem:[#allocation2 + $0xc1] sm:$0xff] %vm225_vm0, %v326_v15  ;;  %v4506_v26 = vld [vmem:[#allocation2 + $0x20] sm:$0xff]  ;;  %v381_v27 = vld [vmem:[#allocation2 + $0x28] sm:$0x3]  ;;  %v689_v28 = vrot.slane %v4504_v25, 2 }
  0x27   : > { %359 = vst.msk [vmem:[#allocation2 + $0xc9] sm:$0xff] %vm225_vm0, %v327_v16  ;;  %360 = vst.msk [vmem:[#allocation2 + $0xd9] sm:$0xff] %vm225_vm0, %v328_v17  ;;  %v690_v29 = vrot.slane %v4506_v26, 2  ;;  %v490_v30 = vrot.slane %v4504_v25, 1  ;;  %v491_v31 = vrot.slane %v4506_v26, 1  ;;  %v692_v33 = vrot.slane %v381_v27, 2 }
  0x28   : > { %361 = vst.msk [vmem:[#allocation2 + $0xe1] sm:$0xff] %vm225_vm0, %v329_v18  ;;  %362 = vst.msk [vmem:[#allocation2 + $0xf1] sm:$0xff] %vm225_vm0, %v330_v19  ;;  %v4515_v32 = vld [vmem:[#allocation2 + $0x38] sm:$0xff]  ;;  %v493_v34 = vrot.slane %v381_v27, 1  ;;  %v384_v35 = vld [vmem:[#allocation2 + $0x40] sm:$0x3] }
  0x29   : > { %363 = vst.msk [vmem:[#allocation2 + $0xf9] sm:$0xff] %vm225_vm0, %v331_v20  ;;  %364 = vst.msk [vmem:[#allocation2 + $0x109] sm:$0xff] %vm225_vm0, %v332_v21  ;;  %v4517_v36 = vld [vmem:[#allocation2 + $0x30] sm:$0xff]  ;;  %v691_v37 = vsel %vm683_vm3, %v689_v28, %v690_v29  ;;  %v492_v38 = vsel %vm484_vm4, %v490_v30, %v491_v31  ;;  %v496_v39 = vrot.slane %v4515_v32, 1  ;;  %v693_v40 = vsel %vm683_vm3, %v690_v29, %v692_v33  ;;  %v387_v50 = vld [vmem:[#allocation2 + $0x58] sm:$0x3] }
  0x2a   : > { %365 = vst.msk [vmem:[#allocation2 + $0x111] sm:$0xff] %vm225_vm0, %v333_v22  ;;  %366 = vst.msk [vmem:[#allocation2 + $0x121] sm:$0xff] %vm225_vm0, %v334_v23  ;;  %778 = vrot.lane.b32.xlu1 %v691_v37, %s4323_s25  ;;  %579 = vrot.lane.b32.xlu0 %v492_v38, %s4324_s26  ;;  %v494_v41 = vsel %vm484_vm4, %v491_v31, %v493_v34  ;;  %v498_v42 = vrot.slane %v384_v35, 1  ;;  %v495_v43 = vrot.slane %v4517_v36, 1  ;;  %v695_v44 = vrot.slane %v4515_v32, 2  ;;  %v4533_v49 = vld [vmem:[#allocation2 + $0x50] sm:$0xff] }
  0x2b   : > { %367 = vst.msk [vmem:[#allocation2 + $0x129] sm:$0xff] %vm225_vm0, %v335_v24  ;;  %v697_v47 = vrot.slane %v384_v35, 2  ;;  %v694_v48 = vrot.slane %v4517_v36, 2  ;;  %v4535_v51 = vld [vmem:[#allocation2 + $0x48] sm:$0xff]  ;;  %v501_v52 = vrot.slane %v4533_v49, 1  ;;  %v503_v55 = vrot.slane %v387_v50, 1 }
  0x2c   : > { %v499_v45 = vsel %vm484_vm4, %v496_v39, %v498_v42  ;;  %v497_v46 = vsel %vm484_vm4, %v495_v43, %v496_v39  ;;  %v500_v56 = vrot.slane %v4535_v51, 1  ;;  %368 = vst.msk [vmem:[#allocation2 + $0x139] sm:$0xff] %vm225_vm0, %v336_v57  ;;  %369 = vst.msk [vmem:[#allocation2 + $0x141] sm:$0xff] %vm225_vm0, %v337_v58  ;;  %v700_v62 = vrot.slane %v4533_v49, 2  ;;  %v4553_v63 = vld [vmem:[#allocation2 + $0x68] sm:$0xff]  ;;  %v4572_v11 = vld [vmem:[#allocation2 + $0x60] sm:$0xff] }
  0x2d   : > { %v698_v53 = vsel %vm683_vm3, %v695_v44, %v697_v47  ;;  %v696_v54 = vsel %vm683_vm3, %v694_v48, %v695_v44  ;;  %370 = vst.msk [vmem:[#allocation2 + $0x151] sm:$0xff] %vm225_vm0, %v338_v59  ;;  %371 = vst.msk [vmem:[#allocation2 + $0x159] sm:$0xff] %vm225_vm0, %v339_v60  ;;  %v504_v3 = vsel %vm484_vm4, %v501_v52, %v503_v55  ;;  %v702_v5 = vrot.slane %v387_v50, 2  ;;  %v390_v10 = vld [vmem:[#allocation2 + $0x70] sm:$0x3]  ;;  %v4589_v22 = vld [vmem:[#allocation2 + $0x80] sm:$0xff] }
  0x2e   : > { %780 = vrot.lane.b32.xlu1 %v693_v40, %s4323_s25  ;;  %581 = vrot.lane.b32.xlu0 %v494_v41, %s4324_s26  ;;  %372 = vst.msk [vmem:[#allocation2 + $0x169] sm:$0xff] %vm225_vm0, %v340_v61  ;;  %v502_v4 = vsel %vm484_vm4, %v500_v56, %v501_v52  ;;  %v699_v6 = vrot.slane %v4535_v51, 2  ;;  %373 = vst.msk [vmem:[#allocation2 + $0x171] sm:$0xff] %vm225_vm0, %v341_v1  ;;  %v506_v12 = vrot.slane %v4553_v63, 1  ;;  %v508_v15 = vrot.slane %v390_v10, 1  ;;  %v4591_v24 = vld [vmem:[#allocation2 + $0x78] sm:$0xff] }
  0x2f   : > { %374 = vst.msk [vmem:[#allocation2 + $0x181] sm:$0xff] %vm225_vm0, %v342_v8  ;;  %375 = vst.msk [vmem:[#allocation2 + $0x189] sm:$0xff] %vm225_vm0, %v343_v9  ;;  %v703_v13 = vsel %vm683_vm3, %v700_v62, %v702_v5  ;;  %v505_v16 = vrot.slane %v4572_v11, 1  ;;  %v705_v17 = vrot.slane %v4553_v63, 2  ;;  %v707_v20 = vrot.slane %v390_v10, 2  ;;  %v4605_v39 = vld [vmem:[#allocation2 + $0x98] sm:$0xff] }
  0x30   : > { %v701_v14 = vsel %vm683_vm3, %v699_v6, %v700_v62  ;;  %v509_v18 = vsel %vm484_vm4, %v506_v12, %v508_v15  ;;  %v704_v21 = vrot.slane %v4572_v11, 2  ;;  %v393_v23 = vld [vmem:[#allocation2 + $0x88] sm:$0x3]  ;;  %v511_v27 = vrot.slane %v4589_v22, 1  ;;  %v396_v40 = vld [vmem:[#allocation2 + $0xa0] sm:$0x3] }
  0x31   : > { %v507_v19 = vsel %vm484_vm4, %v505_v16, %v506_v12  ;;  %v708_v28 = vsel %vm683_vm3, %v705_v17, %v707_v20  ;;  %v513_v30 = vrot.slane %v393_v23, 1  ;;  %v510_v31 = vrot.slane %v4591_v24, 1  ;;  %v4607_v41 = vld [vmem:[#allocation2 + $0x90] sm:$0xff]  ;;  %v399_v55 = vld [vmem:[#allocation2 + $0xb8] sm:$0x3]  ;;  %v4623_v56 = vld [vmem:[#allocation2 + $0xa8] sm:$0xff] }
  0x32   : > { %585 = vrot.lane.b32.xlu1 %v499_v45, %s4324_s26  ;;  %583 = vrot.lane.b32.xlu0 %v497_v46, %s4324_s26  ;;  %v706_v29 = vsel %vm683_vm3, %v704_v21, %v705_v17  ;;  %v710_v33 = vrot.slane %v4589_v22, 2  ;;  %v712_v37 = vrot.slane %v393_v23, 2  ;;  %v709_v38 = vrot.slane %v4591_v24, 2  ;;  %v4637_v5 = vld [vmem:[#allocation2 + $0xc8] sm:$0xff]  ;;  %v402_v6 = vld [vmem:[#allocation2 + $0xd0] sm:$0x3] }
  0x33   : > { %v514_v34 = vsel %vm484_vm4, %v511_v27, %v513_v30  ;;  %v512_v35 = vsel %vm484_vm4, %v510_v31, %v511_v27  ;;  %v516_v42 = vrot.slane %v4605_v39, 1  ;;  %v518_v45 = vrot.slane %v396_v40, 1  ;;  %v4639_v7 = vld [vmem:[#allocation2 + $0xc0] sm:$0xff]  ;;  %v405_v20 = vld [vmem:[#allocation2 + $0xe8] sm:$0x3]  ;;  %v4655_v21 = vld [vmem:[#allocation2 + $0xd8] sm:$0xff] }
  0x34   : > { %v713_v43 = vsel %vm683_vm3, %v710_v33, %v712_v37  ;;  %v711_v44 = vsel %vm683_vm3, %v709_v38, %v710_v33  ;;  %v515_v46 = vrot.slane %v4607_v41, 1  ;;  %v715_v47 = vrot.slane %v4605_v39, 2  ;;  %v4666_v31 = vld [vmem:[%s6744_s1 + $0x28] sm:$0x1] }
  0x35   : > { %v519_v48 = vsel %vm484_vm4, %v516_v42, %v518_v45  ;;  %v717_v52 = vrot.slane %v396_v40, 2  ;;  %v523_v60 = vrot.slane %v399_v55, 1  ;;  %v520_v61 = vrot.slane %v4623_v56, 1  ;;  %4199 = vmatprep.subr.msk.mxu0 %vm1057_vm5, %v4666_v31  ;;  %v4676_v40 = vld [vmem:[#allocation2 + $0xf8] sm:$0xff] }
  0x36   : > { %784 = vrot.lane.b32.xlu1 %v698_v53, %s4323_s25  ;;  %782 = vrot.lane.b32.xlu0 %v696_v54, %s4323_s25  ;;  %v517_v50 = vsel %vm484_vm4, %v515_v46, %v516_v42  ;;  %v714_v53 = vrot.slane %v4607_v41, 2  ;;  %v4621_v54 = vld [vmem:[#allocation2 + $0xb0] sm:$0xff]  ;;  %v526_v8 = vrot.slane %v4637_v5, 1  ;;  %v528_v12 = vrot.slane %v402_v6, 1  ;;  %v408_v42 = vld [vmem:[#allocation2 + $0x100] sm:$0x3] }
  0x37   : > { %v521_v57 = vrot.slane %v4621_v54, 1  ;;  %v718_v58 = vsel %vm683_vm3, %v715_v47, %v717_v52  ;;  %v720_v62 = vrot.slane %v4621_v54, 2  ;;  %v727_v17 = vrot.slane %v402_v6, 2 }
  0x38   : > { %v716_v59 = vsel %vm683_vm3, %v714_v53, %v715_v47  ;;  %v529_v15 = vsel %vm484_vm4, %v526_v8, %v528_v12  ;;  %v530_v30 = vrot.slane %v4655_v21, 1  ;;  %v732_v37 = vrot.slane %v405_v20, 2  ;;  %v4708_v12 = vld [vmem:[#allocation2 + $0x128] sm:$0xff] }
  0x39   : > { %v524_v1 = vsel %vm484_vm4, %v521_v57, %v523_v60  ;;  %v522_v2 = vsel %vm484_vm4, %v520_v61, %v521_v57  ;;  %v729_v38 = vrot.slane %v4655_v21, 2  ;;  %v538_v47 = vrot.slane %v408_v42, 1  ;;  %v4694_v60 = vld [vmem:[#allocation2 + $0x108] sm:$0xff] }
  0x3a   : > { %589 = vrot.lane.b32.xlu1 %v504_v3, %s4324_s26  ;;  %587 = vrot.lane.b32.xlu0 %v502_v4, %s4324_s26  ;;  %v722_v3 = vrot.slane %v399_v55, 2  ;;  %v719_v4 = vrot.slane %v4623_v56, 2  ;;  %v737_v55 = vrot.slane %v408_v42, 2 }
  0x3c   : > { %v723_v9 = vsel %vm683_vm3, %v720_v62, %v722_v3  ;;  %v721_v10 = vsel %vm683_vm3, %v719_v4, %v720_v62  ;;  %v540_v3 = vrot.slane %v4694_v60, 1 }
  0x3e   : > { %788 = vrot.lane.b32.xlu1 %v703_v13, %s4323_s25  ;;  %786 = vrot.lane.b32.xlu0 %v701_v14, %s4323_s25  ;;  %v525_v13 = vrot.slane %v4639_v7, 1  ;;  %v725_v14 = vrot.slane %v4637_v5, 2 }
  0x40   : > { %v527_v16 = vsel %vm484_vm4, %v525_v13, %v526_v8  ;;  %v728_v27 = vsel %vm683_vm3, %v725_v14, %v727_v17  ;;  %v414_v13 = vld [vmem:[#allocation2 + $0x130] sm:$0x3] }
  0x42   : > { %593 = vrot.lane.b32.xlu1 %v509_v18, %s4324_s26  ;;  %591 = vrot.lane.b32.xlu0 %v507_v19, %s4324_s26  ;;  %v724_v18 = vrot.slane %v4639_v7, 2  ;;  %v4653_v19 = vld [vmem:[#allocation2 + $0xe0] sm:$0xff] }
  0x43   : > { %v531_v23 = vrot.slane %v4653_v19, 1  ;;  %v730_v33 = vrot.slane %v4653_v19, 2 }
  0x45   : > { %v733_v45 = vsel %vm683_vm3, %v730_v33, %v732_v37  ;;  %v731_v46 = vsel %vm683_vm3, %v729_v38, %v730_v33  ;;  %v4724_v33 = vld [vmem:[#allocation2 + $0x140] sm:$0xff] }
  0x46   : > { %792 = vrot.lane.b32.xlu1 %v708_v28, %s4323_s25  ;;  %790 = vrot.lane.b32.xlu0 %v706_v29, %s4323_s25  ;;  %v726_v28 = vsel %vm683_vm3, %v724_v18, %v725_v14  ;;  %v533_v29 = vrot.slane %v405_v20, 1  ;;  %v4710_v14 = vld [vmem:[#allocation2 + $0x120] sm:$0xff]  ;;  %v548_v18 = vrot.slane %v414_v13, 1  ;;  %v551_v37 = vrot.slane %v4724_v33, 1 }
  0x47   : > { %v545_v20 = vrot.slane %v4710_v14, 1 }
  0x4a   : > { %597 = vrot.lane.b32.xlu1 %v514_v34, %s4324_s26  ;;  %595 = vrot.lane.b32.xlu0 %v512_v35, %s4324_s26  ;;  %v534_v34 = vsel %vm484_vm4, %v531_v23, %v533_v29  ;;  %v532_v35 = vsel %vm484_vm4, %v530_v30, %v531_v23  ;;  %v745_v23 = vrot.slane %v4708_v12, 2  ;;  %v747_v29 = vrot.slane %v414_v13, 2  ;;  %v423_v13 = vld [vmem:[#allocation2 + $0x178] sm:$0x3] }
  0x4b   : > { %v744_v30 = vrot.slane %v4710_v14, 2 }
  0x4c   : > { %v748_v38 = vsel %vm683_vm3, %v745_v23, %v747_v29 }
  0x4d   : > { %v746_v42 = vsel %vm683_vm3, %v744_v30, %v745_v23  ;;  %v762_v30 = vrot.slane %v423_v13, 2 }
  0x4e   : > { %796 = vrot.lane.b32.xlu1 %v713_v43, %s4323_s25  ;;  %794 = vrot.lane.b32.xlu0 %v711_v44, %s4323_s25  ;;  %v4678_v43 = vld [vmem:[#allocation2 + $0xf0] sm:$0xff]  ;;  %v536_v44 = vrot.slane %v4676_v40, 1 }
  0x4f   : > { %v734_v57 = vrot.slane %v4678_v43, 2 }
  0x50   : > { %v539_v52 = vsel %vm484_vm4, %v536_v44, %v538_v47 }
  0x52   : > { %601 = vrot.lane.b32.xlu1 %v519_v48, %s4324_s26  ;;  %599 = vrot.lane.b32.xlu0 %v517_v50, %s4324_s26  ;;  %v535_v48 = vrot.slane %v4678_v43, 1  ;;  %v735_v50 = vrot.slane %v4676_v40, 2 }
  0x54   : > { %v537_v53 = vsel %vm484_vm4, %v535_v48, %v536_v44  ;;  %v738_v62 = vsel %vm683_vm3, %v735_v50, %v737_v55  ;;  %v420_v55 = vld [vmem:[#allocation2 + $0x160] sm:$0x3] }
  0x56   : > { %800 = vrot.lane.b32.xlu1 %v718_v58, %s4323_s25  ;;  %798 = vrot.lane.b32.xlu0 %v716_v59, %s4323_s25  ;;  %v4692_v58 = vld [vmem:[#allocation2 + $0x110] sm:$0xff]  ;;  %v411_v59 = vld [vmem:[#allocation2 + $0x118] sm:$0x3] }
  0x57   : > { %v541_v61 = vrot.slane %v4692_v58, 1  ;;  %v740_v4 = vrot.slane %v4692_v58, 2 }
  0x59   : > { %v542_v8 = vsel %vm484_vm4, %v540_v3, %v541_v61 }
  0x5a   : > { %605 = vrot.lane.b32.xlu1 %v524_v1, %s4324_s26  ;;  %603 = vrot.lane.b32.xlu0 %v522_v2, %s4324_s26  ;;  %v736_v1 = vsel %vm683_vm3, %v734_v57, %v735_v50  ;;  %v543_v2 = vrot.slane %v411_v59, 1  ;;  %v4742_v57 = vld [vmem:[#allocation2 + $0x150] sm:$0xff] }
  0x5c   : > { %v544_v6 = vsel %vm484_vm4, %v541_v61, %v543_v2  ;;  %v555_v2 = vrot.slane %v4742_v57, 1 }
  0x5e   : > { %804 = vrot.lane.b32.xlu1 %v723_v9, %s4323_s25  ;;  %802 = vrot.lane.b32.xlu0 %v721_v10, %s4323_s25  ;;  %v742_v9 = vrot.slane %v411_v59, 2  ;;  %v739_v10 = vrot.slane %v4694_v60, 2 }
  0x60   : > { %v741_v17 = vsel %vm683_vm3, %v739_v10, %v740_v4  ;;  %v4756_v10 = vld [vmem:[#allocation2 + $0x170] sm:$0xff] }
  0x62   : > { %609 = vrot.lane.b32.xlu1 %v529_v15, %s4324_s26  ;;  %607 = vrot.lane.b32.xlu0 %v527_v16, %s4324_s26  ;;  %v546_v15 = vrot.slane %v4708_v12, 1  ;;  %v743_v16 = vsel %vm683_vm3, %v740_v4, %v742_v9  ;;  %v754_v9 = vrot.slane %v4742_v57, 2 }
  0x66   : > { %808 = vrot.lane.b32.xlu1 %v728_v27, %s4323_s25  ;;  %806 = vrot.lane.b32.xlu0 %v726_v28, %s4323_s25  ;;  %v549_v27 = vsel %vm484_vm4, %v546_v15, %v548_v18  ;;  %v547_v28 = vsel %vm484_vm4, %v545_v20, %v546_v15  ;;  %v4758_v15 = vld [vmem:[#allocation2 + $0x168] sm:$0xff]  ;;  %v563_v20 = vrot.slane %v423_v13, 1 }
  0x67   : > { %v560_v23 = vrot.slane %v4758_v15, 1 }
  0x6a   : > { %613 = vrot.lane.b32.xlu1 %v534_v34, %s4324_s26  ;;  %611 = vrot.lane.b32.xlu0 %v532_v35, %s4324_s26  ;;  %v417_v34 = vld [vmem:[#allocation2 + $0x148] sm:$0x3]  ;;  %v4726_v35 = vld [vmem:[#allocation2 + $0x138] sm:$0xff] }
  0x6b   : > { %v553_v44 = vrot.slane %v417_v34, 1  ;;  %v752_v50 = vrot.slane %v417_v34, 2  ;;  %v759_v34 = vrot.slane %v4758_v15, 2 }
  0x6d   : > { %v554_v47 = vsel %vm484_vm4, %v551_v37, %v553_v44 }
  0x6e   : > { %812 = vrot.lane.b32.xlu1 %v733_v45, %s4323_s25  ;;  %810 = vrot.lane.b32.xlu0 %v731_v46, %s4323_s25  ;;  %v550_v45 = vrot.slane %v4726_v35, 1  ;;  %v750_v46 = vrot.slane %v4724_v33, 2 }
  0x70   : > { %v552_v48 = vsel %vm484_vm4, %v550_v45, %v551_v37  ;;  %v753_v61 = vsel %vm683_vm3, %v750_v46, %v752_v50  ;;  %v4772_v37 = vld [vmem:[#allocation2 + $0x188] sm:$0xff]  ;;  %v4782_v50 = vld [vmem:[#allocation2] sm:$0xff] }
  0x71   : > { %v566_v44 = vrot.slane %v4772_v37, 1 }
  0x72   : > { %617 = vrot.lane.b32.xlu1 %v539_v52, %s4324_s26  ;;  %615 = vrot.lane.b32.xlu0 %v537_v53, %s4324_s26  ;;  %v749_v52 = vrot.slane %v4726_v35, 2  ;;  %v4740_v53 = vld [vmem:[#allocation2 + $0x158] sm:$0xff] }
  0x73   : > { %v556_v59 = vrot.slane %v4740_v53, 1  ;;  %v755_v3 = vrot.slane %v4740_v53, 2 }
  0x75   : > { %v756_v18 = vsel %vm683_vm3, %v754_v9, %v755_v3 }
  0x76   : > { %816 = vrot.lane.b32.xlu1 %v738_v62, %s4323_s25  ;;  %814 = vrot.lane.b32.xlu0 %v736_v1, %s4323_s25  ;;  %v751_v62 = vsel %vm683_vm3, %v749_v52, %v750_v46  ;;  %v558_v1 = vrot.slane %v420_v55, 1  ;;  %v4784_v52 = vld [vmem:[#allocation2 + $0x8] sm:$0xff] }
  0x78   : > { %v559_v4 = vsel %vm484_vm4, %v556_v59, %v558_v1  ;;  %v485_v1 = vrot.slane %v4782_v50, 1 }
  0x7a   : > { %621 = vrot.lane.b32.xlu1 %v544_v6, %s4324_s26  ;;  %619 = vrot.lane.b32.xlu0 %v542_v8, %s4324_s26  ;;  %v557_v6 = vsel %vm484_vm4, %v555_v2, %v556_v59  ;;  %v757_v8 = vrot.slane %v420_v55, 2  ;;  %v486_v2 = vrot.slane %v4784_v52, 1 }
  0x7e   : > { %820 = vrot.lane.b32.xlu1 %v743_v16, %s4323_s25  ;;  %818 = vrot.lane.b32.xlu0 %v741_v17, %s4323_s25  ;;  %v561_v16 = vrot.slane %v4756_v10, 1  ;;  %v758_v17 = vsel %vm683_vm3, %v755_v3, %v757_v8  ;;  %v956_v3 = vld [vmem:[%s6744_s1 + $0x8] sm:$0x1]  ;;  %v765_v8 = vrot.slane %v4772_v37, 2 }
  0x7f   : > { %4147 = vmatprep.subr.msk.mxu1 %vm1057_vm5, %v956_v3 }
  0x80   : > { %v562_v29 = vsel %vm484_vm4, %v560_v23, %v561_v16  ;;  %4148 = vmatpush3.msk.msra.mxu1 %vm1057_vm5, %v956_v3  ;;  %v3808_v23 = vld [vmem:[%s6744_s1 + $0x20] sm:$0xff] }
  0x82   : > { %625 = vrot.lane.b32.xlu1 %v549_v27, %s4324_s26  ;;  %623 = vrot.lane.b32.xlu0 %v547_v28, %s4324_s26  ;;  %v760_v27 = vrot.slane %v4756_v10, 2  ;;  %v564_v28 = vsel %vm484_vm4, %v561_v16, %v563_v20  ;;  %v378_v16 = vld [vmem:[#allocation2 + $0x10] sm:$0x3] }
  0x84   : > { %v763_v45 = vsel %vm683_vm3, %v760_v27, %v762_v30  ;;  %v761_v46 = vsel %vm683_vm3, %v759_v34, %v760_v27 }
  0x86   : > { %824 = vrot.lane.b32.xlu1 %v748_v38, %s4323_s25  ;;  %822 = vrot.lane.b32.xlu0 %v746_v42, %s4323_s25  ;;  %v426_v38 = vld [vmem:[#allocation2 + $0x190] sm:$0x3]  ;;  %v4774_v42 = vld [vmem:[#allocation2 + $0x180] sm:$0xff] }
  0x8a   : > { %629 = vrot.lane.b32.xlu1 %v554_v47, %s4324_s26  ;;  %627 = vrot.lane.b32.xlu0 %v552_v48, %s4324_s26  ;;  %v568_v47 = vrot.slane %v426_v38, 1  ;;  %v565_v48 = vrot.slane %v4774_v42, 1 }
  0x8e   : > { %828 = vrot.lane.b32.xlu1 %v753_v61, %s4323_s25  ;;  %826 = vrot.lane.b32.xlu0 %v751_v62, %s4323_s25 }
  0x92   : > { %633 = vrot.lane.b32.xlu1 %v559_v4, %s4324_s26  ;;  %631 = vrot.lane.b32.xlu0 %v557_v6, %s4324_s26  ;;  %v567_v4 = vsel %vm484_vm4, %v565_v48, %v566_v44  ;;  %v764_v6 = vrot.slane %v4774_v42, 2 }
  0x94   : > { %v766_v27 = vsel %vm683_vm3, %v764_v6, %v765_v8 }
  0x96   : > { %832 = vrot.lane.b32.xlu1 %v758_v17, %s4323_s25  ;;  %830 = vrot.lane.b32.xlu0 %v756_v18, %s4323_s25  ;;  %v955_v18 = vld [vmem:[%s6744_s1] sm:$0xff] }
  0x97   : > { %4149 = vmatprep.subr.mxu1 %v955_v18 }
  0x98   : > { %4150 = vmatpush3.msra.mxu1 %v955_v18 }
  0x99   : > { %2520 = vmatprep.subr.mxu1 %v4322_v0 }
  0x9a   : > { %637 = vrot.lane.b32.xlu1 %v564_v28, %s4324_s26  ;;  %635 = vrot.lane.b32.xlu0 %v562_v29, %s4324_s26  ;;  %v488_v28 = vrot.slane %v378_v16, 1  ;;  %v767_v29 = vrot.slane %v426_v38, 2 }
  0x9c   : > { %v779_v55 = vpop.permute.xlu1 %778  ;;  %v580_v59 = vpop.permute.xlu0 %579  ;;  %v768_v38 = vsel %vm683_vm3, %v765_v8, %v767_v29 }
  0x9d   : > { %v884_v61 = vsel %vm225_vm0, %v4504_v25, %v580_v59  ;;  %v569_v25 = vsel %vm484_vm4, %v566_v44, %v568_v47  ;;  %v685_v44 = vrot.slane %v4784_v52, 2  ;;  %v684_v47 = vrot.slane %v4782_v50, 2 }
  0x9e   : > { %836 = vrot.lane.b32.xlu1 %v763_v45, %s4323_s25  ;;  %834 = vrot.lane.b32.xlu0 %v761_v46, %s4323_s25  ;;  %v4791_v62 = vsel %vm918_vm6, %v884_v61, %v779_v55  ;;  %v489_v45 = vsel %vm484_vm4, %v486_v2, %v488_v28  ;;  %v687_v46 = vrot.slane %v378_v16, 2  ;;  %v4836_v61 = vld [vmem:[#allocation2 + $0x198] sm:$0xff] }
  0x9f   : > { %4099 = vmatprep.mubr.msk.f32.mxu0 %vm960_vm7, %v4791_v62  ;;  %v769_v16 = vrot.slane %v4836_v61, 2 }
  0xa0   : > { %v781_v9 = vpop.permute.xlu1 %780  ;;  %v582_v13 = vpop.permute.xlu0 %581 }
  0xa1   : > { %v885_v17 = vsel %vm225_vm0, %v4506_v26, %v582_v13  ;;  %v487_v26 = vsel %vm484_vm4, %v485_v1, %v486_v2  ;;  %v4838_v1 = vld [vmem:[#allocation2 + $0x1a0] sm:$0xff] }
  0xa2   : > { %641 = vrot.lane.b32.xlu1 %v569_v25, %s4324_s26  ;;  %639 = vrot.lane.b32.xlu0 %v567_v4, %s4324_s26  ;;  %v4814_v20 = vsel %vm918_vm6, %v885_v17, %v781_v9  ;;  %v429_v25 = vld [vmem:[#allocation2 + $0x1a8] sm:$0x3]  ;;  %v571_v4 = vrot.slane %v4838_v1, 1  ;;  %v770_v17 = vrot.slane %v4838_v1, 2 }
  0xa3   : > { %4100 = vmatmul.mubr.msk.f32.vlgmr.msra.gmra.mxu0 %vm960_vm7, %v4814_v20  ;;  %v573_v9 = vrot.slane %v429_v25, 1  ;;  %v772_v29 = vrot.slane %v429_v25, 2 }
  0xa4   : > { %v586_v30 = vpop.permute.xlu1 %585  ;;  %v584_v34 = vpop.permute.xlu0 %583  ;;  %4200 = vmatpush3.msk.msra.mxu0 %vm1057_vm5, %v4666_v31 }
  0xa5   : > { %4201 = vmatprep.subr.mxu0 %v3808_v23  ;;  %v887_v31 = vsel %vm225_vm0, %v4515_v32, %v586_v30  ;;  %v886_v48 = vsel %vm225_vm0, %v4517_v36, %v584_v34  ;;  %v688_v32 = vsel %vm683_vm3, %v685_v44, %v687_v46  ;;  %v686_v36 = vsel %vm683_vm3, %v684_v47, %v685_v44 }
  0xa6   : > { %575 = vrot.lane.b32.xlu1 %v487_v26, %s4324_s26  ;;  %838 = vrot.lane.b32.xlu0 %v766_v27, %s4323_s25  ;;  %v574_v28 = vsel %vm484_vm4, %v571_v4, %v573_v9 }
  0xa7   : > { %4202 = vmatpush3.msra.mxu0 %v3808_v23 }
  0xa8   : > { %v785_v55 = vpop.permute.xlu1 %784  ;;  %v783_v59 = vpop.permute.xlu0 %782  ;;  %2841 = vmatprep.subr.mxu0 %v4322_v0  ;;  %v570_v0 = vrot.slane %v4836_v61, 1 }
  0xa9   : > { %v4842_v2 = vsel %vm918_vm6, %v887_v31, %v785_v55  ;;  %v4845_v3 = vsel %vm918_vm6, %v886_v48, %v783_v59 }
  0xaa   : > { %577 = vrot.lane.b32.xlu1 %v489_v45, %s4324_s26  ;;  %840 = vrot.lane.b32.xlu0 %v768_v38, %s4323_s25  ;;  %v572_v13 = vsel %vm484_vm4, %v570_v0, %v571_v4  ;;  %v773_v45 = vsel %vm683_vm3, %v770_v17, %v772_v29 }
  0xab   : > { %4102 = vmatprep.mubr.msk.f32.mxu0 %vm960_vm7, %v4845_v3 }
  0xac   : > { %4103 = vmatmul.mubr.msk.f32.gmra.mxu0 %vm960_vm7, %v4842_v2  ;;  %v590_v6 = vpop.permute.xlu1 %589  ;;  %v588_v8 = vpop.permute.xlu0 %587 }
  0xad   : > { %v889_v18 = vsel %vm225_vm0, %v4533_v49, %v590_v6  ;;  %v888_v23 = vsel %vm225_vm0, %v4535_v51, %v588_v8  ;;  %v771_v49 = vsel %vm683_vm3, %v769_v16, %v770_v17 }
  0xae   : > { %776 = vrot.lane.b32.xlu1 %v688_v32, %s4323_s25  ;;  %774 = vrot.lane.b32.xlu0 %v686_v36, %s4323_s25 }
  0xb0   : > { %v789_v26 = vpop.permute.xlu1 %788  ;;  %v787_v27 = vpop.permute.xlu0 %786 }
  0xb1   : > { %v4868_v30 = vsel %vm918_vm6, %v889_v18, %v789_v26  ;;  %v4871_v34 = vsel %vm918_vm6, %v888_v23, %v787_v27 }
  0xb2   : > { %4105 = vmatprep.mubr.msk.f32.mxu0 %vm960_vm7, %v4871_v34  ;;  %643 = vrot.lane.b32.xlu0 %v572_v13, %s4324_s26 }
  0xb3   : > { %4106 = vmatmul.mubr.msk.f32.gmra.mxu0 %vm960_vm7, %v4868_v30  ;;  %645 = vrot.lane.b32.xlu1 %v574_v28, %s4324_s26 }
  0xb4   : > { %v594_v51 = vpop.permute.xlu1 %593  ;;  %v592_v44 = vpop.permute.xlu0 %591 }
  0xb5   : > { %v891_v38 = vsel %vm225_vm0, %v4553_v63, %v594_v51  ;;  %v890_v46 = vsel %vm225_vm0, %v4572_v11, %v592_v44 }
  0xb6   : > { %842 = vrot.lane.b32.xlu0 %v771_v49, %s4323_s25 }
  0xb7   : > { %844 = vrot.lane.b32.xlu1 %v773_v45, %s4323_s25 }
  0xb8   : > { %v793_v47 = vpop.permute.xlu1 %792  ;;  %v791_v31 = vpop.permute.xlu0 %790 }
  0xb9   : > { %v4888_v48 = vsel %vm918_vm6, %v891_v38, %v793_v47  ;;  %v4891_v55 = vsel %vm918_vm6, %v890_v46, %v791_v31 }
  0xba   : > { %4108 = vmatprep.mubr.msk.f32.mxu0 %vm960_vm7, %v4891_v55 }
  0xbb   : > { %4109 = vmatmul.mubr.msk.f32.gmra.mxu0 %vm960_vm7, %v4888_v48 }
  0xbc   : > { %v598_v59 = vpop.permute.xlu1 %597  ;;  %v596_v25 = vpop.permute.xlu0 %595 }
  0xbd   : > { %v893_v63 = vsel %vm225_vm0, %v4589_v22, %v598_v59  ;;  %v892_v11 = vsel %vm225_vm0, %v4591_v24, %v596_v25 }
  0xc0   : > { %v797_v32 = vpop.permute.xlu1 %796  ;;  %v795_v36 = vpop.permute.xlu0 %794 }
  0xc1   : > { %v4902_v0 = vsel %vm918_vm6, %v893_v63, %v797_v32  ;;  %v4905_v4 = vsel %vm918_vm6, %v892_v11, %v795_v36 }
  0xc2   : > { %4111 = vmatprep.mubr.msk.f32.mxu0 %vm960_vm7, %v4905_v4 }
  0xc3   : > { %4112 = vmatmul.mubr.msk.f32.gmra.mxu0 %vm960_vm7, %v4902_v0 }
  0xc4   : > { %v602_v6 = vpop.permute.xlu1 %601  ;;  %v600_v8 = vpop.permute.xlu0 %599 }
  0xc5   : > { %v895_v22 = vsel %vm225_vm0, %v4605_v39, %v602_v6  ;;  %v894_v24 = vsel %vm225_vm0, %v4607_v41, %v600_v8 }
  0xc8   : > { %v801_v9 = vpop.permute.xlu1 %800  ;;  %v799_v13 = vpop.permute.xlu0 %798 }
  0xc9   : > { %v4916_v16 = vsel %vm918_vm6, %v895_v22, %v801_v9  ;;  %v4919_v17 = vsel %vm918_vm6, %v894_v24, %v799_v13 }
  0xca   : > { %4114 = vmatprep.mubr.msk.f32.mxu0 %vm960_vm7, %v4919_v17 }
  0xcb   : > { %4115 = vmatmul.mubr.msk.f32.gmra.mxu0 %vm960_vm7, %v4916_v16 }
  0xcc   : > { %v606_v18 = vpop.permute.xlu1 %605  ;;  %v604_v23 = vpop.permute.xlu0 %603 }
  0xcd   : > { %v897_v39 = vsel %vm225_vm0, %v4621_v54, %v606_v18  ;;  %v896_v41 = vsel %vm225_vm0, %v4623_v56, %v604_v23 }
  0xd0   : > { %v805_v26 = vpop.permute.xlu1 %804  ;;  %v803_v27 = vpop.permute.xlu0 %802 }
  0xd1   : > { %v4930_v28 = vsel %vm918_vm6, %v897_v39, %v805_v26  ;;  %v4933_v29 = vsel %vm918_vm6, %v896_v41, %v803_v27 }
  0xd2   : > { %4117 = vmatprep.mubr.msk.f32.mxu0 %vm960_vm7, %v4933_v29 }
  0xd3   : > { %4118 = vmatmul.mubr.msk.f32.gmra.mxu0 %vm960_vm7, %v4930_v28 }
  0xd4   : > { %v610_v49 = vpop.permute.xlu1 %609  ;;  %v608_v51 = vpop.permute.xlu0 %607 }
  0xd5   : > { %v899_v54 = vsel %vm225_vm0, %v4637_v5, %v610_v49  ;;  %v898_v56 = vsel %vm225_vm0, %v4639_v7, %v608_v51 }
  0xd8   : > { %v809_v44 = vpop.permute.xlu1 %808  ;;  %v807_v45 = vpop.permute.xlu0 %806 }
  0xd9   : > { %v4944_v38 = vsel %vm918_vm6, %v899_v54, %v809_v44  ;;  %v4947_v46 = vsel %vm918_vm6, %v898_v56, %v807_v45 }
  0xda   : > { %4120 = vmatprep.mubr.msk.f32.mxu0 %vm960_vm7, %v4947_v46 }
  0xdb   : > { %4121 = vmatmul.mubr.msk.f32.gmra.mxu0 %vm960_vm7, %v4944_v38 }
  0xdc   : > { %v614_v47 = vpop.permute.xlu1 %613  ;;  %v612_v31 = vpop.permute.xlu0 %611 }
  0xdd   : > { %v901_v5 = vsel %vm225_vm0, %v4653_v19, %v614_v47  ;;  %v900_v7 = vsel %vm225_vm0, %v4655_v21, %v612_v31 }
  0xe0   : > { %v813_v59 = vpop.permute.xlu1 %812  ;;  %v811_v25 = vpop.permute.xlu0 %810 }
  0xe1   : > { %v4958_v63 = vsel %vm918_vm6, %v901_v5, %v813_v59  ;;  %v4961_v11 = vsel %vm918_vm6, %v900_v7, %v811_v25 }
  0xe2   : > { %4123 = vmatprep.mubr.msk.f32.mxu0 %vm960_vm7, %v4961_v11 }
  0xe3   : > { %4124 = vmatmul.mubr.msk.f32.gmra.mxu0 %vm960_vm7, %v4958_v63 }
  0xe4   : > { %v618_v32 = vpop.permute.xlu1 %617  ;;  %v616_v36 = vpop.permute.xlu0 %615 }
  0xe5   : > { %v903_v19 = vsel %vm225_vm0, %v4676_v40, %v618_v32  ;;  %v902_v21 = vsel %vm225_vm0, %v4678_v43, %v616_v36 }
  0xe8   : > { %v817_v6 = vpop.permute.xlu1 %816  ;;  %v815_v8 = vpop.permute.xlu0 %814 }
  0xe9   : > { %v4972_v22 = vsel %vm918_vm6, %v903_v19, %v817_v6  ;;  %v4975_v24 = vsel %vm918_vm6, %v902_v21, %v815_v8 }
  0xea   : > { %4126 = vmatprep.mubr.msk.f32.mxu0 %vm960_vm7, %v4975_v24 }
  0xeb   : > { %4127 = vmatmul.mubr.msk.f32.gmra.mxu0 %vm960_vm7, %v4972_v22 }
  0xec   : > { %v622_v9 = vpop.permute.xlu1 %621  ;;  %v620_v13 = vpop.permute.xlu0 %619 }
  0xed   : > { %v905_v40 = vsel %vm225_vm0, %v4692_v58, %v622_v9  ;;  %v904_v43 = vsel %vm225_vm0, %v4694_v60, %v620_v13 }
  0xf0   : > { %v821_v18 = vpop.permute.xlu1 %820  ;;  %v819_v23 = vpop.permute.xlu0 %818 }
  0xf1   : > { %v4986_v39 = vsel %vm918_vm6, %v905_v40, %v821_v18  ;;  %v4989_v41 = vsel %vm918_vm6, %v904_v43, %v819_v23 }
  0xf2   : > { %4129 = vmatprep.mubr.msk.f32.mxu0 %vm960_vm7, %v4989_v41 }
  0xf3   : > { %4130 = vmatmul.mubr.msk.f32.gmra.mxu0 %vm960_vm7, %v4986_v39 }
  0xf4   : > { %v626_v26 = vpop.permute.xlu1 %625  ;;  %v624_v27 = vpop.permute.xlu0 %623 }
  0xf5   : > { %v907_v58 = vsel %vm225_vm0, %v4708_v12, %v626_v26  ;;  %v906_v60 = vsel %vm225_vm0, %v4710_v14, %v624_v27 }
  0xf8   : > { %v825_v49 = vpop.permute.xlu1 %824  ;;  %v823_v51 = vpop.permute.xlu0 %822 }
  0xf9   : > { %v5000_v54 = vsel %vm918_vm6, %v907_v58, %v825_v49  ;;  %v5003_v56 = vsel %vm918_vm6, %v906_v60, %v823_v51 }
  0xfa   : > { %4132 = vmatprep.mubr.msk.f32.mxu0 %vm960_vm7, %v5003_v56 }
  0xfb   : > { %4133 = vmatmul.mubr.msk.f32.gmra.mxu0 %vm960_vm7, %v5000_v54 }
  0xfc   : > { %v630_v44 = vpop.permute.xlu1 %629  ;;  %v628_v45 = vpop.permute.xlu0 %627 }
  0xfd   : > { %v909_v12 = vsel %vm225_vm0, %v4724_v33, %v630_v44  ;;  %v908_v14 = vsel %vm225_vm0, %v4726_v35, %v628_v45 }
 0x100   : > { %v829_v47 = vpop.permute.xlu1 %828  ;;  %v827_v31 = vpop.permute.xlu0 %826 }
 0x101   : > { %v5014_v5 = vsel %vm918_vm6, %v909_v12, %v829_v47  ;;  %v5017_v7 = vsel %vm918_vm6, %v908_v14, %v827_v31  ;;  %v2332_v47 = vld [vmem:[%s6746_s3 + $0xa8] sm:$0xff]  ;;  %v2331_v31 = vld [vmem:[%s6746_s3 + $0xa0] sm:$0xff] }
 0x102   : > { %4135 = vmatprep.mubr.msk.f32.mxu0 %vm960_vm7, %v5017_v7 }
 0x103   : > { %4136 = vmatmul.mubr.msk.f32.gmra.mxu0 %vm960_vm7, %v5014_v5 }
 0x104   : > { %v634_v59 = vpop.permute.xlu1 %633  ;;  %v632_v25 = vpop.permute.xlu0 %631 }
 0x105   : > { %v911_v33 = vsel %vm225_vm0, %v4740_v53, %v634_v59  ;;  %v910_v35 = vsel %vm225_vm0, %v4742_v57, %v632_v25  ;;  %v2328_v59 = vld [vmem:[%s6746_s3 + $0x88] sm:$0xff]  ;;  %v2327_v25 = vld [vmem:[%s6746_s3 + $0x80] sm:$0xff] }
 0x108   : > { %v833_v32 = vpop.permute.xlu1 %832  ;;  %v831_v36 = vpop.permute.xlu0 %830 }
 0x109   : > { %v5028_v19 = vsel %vm918_vm6, %v911_v33, %v833_v32  ;;  %v5031_v21 = vsel %vm918_vm6, %v910_v35, %v831_v36 }
 0x10a   : > { %4138 = vmatprep.mubr.msk.f32.mxu0 %vm960_vm7, %v5031_v21 }
 0x10b   : > { %4139 = vmatmul.mubr.msk.f32.gmra.mxu0 %vm960_vm7, %v5028_v19 }
 0x10c   : > { %v638_v6 = vpop.permute.xlu1 %637  ;;  %v636_v8 = vpop.permute.xlu0 %635 }
 0x10d   : > { %v913_v53 = vsel %vm225_vm0, %v4756_v10, %v638_v6  ;;  %v912_v57 = vsel %vm225_vm0, %v4758_v15, %v636_v8 }
 0x110   : > { %v837_v9 = vpop.permute.xlu1 %836  ;;  %v835_v13 = vpop.permute.xlu0 %834 }
 0x111   : > { %v5042_v40 = vsel %vm918_vm6, %v913_v53, %v837_v9  ;;  %v5045_v43 = vsel %vm918_vm6, %v912_v57, %v835_v13 }
 0x112   : > { %4141 = vmatprep.mubr.msk.f32.mxu0 %vm960_vm7, %v5045_v43 }
 0x113   : > { %4142 = vmatmul.mubr.msk.f32.gmra.mxu0 %vm960_vm7, %v5042_v40 }
 0x114   : > { %v642_v18 = vpop.permute.xlu1 %641  ;;  %v640_v23 = vpop.permute.xlu0 %639 }
 0x115   : > { %v914_v10 = vsel %vm225_vm0, %v4774_v42, %v640_v23  ;;  %v915_v58 = vsel %vm225_vm0, %v4772_v37, %v642_v18  ;;  %v3859_v23 = vld [vmem:[%s6746_s3 + $0x138] sm:$0xff] }
 0x118   : > { %v576_v15 = vpop.permute.xlu1 %575  ;;  %v839_v26 = vpop.permute.xlu0 %838 }
 0x119   : > { %v5054_v27 = vsel %vm918_vm6, %v914_v10, %v839_v26  ;;  %v882_v42 = vsel %vm225_vm0, %v4782_v50, %v576_v15  ;;  %v2326_v50 = vld [vmem:[%s6746_s3 + $0x78] sm:$0xff]  ;;  %v3858_v10 = vld [vmem:[%s6746_s3 + $0x130] sm:$0xff]  ;;  %v3857_v26 = vld [vmem:[%s6746_s3 + $0x128] sm:$0xff] }
 0x11a   : > { %4144 = vmatprep.mubr.msk.f32.mxu0 %vm960_vm7, %v5054_v27 }
 0x11c   : > { %v578_v60 = vpop.permute.xlu1 %577  ;;  %v841_v49 = vpop.permute.xlu0 %840 }
 0x11d   : > { %v5061_v51 = vsel %vm918_vm6, %v915_v58, %v841_v49  ;;  %v883_v44 = vsel %vm225_vm0, %v4784_v52, %v578_v60  ;;  %v5156_v52 = vld [vmem:[#allocation3] sm:$0xff]  ;;  %v3855_v60 = vld [vmem:[%s6746_s3 + $0x118] sm:$0xff] }
 0x11e   : > { %4145 = vmatmul.mubr.msk.f32.gmra.mxu0 %vm960_vm7, %v5061_v51  ;;  %270 = vst.msk [vmem:[#allocation3 + $0x8] sm:$0xff] %vm269_vm8, %v5156_v52  ;;  %272 = vst.msk [vmem:[#allocation3 + $0x18] sm:$0xff] %vm269_vm8, %v5156_v52 }
 0x11f   : > { %4203 = vmatprep.mubr.msk.f32.mxu0 %vm960_vm7, %v4845_v3  ;;  %275 = vst.msk [vmem:[#allocation3 + $0x228] sm:$0xff] %vm269_vm8, %v5156_v52  ;;  %277 = vst.msk [vmem:[#allocation3 + $0x238] sm:$0xff] %vm269_vm8, %v5156_v52 }
 0x120   : > { %v777_v45 = vpop.permute.xlu1 %776  ;;  %v775_v12 = vpop.permute.xlu0 %774  ;;  %280 = vst.msk [vmem:[#allocation3 + $0x20] sm:$0x1] %vm279_vm9, %v5156_v52  ;;  %281 = vst.msk [vmem:[#allocation3 + $0x40] sm:$0x1] %vm279_vm9, %v5156_v52 }
 0x121   : > { %v920_v37 = vsel %vm918_vm6, %v883_v44, %v777_v45  ;;  %v919_v14 = vsel %vm918_vm6, %v882_v42, %v775_v12  ;;  %282 = vst.msk [vmem:[#allocation3 + $0x60] sm:$0x1] %vm279_vm9, %v5156_v52  ;;  %283 = vst.msk [vmem:[#allocation3 + $0x80] sm:$0x1] %vm279_vm9, %v5156_v52  ;;  %v3853_v42 = vld [vmem:[%s6746_s3 + $0x108] sm:$0xff]  ;;  %v3852_v45 = vld [vmem:[%s6746_s3 + $0x100] sm:$0xff] }
 0x122   : > { %4151 = vmatprep.mubr.msk.f32.mxu1 %vm960_vm7, %v919_v14  ;;  %4204 = vmatmul.mubr.msk.f32.vlgmr.msra.gmra.mxu0 %vm960_vm7, %v4842_v2  ;;  %284 = vst.msk [vmem:[#allocation3 + $0xa0] sm:$0x1] %vm279_vm9, %v5156_v52  ;;  %285 = vst.msk [vmem:[#allocation3 + $0xc0] sm:$0x1] %vm279_vm9, %v5156_v52  ;;  %v3850_v14 = vld [vmem:[%s6746_s3 + $0xf0] sm:$0xff] }
 0x123   : > { %4152 = vmatmul.mubr.msk.f32.vlgmr.msra.gmra.mxu1 %vm960_vm7, %v920_v37  ;;  %4206 = vmatprep.mubr.msk.f32.mxu0 %vm960_vm7, %v4871_v34  ;;  %286 = vst.msk [vmem:[#allocation3 + $0xe0] sm:$0x1] %vm279_vm9, %v5156_v52  ;;  %287 = vst.msk [vmem:[#allocation3 + $0x100] sm:$0x1] %vm279_vm9, %v5156_v52  ;;  %v3851_v37 = vld [vmem:[%s6746_s3 + $0xf8] sm:$0xff] }
 0x124   : > { %4154 = vmatprep.mubr.msk.f32.mxu1 %vm960_vm7, %v4791_v62  ;;  %2842 = vmatpush1.msra.mxu0 %v2326_v50  ;;  %v2325_v62 = vld [vmem:[%s6746_s3 + $0x70] sm:$0xff]  ;;  %288 = vst.msk [vmem:[#allocation3 + $0x120] sm:$0x1] %vm279_vm9, %v5156_v52  ;;  %289 = vst.msk [vmem:[#allocation3 + $0x140] sm:$0x1] %vm279_vm9, %v5156_v52 }
 0x125   : > { %2843 = vmatprep.subr.mxu0 %v5156_v52  ;;  %290 = vst.msk [vmem:[#allocation3 + $0x160] sm:$0x1] %vm279_vm9, %v5156_v52  ;;  %291 = vst.msk [vmem:[#allocation3 + $0x180] sm:$0x1] %vm279_vm9, %v5156_v52  ;;  %v2250_v33 = vld [vmem:[#allocation3 + $0x18] sm:$0xff]  ;;  %2521 = vmatpush1.msra.mxu1 %v3859_v23 }
 0x126   : > { %4207 = vmatmul.mubr.msk.f32.gmra.mxu0 %vm960_vm7, %v4868_v30  ;;  %292 = vst.msk [vmem:[#allocation3 + $0x1a0] sm:$0x1] %vm279_vm9, %v5156_v52  ;;  %293 = vst.msk [vmem:[#allocation3 + $0x1c0] sm:$0x1] %vm279_vm9, %v5156_v52  ;;  %2522 = vmatprep.subr.mxu1 %v5156_v52 }
 0x127   : > { %4155 = vmatmul.mubr.msk.f32.gmra.mxu1 %vm960_vm7, %v4814_v20  ;;  %4209 = vmatprep.mubr.msk.f32.mxu0 %vm960_vm7, %v4891_v55  ;;  %v2324_v20 = vld [vmem:[%s6746_s3 + $0x68] sm:$0xff]  ;;  %294 = vst.msk [vmem:[#allocation3 + $0x1e0] sm:$0x1] %vm279_vm9, %v5156_v52  ;;  %295 = vst.msk [vmem:[#allocation3 + $0x200] sm:$0x1] %vm279_vm9, %v5156_v52 }
 0x128   : > { %4157 = vmatprep.mubr.msk.f32.mxu1 %vm960_vm7, %v4845_v3  ;;  %2844 = vmatpush1.msra.mxu0 %v2325_v62  ;;  %v2323_v3 = vld [vmem:[%s6746_s3 + $0x60] sm:$0xff]  ;;  %296 = vst.msk [vmem:[#allocation3 + $0x3f] sm:$0x1] %vm279_vm9, %v5156_v52  ;;  %297 = vst.msk [vmem:[#allocation3 + $0x5f] sm:$0x1] %vm279_vm9, %v5156_v52  ;;  %v3849_v62 = vld [vmem:[%s6746_s3 + $0xe8] sm:$0xff] }
 0x129   : > { %2845 = vmatprep.subr.mxu0 %v5156_v52  ;;  %298 = vst.msk [vmem:[#allocation3 + $0x7f] sm:$0x1] %vm279_vm9, %v5156_v52  ;;  %299 = vst.msk [vmem:[#allocation3 + $0x9f] sm:$0x1] %vm279_vm9, %v5156_v52  ;;  %2523 = vmatpush1.msra.mxu1 %v3858_v10  ;;  %v3861_v10 = vld [vmem:[%s6746_s3 + $0x148] sm:$0xff] }
 0x12a   : > { %4210 = vmatmul.mubr.msk.f32.gmra.mxu0 %vm960_vm7, %v4888_v48  ;;  %300 = vst.msk [vmem:[#allocation3 + $0xbf] sm:$0x1] %vm279_vm9, %v5156_v52  ;;  %301 = vst.msk [vmem:[#allocation3 + $0xdf] sm:$0x1] %vm279_vm9, %v5156_v52  ;;  %2524 = vmatprep.subr.mxu1 %v5156_v52 }
 0x12b   : > { %4158 = vmatmul.mubr.msk.f32.gmra.mxu1 %vm960_vm7, %v4842_v2  ;;  %4212 = vmatprep.mubr.msk.f32.mxu0 %vm960_vm7, %v4905_v4  ;;  %v644_v2 = vpop.permute.xlu0 %643  ;;  %302 = vst.msk [vmem:[#allocation3 + $0xff] sm:$0x1] %vm279_vm9, %v5156_v52  ;;  %303 = vst.msk [vmem:[#allocation3 + $0x11f] sm:$0x1] %vm279_vm9, %v5156_v52 }
 0x12c   : > { %4160 = vmatprep.mubr.msk.f32.mxu1 %vm960_vm7, %v4871_v34  ;;  %2846 = vmatpush1.msra.mxu0 %v2324_v20  ;;  %v916_v34 = vsel %vm225_vm0, %v4836_v61, %v644_v2  ;;  %304 = vst.msk [vmem:[#allocation3 + $0x13f] sm:$0x1] %vm279_vm9, %v5156_v52  ;;  %305 = vst.msk [vmem:[#allocation3 + $0x15f] sm:$0x1] %vm279_vm9, %v5156_v52  ;;  %v3848_v2 = vld [vmem:[%s6746_s3 + $0xe0] sm:$0xff] }
 0x12d   : > { %2847 = vmatprep.subr.mxu0 %v5156_v52  ;;  %306 = vst.msk [vmem:[#allocation3 + $0x17f] sm:$0x1] %vm279_vm9, %v5156_v52  ;;  %307 = vst.msk [vmem:[#allocation3 + $0x19f] sm:$0x1] %vm279_vm9, %v5156_v52  ;;  %2525 = vmatpush1.msra.mxu1 %v3857_v26 }
 0x12e   : > { %4213 = vmatmul.mubr.msk.f32.gmra.mxu0 %vm960_vm7, %v4902_v0  ;;  %308 = vst.msk [vmem:[#allocation3 + $0x1bf] sm:$0x1] %vm279_vm9, %v5156_v52  ;;  %309 = vst.msk [vmem:[#allocation3 + $0x1df] sm:$0x1] %vm279_vm9, %v5156_v52  ;;  %2526 = vmatprep.subr.mxu1 %v5156_v52 }
 0x12f   : > { %4161 = vmatmul.mubr.msk.f32.gmra.mxu1 %vm960_vm7, %v4868_v30  ;;  %4215 = vmatprep.mubr.msk.f32.mxu0 %vm960_vm7, %v4919_v17  ;;  %v646_v30 = vpop.permute.xlu1 %645  ;;  %310 = vst.msk [vmem:[#allocation3 + $0x1ff] sm:$0x1] %vm279_vm9, %v5156_v52  ;;  %311 = vst.msk [vmem:[#allocation3 + $0x21f] sm:$0x1] %vm279_vm9, %v5156_v52 }
 0x130   : > { %4163 = vmatprep.mubr.msk.f32.mxu1 %vm960_vm7, %v4891_v55  ;;  %2848 = vmatpush1.msra.mxu0 %v2323_v3  ;;  %v2322_v55 = vld [vmem:[%s6746_s3 + $0x58] sm:$0xff]  ;;  %v917_v61 = vsel %vm225_vm0, %v4838_v1, %v646_v30  ;;  %v2320_v1 = vld [vmem:[%s6746_s3 + $0x48] sm:$0xff] }
 0x131   : > { %2849 = vmatprep.subr.mxu0 %v5156_v52  ;;  %v3847_v3 = vld [vmem:[%s6746_s3 + $0xd8] sm:$0xff] }
 0x132   : > { %4216 = vmatmul.mubr.msk.f32.gmra.mxu0 %vm960_vm7, %v4916_v16 }
 0x133   : > { %4164 = vmatmul.mubr.msk.f32.gmra.mxu1 %vm960_vm7, %v4888_v48  ;;  %4218 = vmatprep.mubr.msk.f32.mxu0 %vm960_vm7, %v4933_v29  ;;  %v843_v48 = vpop.permute.xlu0 %842 }
 0x134   : > { %4166 = vmatprep.mubr.msk.f32.mxu1 %vm960_vm7, %v4905_v4  ;;  %v845_v4 = vpop.permute.xlu1 %844  ;;  %2850 = vmatpush1.msra.mxu0 %v2322_v55  ;;  %v3845_v55 = vld [vmem:[%s6746_s3 + $0xc8] sm:$0xff] }
 0x135   : > { %2851 = vmatprep.subr.mxu0 %v5156_v52 }
 0x136   : > { %4219 = vmatmul.mubr.msk.f32.gmra.mxu0 %vm960_vm7, %v4930_v28 }
 0x137   : > { %4167 = vmatmul.mubr.msk.f32.gmra.mxu1 %vm960_vm7, %v4902_v0  ;;  %4221 = vmatprep.mubr.msk.f32.mxu0 %vm960_vm7, %v4947_v46  ;;  %v953_v0 = vsel %vm918_vm6, %v916_v34, %v843_v48  ;;  %v3846_v34 = vld [vmem:[%s6746_s3 + $0xd0] sm:$0xff] }
 0x138   : > { %4169 = vmatprep.mubr.msk.f32.mxu1 %vm960_vm7, %v4919_v17  ;;  %v954_v17 = vsel %vm918_vm6, %v917_v61, %v845_v4  ;;  %v3844_v61 = vld [vmem:[%s6746_s3 + $0xc0] sm:$0xff]  ;;  %v3867_v4 = vld [vmem:[%s6746_s3 + $0x178] sm:$0xff] }
 0x13a   : > { %4222 = vmatmul.mubr.msk.f32.gmra.mxu0 %vm960_vm7, %v4944_v38 }
 0x13b   : > { %4170 = vmatmul.mubr.msk.f32.gmra.mxu1 %vm960_vm7, %v4916_v16  ;;  %4224 = vmatprep.mubr.msk.f32.mxu0 %vm960_vm7, %v4961_v11  ;;  %v2321_v16 = vld [vmem:[%s6746_s3 + $0x50] sm:$0xff] }
 0x13c   : > { %4172 = vmatprep.mubr.msk.f32.mxu1 %vm960_vm7, %v4933_v29  ;;  %2852 = vmatpush1.msra.mxu0 %v2321_v16  ;;  %v2318_v29 = vld [vmem:[%s6746_s3 + $0x38] sm:$0xff] }
 0x13d   : > { %2853 = vmatprep.subr.mxu0 %v5156_v52 }
 0x13e   : > { %4225 = vmatmul.mubr.msk.f32.gmra.mxu0 %vm960_vm7, %v4958_v63 }
 0x13f   : > { %4173 = vmatmul.mubr.msk.f32.gmra.mxu1 %vm960_vm7, %v4930_v28  ;;  %4227 = vmatprep.mubr.msk.f32.mxu0 %vm960_vm7, %v4975_v24  ;;  %v2319_v28 = vld [vmem:[%s6746_s3 + $0x40] sm:$0xff] }
 0x140   : > { %4175 = vmatprep.mubr.msk.f32.mxu1 %vm960_vm7, %v4947_v46  ;;  %2854 = vmatpush1.msra.mxu0 %v2320_v1  ;;  %v2316_v46 = vld [vmem:[%s6746_s3 + $0x28] sm:$0xff] }
 0x141   : > { %2855 = vmatprep.subr.mxu0 %v5156_v52  ;;  %v3865_v1 = vld [vmem:[%s6746_s3 + $0x168] sm:$0xff] }
 0x142   : > { %4228 = vmatmul.mubr.msk.f32.gmra.mxu0 %vm960_vm7, %v4972_v22 }
 0x143   : > { %4176 = vmatmul.mubr.msk.f32.gmra.mxu1 %vm960_vm7, %v4944_v38  ;;  %4230 = vmatprep.mubr.msk.f32.mxu0 %vm960_vm7, %v4989_v41  ;;  %v2317_v38 = vld [vmem:[%s6746_s3 + $0x30] sm:$0xff] }
 0x144   : > { %4178 = vmatprep.mubr.msk.f32.mxu1 %vm960_vm7, %v4961_v11  ;;  %2856 = vmatpush1.msra.mxu0 %v2319_v28  ;;  %v2314_v11 = vld [vmem:[%s6746_s3 + $0x18] sm:$0xff] }
 0x145   : > { %2857 = vmatprep.subr.mxu0 %v5156_v52 }
 0x146   : > { %4231 = vmatmul.mubr.msk.f32.gmra.mxu0 %vm960_vm7, %v4986_v39 }
 0x147   : > { %4179 = vmatmul.mubr.msk.f32.gmra.mxu1 %vm960_vm7, %v4958_v63  ;;  %4233 = vmatprep.mubr.msk.f32.mxu0 %vm960_vm7, %v5003_v56  ;;  %v2315_v63 = vld [vmem:[%s6746_s3 + $0x20] sm:$0xff] }
 0x148   : > { %4181 = vmatprep.mubr.msk.f32.mxu1 %vm960_vm7, %v4975_v24  ;;  %2858 = vmatpush1.msra.mxu0 %v2318_v29  ;;  %v2312_v24 = vld [vmem:[%s6746_s3 + $0x8] sm:$0xff]  ;;  %v3864_v29 = vld [vmem:[%s6746_s3 + $0x160] sm:$0xff] }
 0x149   : > { %2859 = vmatprep.subr.mxu0 %v5156_v52 }
 0x14a   : > { %4234 = vmatmul.mubr.msk.f32.gmra.mxu0 %vm960_vm7, %v5000_v54 }
 0x14b   : > { %4182 = vmatmul.mubr.msk.f32.gmra.mxu1 %vm960_vm7, %v4972_v22  ;;  %4236 = vmatprep.mubr.msk.f32.mxu0 %vm960_vm7, %v5017_v7  ;;  %v2313_v22 = vld [vmem:[%s6746_s3 + $0x10] sm:$0xff] }
 0x14c   : > { %4184 = vmatprep.mubr.msk.f32.mxu1 %vm960_vm7, %v4989_v41  ;;  %2860 = vmatpush1.msra.mxu0 %v2317_v38  ;;  %v2334_v41 = vld [vmem:[%s6746_s3 + $0xb8] sm:$0xff] }
 0x14d   : > { %2861 = vmatprep.subr.mxu0 %v5156_v52 }
 0x14e   : > { %4237 = vmatmul.mubr.msk.f32.gmra.mxu0 %vm960_vm7, %v5014_v5 }
 0x14f   : > { %4185 = vmatmul.mubr.msk.f32.gmra.mxu1 %vm960_vm7, %v4986_v39  ;;  %4239 = vmatprep.mubr.msk.f32.mxu0 %vm960_vm7, %v5031_v21  ;;  %v2311_v39 = vld [vmem:[%s6746_s3] sm:$0xff] }
 0x150   : > { %4187 = vmatprep.mubr.msk.f32.mxu1 %vm960_vm7, %v5003_v56  ;;  %2862 = vmatpush1.msra.mxu0 %v2316_v46  ;;  %v2248_v56 = vld [vmem:[#allocation3 + $0x8] sm:$0xff] }
 0x151   : > { %2863 = vmatprep.subr.mxu0 %v5156_v52 }
 0x152   : > { %4240 = vmatmul.mubr.msk.f32.gmra.mxu0 %vm960_vm7, %v5028_v19 }
 0x153   : > { %4188 = vmatmul.mubr.msk.f32.gmra.mxu1 %vm960_vm7, %v5000_v54  ;;  %4242 = vmatprep.mubr.msk.f32.mxu0 %vm960_vm7, %v5045_v43  ;;  %v2333_v54 = vld [vmem:[%s6746_s3 + $0xb0] sm:$0xff] }
 0x154   : > { %4190 = vmatprep.mubr.msk.f32.mxu1 %vm960_vm7, %v5017_v7  ;;  %2864 = vmatpush1.msra.mxu0 %v2315_v63  ;;  %v2329_v7 = vld [vmem:[%s6746_s3 + $0x90] sm:$0xff] }
 0x155   : > { %2865 = vmatprep.subr.mxu0 %v5156_v52 }
 0x156   : > { %4243 = vmatmul.mubr.msk.f32.gmra.mxu0 %vm960_vm7, %v5042_v40 }
 0x157   : > { %4191 = vmatmul.mubr.msk.f32.gmra.mxu1 %vm960_vm7, %v5014_v5  ;;  %4245 = vmatprep.mubr.msk.f32.mxu0 %vm960_vm7, %v5054_v27  ;;  %v2330_v5 = vld [vmem:[%s6746_s3 + $0x98] sm:$0xff]  ;;  %v3856_v27 = vld [vmem:[%s6746_s3 + $0x120] sm:$0xff] }
 0x158   : > { %4193 = vmatprep.mubr.msk.f32.mxu1 %vm960_vm7, %v5031_v21  ;;  %2866 = vmatpush1.msra.mxu0 %v2314_v11 }
 0x159   : > { %2867 = vmatprep.subr.mxu0 %v5156_v52  ;;  %2527 = vmatpush1.msra.mxu1 %v3856_v27 }
 0x15a   : > { %4246 = vmatmul.mubr.msk.f32.gmra.mxu0 %vm960_vm7, %v5061_v51  ;;  %2528 = vmatprep.subr.mxu1 %v5156_v52  ;;  %v3854_v51 = vld [vmem:[%s6746_s3 + $0x110] sm:$0xff] }
 0x15b   : > { %4194 = vmatmul.mubr.msk.f32.gmra.mxu1 %vm960_vm7, %v5028_v19  ;;  %4248 = vmatprep.mubr.msk.f32.mxu0 %vm960_vm7, %v953_v0 }
 0x15c   : > { %4196 = vmatprep.mubr.msk.f32.mxu1 %vm960_vm7, %v5045_v43  ;;  %2868 = vmatpush1.msra.mxu0 %v2313_v22 }
 0x15d   : > { %2869 = vmatprep.subr.mxu0 %v5156_v52  ;;  %2529 = vmatpush1.msra.mxu1 %v3855_v60 }
 0x15e   : > { %4249 = vmatmul.mubr.msk.f32.gmra.mxu0 %vm960_vm7, %v954_v17  ;;  %2530 = vmatprep.subr.mxu1 %v5156_v52  ;;  %v3866_v17 = vld [vmem:[%s6746_s3 + $0x170] sm:$0xff] }
 0x15f   : > { %4197 = vmatmul.mubr.msk.f32.gmra.mxu1 %vm960_vm7, %v5042_v40  ;;  %2870 = vmatpush1.msra.mxu0 %v2312_v24 }
 0x160   : > { %2871 = vmatprep.subr.mxu0 %v5156_v52  ;;  %3900 = vmatprep.mubr.msk.f32.mxu0 %vm269_vm8, %v2248_v56  ;;  %v3862_v56 = vld [vmem:[%s6746_s3 + $0x150] sm:$0xff] }
 0x161   : > { %2872 = vmatpush1.msra.mxu0 %v2311_v39  ;;  %2531 = vmatpush1.msra.mxu1 %v3854_v51  ;;  %v3863_v39 = vld [vmem:[%s6746_s3 + $0x158] sm:$0xff] }
 0x162   : > { %2889 = vmatprep.subr.mxu0 %v5156_v52  ;;  %2532 = vmatprep.subr.mxu1 %v5156_v52 }
 0x163   : > { %2890 = vmatpush2.msra.mxu0 %v2334_v41  ;;  %v5374_v35 = vpop.f32.mrf.mxu0  ;;  %2533 = vmatpush1.msra.mxu1 %v3853_v42 }
 0x164   : > { %2891 = vmatprep.subr.mxu0 %v5156_v52  ;;  %2534 = vmatprep.subr.mxu1 %v5156_v52 }
 0x165   : > { %2892 = vmatpush2.msra.mxu0 %v2333_v54  ;;  %v5377_v32 = vpop.f32.mrf.mxu0  ;;  %2535 = vmatpush1.msra.mxu1 %v3852_v45 }
 0x166   : > { %2893 = vmatprep.subr.mxu0 %v5156_v52  ;;  %2536 = vmatprep.subr.mxu1 %v5156_v52 }
 0x167   : > { %2894 = vmatpush2.msra.mxu0 %v2332_v47  ;;  %2537 = vmatpush1.msra.mxu1 %v3851_v37 }
 0x168   : > { %2895 = vmatprep.subr.mxu0 %v5156_v52  ;;  %2538 = vmatprep.subr.mxu1 %v5156_v52 }
 0x169   : > { %2896 = vmatpush2.msra.mxu0 %v2331_v31  ;;  %2539 = vmatpush1.msra.mxu1 %v3850_v14 }
 0x16a   : > { %2897 = vmatprep.subr.mxu0 %v5156_v52  ;;  %2540 = vmatprep.subr.mxu1 %v5156_v52 }
 0x16b   : > { %2898 = vmatpush2.msra.mxu0 %v2330_v5  ;;  %2541 = vmatpush1.msra.mxu1 %v3849_v62 }
 0x16c   : > { %2899 = vmatprep.subr.mxu0 %v5156_v52  ;;  %v5379_v36 = vpop.f32.mrf.mxu0  ;;  %2542 = vmatprep.subr.mxu1 %v5156_v52 }
 0x16d   : > { %2900 = vmatpush2.msra.mxu0 %v2329_v7  ;;  %2543 = vmatpush1.msra.mxu1 %v3848_v2  ;;  %v5530_v7 = vld [vmem:[%s6745_s2] ss:$0 sm:$0xff] }
 0x16e   : > { %2901 = vmatprep.subr.mxu0 %v5156_v52  ;;  %v5381_v19 = vpop.f32.mrf.mxu0  ;;  %2544 = vmatprep.subr.mxu1 %v5156_v52 }
 0x16f   : > { %2902 = vmatpush2.msra.mxu0 %v2328_v59  ;;  %2545 = vmatpush1.msra.mxu1 %v3847_v3 }
 0x170   : > { %2903 = vmatprep.subr.mxu0 %v5156_v52  ;;  %2546 = vmatprep.subr.mxu1 %v5156_v52 }
 0x171   : > { %2904 = vmatpush2.msra.mxu0 %v2327_v25  ;;  %2547 = vmatpush1.msra.mxu1 %v3846_v34 }
 0x172   : > { %2906 = vmatmul.mubr.f32.vlgmr.msra.gmra.mxu0 %v5156_v52  ;;  %3252 = vmatprep.subr.mxu0 %v5156_v52 }
 0x173   : > { %3901 = vmatprep.mubr.msk.f32.mxu0 %vm269_vm8, %v2250_v33  ;;  %v5383_v21 = vpop.f32.mrf.mxu0  ;;  %2548 = vmatprep.subr.mxu1 %v5156_v52 }
 0x174   : > { %2549 = vmatpush1.msra.mxu1 %v3845_v55 }
 0x175   : > { %v5385_v6 = vpop.f32.mrf.mxu0  ;;  %2550 = vmatprep.subr.mxu1 %v5156_v52 }
 0x176   : > { %2911 = vmatmul.mubr.f32.gmra.mxu0 %v5156_v52  ;;  %2551 = vmatpush1.msra.mxu1 %v3844_v61 }
 0x177   : > { %2568 = vmatprep.subr.mxu1 %v5156_v52 }
 0x178   : > { %2569 = vmatpush2.msra.mxu1 %v3867_v4 }
 0x179   : > { %2570 = vmatprep.subr.mxu1 %v5156_v52 }
 0x17a   : > { %2571 = vmatpush2.msra.mxu1 %v3866_v17  ;;  %v5554_v17 = vld [vmem:[%s6746_s3 + $0x1f8] sm:$0xff] }
 0x17b   : > { %v5387_v8 = vpop.f32.mrf.mxu0  ;;  %2572 = vmatprep.subr.mxu1 %v5156_v52  ;;  %3253 = vmatpush1.msra.mxu0 %v5554_v17 }
 0x17c   : > { %2573 = vmatpush2.msra.mxu1 %v3865_v1  ;;  %3254 = vmatprep.subr.mxu0 %v5156_v52 }
 0x17d   : > { %v5389_v53 = vpop.f32.mrf.mxu0  ;;  %2574 = vmatprep.subr.mxu1 %v5156_v52 }
 0x17e   : > { %2575 = vmatpush2.msra.mxu1 %v3864_v29 }
 0x17f   : > { %2576 = vmatprep.subr.mxu1 %v5156_v52 }
 0x180   : > { %2577 = vmatpush2.msra.mxu1 %v3863_v39 }
 0x181   : > { %2578 = vmatprep.subr.mxu1 %v5156_v52 }
 0x182   : > { %2579 = vmatpush2.msra.mxu1 %v3862_v56 }
 0x183   : > { %v5391_v57 = vpop.f32.mrf.mxu0  ;;  %2580 = vmatprep.subr.mxu1 %v5156_v52 }
 0x184   : > { %2581 = vmatpush2.msra.mxu1 %v3861_v10 }
 0x185   : > { %v5393_v9 = vpop.f32.mrf.mxu0  ;;  %2582 = vmatprep.subr.mxu1 %v5156_v52 }
 0x18b   : > { %v5395_v13 = vpop.f32.mrf.mxu0 }
 0x18d   : > { %v5397_v40 = vpop.f32.mrf.mxu0 }
 0x193   : > { %v5399_v43 = vpop.f32.mrf.mxu0 }
 0x195   : > { %v5401_v18 = vpop.f32.mrf.mxu0 }
 0x19b   : > { %v5409_v15 = vpop.f32.mrf.mxu0 }
 0x19d   : > { %v5419_v58 = vpop.f32.mrf.mxu0 }
 0x1a3   : > { %v5425_v49 = vpop.f32.mrf.mxu0 }
 0x1a5   : > { %v5435_v44 = vpop.f32.mrf.mxu0 }
 0x1ab   : > { %v5441_v12 = vpop.f32.mrf.mxu0 }
 0x1ad   : > { %v5451_v50 = vpop.f32.mrf.mxu0 }
 0x1b3   : > { %v5457_v20 = vpop.f32.mrf.mxu0 }
 0x1b5   : > { %v5467_v30 = vpop.f32.mrf.mxu0 }
 0x1bb   : > { %v5473_v48 = vpop.f32.mrf.mxu0 }
 0x1bd   : > { %v5483_v0 = vpop.f32.mrf.mxu0 }
 0x1c3   : > { %v5489_v16 = vpop.f32.mrf.mxu0 }
 0x1c5   : > { %v5499_v28 = vpop.f32.mrf.mxu0 }
 0x1cb   : > { %v5505_v38 = vpop.f32.mrf.mxu0 }
 0x1cd   : > { %v5509_v46 = vpop.f32.mrf.mxu0 }
 0x1d3   : > { %v5511_v63 = vpop.f32.mrf.mxu0 }
 0x1d5   : > { %v5513_v11 = vpop.f32.mrf.mxu0 }
 0x1de   : > { %v5515_v22 = vpop.f32.mrf.mxu0 }
 0x1e0   : > { %v5517_v24 = vpop.f32.mrf.mxu0 }
 0x1e2   : > { %v4205_v41 = vpop.f32.mrf.mxu0 }
 0x1e3   : > { %v4153_v54 = vpop.f32.mrf.mxu1 }
 0x1e4   : > { %v1367_v47 = vadd.f32 %v4153_v54, %v5374_v35  ;;  %v1598_v31 = vpop.f32.mrf.mxu0 }
 0x1e5   : > { %v1361_v5 = vpop.f32.mrf.mxu1 }
 0x1e6   : > { %v1758_v59 = vadd.f32 %v4205_v41, %v1367_v47  ;;  %v1362_v25 = vadd.f32 %v1361_v5, %v5377_v32  ;;  %v4208_v33 = vpop.f32.mrf.mxu0  ;;  %v3860_v32 = vld [vmem:[%s6746_s3 + $0x140] sm:$0xff] }
 0x1e7   : > { %v4156_v23 = vpop.f32.mrf.mxu1  ;;  %2583 = vmatpush2.msra.mxu1 %v3860_v32 }
 0x1e8   : > { %v1757_v35 = vadd.f32 %v1598_v31, %v1362_v25  ;;  %v1377_v26 = vadd.f32 %v4156_v23, %v5379_v36  ;;  %v1608_v27 = vpop.f32.mrf.mxu0  ;;  %v1797_v60 = vadd.f32 %v5530_v7, %v1758_v59  ;;  %4251 = vmatprep.subr.mxu1 %v5156_v52 }
 0x1e9   : > { %v1371_v51 = vpop.f32.mrf.mxu1 }
 0x1ea   : > { %v1760_v42 = vadd.f32 %v4208_v33, %v1377_v26  ;;  %v1372_v45 = vadd.f32 %v1371_v51, %v5381_v19  ;;  %v4211_v37 = vpop.f32.mrf.mxu0  ;;  %v1829_v14 = vmax.f32 %v1797_v60, 0.0  ;;  %v1796_v62 = vadd.f32 %v5530_v7, %v1757_v35 }
 0x1eb   : > { %v4159_v36 = vpop.f32.mrf.mxu1 }
 0x1ec   : > { %v1759_v2 = vadd.f32 %v1608_v27, %v1372_v45  ;;  %v1387_v3 = vadd.f32 %v4159_v36, %v5383_v21  ;;  %v1618_v34 = vpop.f32.mrf.mxu0  ;;  %1894 = vrot.lane.b32.xlu1 %v1829_v14, %s4325_s27  ;;  %v2135_v55 = vrot.slane %v1829_v14, 1  ;;  %v5548_v4 = vmax.f32 %v1796_v62, 0.0 }
 0x1ed   : > { %v1381_v61 = vpop.f32.mrf.mxu1  ;;  %v1799_v19 = vadd.f32 %v5530_v7, %v1760_v42  ;;  %v2022_v41 = vrot.slane %v1829_v14, 7 }
 0x1ee   : > { %v1762_v1 = vadd.f32 %v4211_v37, %v1387_v3  ;;  %2216 = vst.msk [vmem:[#allocation3 + $0x38] sm:$0x7f] %vm2215_vm10, %v2135_v55  ;;  %v1382_v21 = vadd.f32 %v1381_v61, %v5385_v6  ;;  %v4214_v29 = vpop.f32.mrf.mxu0  ;;  %v1798_v39 = vadd.f32 %v5530_v7, %v1759_v2  ;;  %1892 = vrot.lane.b32.xlu0 %v5548_v4, %s4325_s27  ;;  %v2021_v54 = vrot.slane %v5548_v4, 7 }
 0x1ef   : > { %v2134_v56 = vrot.slane %v5548_v4, 1  ;;  %v4162_v47 = vpop.f32.mrf.mxu1  ;;  %v1831_v31 = vmax.f32 %v1799_v19, 0.0 }
 0x1f0   : > { %v1761_v5 = vadd.f32 %v1618_v34, %v1382_v21  ;;  %v1397_v6 = vadd.f32 %v4162_v47, %v5387_v8  ;;  %v1628_v59 = vpop.f32.mrf.mxu0  ;;  %v5566_v25 = vmax.f32 %v1798_v39, 0.0  ;;  %v1801_v33 = vadd.f32 %v5530_v7, %v1762_v1  ;;  %v5579_v8 = vld [vmem:[%s6746_s3 + $0x1f0] sm:$0xff] }
 0x1f1   : > { %v2136_v23 = vsel %vm484_vm4, %v2134_v56, %v2135_v55  ;;  %1898 = vrot.lane.b32.xlu1 %v1831_v31, %s4325_s27  ;;  %v2138_v10 = vrot.slane %v1831_v31, 1  ;;  %v1391_v35 = vpop.f32.mrf.mxu1  ;;  %v5574_v26 = vsel %vm1057_vm5, %v2021_v54, %v2022_v41  ;;  %3255 = vmatpush1.msra.mxu0 %v5579_v8  ;;  %v2025_v45 = vrot.slane %v1831_v31, 7 }
 0x1f2   : > { %2214 = vst.msk [vmem:[#allocation3 + $0x28] sm:$0xff] %vm269_vm8, %v2136_v23  ;;  %v1764_v27 = vadd.f32 %v4214_v29, %v1397_v6  ;;  %v1392_v60 = vadd.f32 %v1391_v35, %v5389_v53  ;;  %v4217_v51 = vpop.f32.mrf.mxu0  ;;  %v2024_v32 = vrot.slane %v5566_v25, 7  ;;  %v2137_v42 = vrot.slane %v5566_v25, 1  ;;  %1896 = vrot.lane.b32.xlu0 %v5566_v25, %s4325_s27  ;;  %3256 = vmatprep.subr.mxu0 %v5156_v52  ;;  %v5613_v6 = vld [vmem:[%s6746_s3 + $0x1e8] sm:$0xff] }
 0x1f3   : > { %2218 = vst.msk [vmem:[#allocation3 + $0x58] sm:$0x7f] %vm2215_vm10, %v2138_v10  ;;  %v4165_v37 = vpop.f32.mrf.mxu1  ;;  %v1833_v14 = vmax.f32 %v1801_v33, 0.0  ;;  %v1800_v62 = vadd.f32 %v5530_v7, %v1761_v5  ;;  %3257 = vmatpush1.msra.mxu0 %v5613_v6 }
 0x1f4   : > { %v1763_v53 = vadd.f32 %v1628_v59, %v1392_v60  ;;  %v2139_v36 = vsel %vm484_vm4, %v2137_v42, %v2138_v10  ;;  %v1407_v2 = vadd.f32 %v4165_v37, %v5391_v57  ;;  %v1638_v3 = vpop.f32.mrf.mxu0  ;;  %v1803_v34 = vadd.f32 %v5530_v7, %v1764_v27  ;;  %3258 = vmatprep.subr.mxu0 %v5156_v52 }
 0x1f5   : > { %2217 = vst.msk [vmem:[#allocation3 + $0x48] sm:$0xff] %vm269_vm8, %v2139_v36  ;;  %1902 = vrot.lane.b32.xlu1 %v1833_v14, %s4325_s27  ;;  %v2141_v55 = vrot.slane %v1833_v14, 1  ;;  %v1401_v61 = vpop.f32.mrf.mxu1  ;;  %v5596_v19 = vmax.f32 %v1800_v62, 0.0  ;;  %v5601_v1 = vsel %vm1057_vm5, %v2024_v32, %v2025_v45  ;;  %v2028_v56 = vrot.slane %v1833_v14, 7  ;;  %v2338_v25 = vld [vmem:[#allocation3 + $0x38] sm:$0xff] }
 0x1f6   : > { %v1766_v21 = vadd.f32 %v4217_v51, %v1407_v2  ;;  %v1402_v29 = vadd.f32 %v1401_v61, %v5393_v9  ;;  %v4220_v57 = vpop.f32.mrf.mxu0  ;;  %v1835_v39 = vmax.f32 %v1803_v34, 0.0  ;;  %v1802_v41 = vadd.f32 %v5530_v7, %v1763_v53 }
 0x1f7   : > { %2220 = vst.msk [vmem:[#allocation3 + $0x78] sm:$0x7f] %vm2215_vm10, %v2141_v55  ;;  %v2027_v47 = vrot.slane %v5596_v19, 7  ;;  %v2140_v31 = vrot.slane %v5596_v19, 1  ;;  %1900 = vrot.lane.b32.xlu0 %v5596_v19, %s4325_s27  ;;  %v4168_v5 = vpop.f32.mrf.mxu1 }
 0x1f8   : > { %v1765_v9 = vadd.f32 %v1638_v3, %v1402_v29  ;;  %v1417_v59 = vadd.f32 %v4168_v5, %v5395_v13  ;;  %v1648_v33 = vpop.f32.mrf.mxu0  ;;  %v2144_v23 = vrot.slane %v1835_v39, 1  ;;  %v5619_v60 = vmax.f32 %v1802_v41, 0.0 }
 0x1f9   : > { %v2142_v10 = vsel %vm484_vm4, %v2140_v31, %v2141_v55  ;;  %1906 = vrot.lane.b32.xlu1 %v1835_v39, %s4325_s27  ;;  %v1411_v35 = vpop.f32.mrf.mxu1  ;;  %v2336_v27 = vld [vmem:[#allocation3 + $0x28] sm:$0xff]  ;;  %v1805_v51 = vadd.f32 %v5530_v7, %v1766_v21  ;;  %v5625_v42 = vsel %vm1057_vm5, %v2027_v47, %v2028_v56  ;;  %v2031_v62 = vrot.slane %v1835_v39, 7 }
 0x1fa   : > { %2219 = vst.msk [vmem:[#allocation3 + $0x68] sm:$0xff] %vm269_vm8, %v2142_v10  ;;  %v1768_v13 = vadd.f32 %v4220_v57, %v1417_v59  ;;  %v1412_v45 = vadd.f32 %v1411_v35, %v5397_v40  ;;  %3868 = vmatprep.mubr.msk.f32.mxu1 %vm269_vm8, %v2336_v27  ;;  %3902 = vmatprep.mubr.msk.f32.mxu0 %vm269_vm8, %v2336_v27  ;;  %v4223_v37 = vpop.f32.mrf.mxu0  ;;  %v2030_v53 = vrot.slane %v5619_v60, 7  ;;  %v2143_v36 = vrot.slane %v5619_v60, 1 }
 0x1fb   : > { %2222 = vst.msk [vmem:[#allocation3 + $0x98] sm:$0x7f] %vm2215_vm10, %v2144_v23  ;;  %v1804_v14 = vadd.f32 %v5530_v7, %v1765_v9  ;;  %1904 = vrot.lane.b32.xlu0 %v5619_v60, %s4325_s27  ;;  %v4171_v2 = vpop.f32.mrf.mxu1  ;;  %v1837_v3 = vmax.f32 %v1805_v51, 0.0 }
 0x1fc   : > { %v1767_v34 = vadd.f32 %v1648_v33, %v1412_v45  ;;  %v1427_v40 = vadd.f32 %v4171_v2, %v5399_v43  ;;  %v1658_v55 = vpop.f32.mrf.mxu0  ;;  %v1807_v21 = vadd.f32 %v5530_v7, %v1768_v13  ;;  %v2145_v29 = vsel %vm484_vm4, %v2143_v36, %v2144_v23  ;;  %v5652_v43 = vld [vmem:[%s6746_s3 + $0x1e0] sm:$0xff] }
 0x1fd   : > { %v5639_v61 = vmax.f32 %v1804_v14, 0.0  ;;  %1910 = vrot.lane.b32.xlu1 %v1837_v3, %s4325_s27  ;;  %v2147_v57 = vrot.slane %v1837_v3, 1  ;;  %v1421_v39 = vpop.f32.mrf.mxu1  ;;  %v5647_v41 = vsel %vm1057_vm5, %v2030_v53, %v2031_v62  ;;  %2221 = vst.msk [vmem:[#allocation3 + $0x88] sm:$0xff] %vm269_vm8, %v2145_v29  ;;  %3259 = vmatpush1.msra.mxu0 %v5652_v43  ;;  %v2034_v33 = vrot.slane %v1837_v3, 7 }
 0x1fe   : > { %v1770_v56 = vadd.f32 %v4223_v37, %v1427_v40  ;;  %v1422_v31 = vadd.f32 %v1421_v39, %v5401_v18  ;;  %v4226_v5 = vpop.f32.mrf.mxu0  ;;  %v1839_v10 = vmax.f32 %v1807_v21, 0.0  ;;  %v1806_v35 = vadd.f32 %v5530_v7, %v1767_v34  ;;  %3260 = vmatprep.subr.mxu0 %v5156_v52 }
 0x1ff   : > { %v6757_v9 = vrot.slane %v5639_v61, 7  ;;  %v2146_v59 = vrot.slane %v5639_v61, 1  ;;  %2224 = vst.msk [vmem:[#allocation3 + $0xb8] sm:$0x7f] %vm2215_vm10, %v2147_v57  ;;  %1908 = vrot.lane.b32.xlu0 %v5639_v61, %s4325_s27  ;;  %v4174_v23 = vpop.f32.mrf.mxu1 }
 0x200   : > { %v1769_v18 = vadd.f32 %v1658_v55, %v1422_v31  ;;  %v1437_v51 = vadd.f32 %v4174_v23, %v5409_v15  ;;  %v1668_v13 = vpop.f32.mrf.mxu0  ;;  %v1809_v45 = vadd.f32 %v5530_v7, %v1770_v56  ;;  %v2150_v37 = vrot.slane %v1839_v10, 1  ;;  %v5679_v15 = vld [vmem:[%s6746_s3 + $0x1d8] sm:$0xff] }
 0x201   : > { %v2148_v27 = vsel %vm484_vm4, %v2146_v59, %v2147_v57  ;;  %1914 = vrot.lane.b32.xlu1 %v1839_v10, %s4325_s27  ;;  %v1431_v14 = vpop.f32.mrf.mxu1  ;;  %v5669_v62 = vmax.f32 %v1806_v35, 0.0  ;;  %v5674_v36 = vsel %vm1057_vm5, %v6757_v9, %v2034_v33  ;;  %3261 = vmatpush1.msra.mxu0 %v5679_v15  ;;  %v2037_v21 = vrot.slane %v1839_v10, 7 }
 0x202   : > { %2223 = vst.msk [vmem:[#allocation3 + $0xa8] sm:$0xff] %vm269_vm8, %v2148_v27  ;;  %v1772_v2 = vadd.f32 %v4226_v5, %v1437_v51  ;;  %v1432_v3 = vadd.f32 %v1431_v14, %v5419_v58  ;;  %v4229_v34 = vpop.f32.mrf.mxu0  ;;  %v1841_v40 = vmax.f32 %v1809_v45, 0.0  ;;  %v1808_v55 = vadd.f32 %v5530_v7, %v1769_v18  ;;  %3262 = vmatprep.subr.mxu0 %v5156_v52 }
 0x203   : > { %2226 = vst.msk [vmem:[#allocation3 + $0xd8] sm:$0x7f] %vm2215_vm10, %v2150_v37  ;;  %v6755_v29 = vrot.slane %v5669_v62, 7  ;;  %v2149_v57 = vrot.slane %v5669_v62, 1  ;;  %1912 = vrot.lane.b32.xlu0 %v5669_v62, %s4325_s27  ;;  %v4177_v39 = vpop.f32.mrf.mxu1 }
 0x204   : > { %v1771_v58 = vadd.f32 %v1668_v13, %v1432_v3  ;;  %v1447_v56 = vadd.f32 %v4177_v39, %v5425_v49  ;;  %v1678_v31 = vpop.f32.mrf.mxu0  ;;  %v2153_v5 = vrot.slane %v1841_v40, 1  ;;  %v5693_v23 = vmax.f32 %v1808_v55, 0.0  ;;  %v5712_v3 = vld [vmem:[%s6746_s3 + $0x1d0] sm:$0xff] }
 0x205   : > { %v2151_v59 = vsel %vm484_vm4, %v2149_v57, %v2150_v37  ;;  %1918 = vrot.lane.b32.xlu1 %v1841_v40, %s4325_s27  ;;  %v1441_v33 = vpop.f32.mrf.mxu1  ;;  %v1811_v10 = vadd.f32 %v5530_v7, %v1772_v2  ;;  %v5699_v35 = vsel %vm1057_vm5, %v6755_v29, %v2037_v21  ;;  %v2040_v13 = vrot.slane %v1841_v40, 7  ;;  %3263 = vmatpush1.msra.mxu0 %v5712_v3 }
 0x206   : > { %2225 = vst.msk [vmem:[#allocation3 + $0xc8] sm:$0xff] %vm269_vm8, %v2151_v59  ;;  %v1774_v18 = vadd.f32 %v4229_v34, %v1447_v56  ;;  %v1442_v49 = vadd.f32 %v1441_v33, %v5435_v44  ;;  %v4232_v27 = vpop.f32.mrf.mxu0  ;;  %v1810_v51 = vadd.f32 %v5530_v7, %v1771_v58  ;;  %v6753_v45 = vrot.slane %v5693_v23, 7  ;;  %3264 = vmatprep.subr.mxu0 %v5156_v52 }
 0x207   : > { %2228 = vst.msk [vmem:[#allocation3 + $0xf8] sm:$0x7f] %vm2215_vm10, %v2153_v5  ;;  %v2152_v37 = vrot.slane %v5693_v23, 1  ;;  %1916 = vrot.lane.b32.xlu0 %v5693_v23, %s4325_s27  ;;  %v4180_v14 = vpop.f32.mrf.mxu1  ;;  %v1843_v2 = vmax.f32 %v1811_v10, 0.0 }
 0x208   : > { %v1773_v34 = vadd.f32 %v1678_v31, %v1442_v49  ;;  %v1457_v44 = vadd.f32 %v4180_v14, %v5441_v12  ;;  %v1688_v55 = vpop.f32.mrf.mxu0  ;;  %v5715_v21 = vmax.f32 %v1810_v51, 0.0  ;;  %v1813_v40 = vadd.f32 %v5530_v7, %v1774_v18 }
 0x209   : > { %v2154_v57 = vsel %vm484_vm4, %v2152_v37, %v2153_v5  ;;  %1922 = vrot.lane.b32.xlu1 %v1843_v2, %s4325_s27  ;;  %v2156_v39 = vrot.slane %v1843_v2, 1  ;;  %v1451_v58 = vpop.f32.mrf.mxu1  ;;  %v5724_v56 = vsel %vm1057_vm5, %v6753_v45, %v2040_v13  ;;  %v2043_v10 = vrot.slane %v1843_v2, 7 }
 0x20a   : > { %2227 = vst.msk [vmem:[#allocation3 + $0xe8] sm:$0xff] %vm269_vm8, %v2154_v57  ;;  %v1776_v12 = vadd.f32 %v4232_v27, %v1457_v44  ;;  %v1452_v31 = vadd.f32 %v1451_v58, %v5451_v50  ;;  %v4235_v59 = vpop.f32.mrf.mxu0  ;;  %v6750_v33 = vrot.slane %v5715_v21, 7  ;;  %v2155_v5 = vrot.slane %v5715_v21, 1 }
 0x20b   : > { %2230 = vst.msk [vmem:[#allocation3 + $0x118] sm:$0x7f] %vm2215_vm10, %v2156_v39  ;;  %1920 = vrot.lane.b32.xlu0 %v5715_v21, %s4325_s27  ;;  %v4183_v18 = vpop.f32.mrf.mxu1  ;;  %v1845_v49 = vmax.f32 %v1813_v40, 0.0  ;;  %v1812_v51 = vadd.f32 %v5530_v7, %v1773_v34 }
 0x20c   : > { %v1775_v13 = vadd.f32 %v1688_v55, %v1452_v31  ;;  %v2157_v27 = vsel %vm484_vm4, %v2155_v5, %v2156_v39  ;;  %v1467_v50 = vadd.f32 %v4183_v18, %v5457_v20  ;;  %v1698_v37 = vpop.f32.mrf.mxu0  ;;  %v1815_v14 = vadd.f32 %v5530_v7, %v1776_v12  ;;  %v5750_v20 = vld [vmem:[%s6746_s3 + $0x1c8] sm:$0xff] }
 0x20d   : > { %2229 = vst.msk [vmem:[#allocation3 + $0x108] sm:$0xff] %vm269_vm8, %v2157_v27  ;;  %1926 = vrot.lane.b32.xlu1 %v1845_v49, %s4325_s27  ;;  %v2159_v2 = vrot.slane %v1845_v49, 1  ;;  %v1461_v44 = vpop.f32.mrf.mxu1  ;;  %v5740_v57 = vmax.f32 %v1812_v51, 0.0  ;;  %v5745_v34 = vsel %vm1057_vm5, %v6750_v33, %v2043_v10  ;;  %3265 = vmatpush1.msra.mxu0 %v5750_v20  ;;  %v2046_v31 = vrot.slane %v1845_v49, 7 }
 0x20e   : > { %v1778_v55 = vadd.f32 %v4235_v59, %v1467_v50  ;;  %v1462_v40 = vadd.f32 %v1461_v44, %v5467_v30  ;;  %v4238_v39 = vpop.f32.mrf.mxu0  ;;  %v1847_v58 = vmax.f32 %v1815_v14, 0.0  ;;  %v1814_v12 = vadd.f32 %v5530_v7, %v1775_v13  ;;  %3266 = vmatprep.subr.mxu0 %v5156_v52  ;;  %v5775_v52 = vld [vmem:[%s6746_s3 + $0x1c0] sm:$0xff] }
 0x20f   : > { %2232 = vst.msk [vmem:[#allocation3 + $0x138] sm:$0x7f] %vm2215_vm10, %v2159_v2  ;;  %v6749_v5 = vrot.slane %v5740_v57, 7  ;;  %v2158_v10 = vrot.slane %v5740_v57, 1  ;;  %1924 = vrot.lane.b32.xlu0 %v5740_v57, %s4325_s27  ;;  %v4186_v18 = vpop.f32.mrf.mxu1  ;;  %3267 = vmatpush1.msra.mxu0 %v5775_v52 }
 0x210   : > { %v1777_v30 = vadd.f32 %v1698_v37, %v1462_v40  ;;  %v1477_v59 = vadd.f32 %v4186_v18, %v5473_v48  ;;  %v1708_v51 = vpop.f32.mrf.mxu0  ;;  %v2162_v13 = vrot.slane %v1847_v58, 1  ;;  %v5764_v50 = vmax.f32 %v1814_v12, 0.0 }
 0x211   : > { %v2160_v27 = vsel %vm484_vm4, %v2158_v10, %v2159_v2  ;;  %1930 = vrot.lane.b32.xlu1 %v1847_v58, %s4325_s27  ;;  %v1471_v49 = vpop.f32.mrf.mxu1  ;;  %v1817_v14 = vadd.f32 %v5530_v7, %v1778_v55  ;;  %v5770_v44 = vsel %vm1057_vm5, %v6749_v5, %v2046_v31  ;;  %v2049_v40 = vrot.slane %v1847_v58, 7 }
 0x212   : > { %2231 = vst.msk [vmem:[#allocation3 + $0x128] sm:$0xff] %vm269_vm8, %v2160_v27  ;;  %v1780_v48 = vadd.f32 %v4238_v39, %v1477_v59  ;;  %v1472_v37 = vadd.f32 %v1471_v49, %v5483_v0  ;;  %v4241_v2 = vpop.f32.mrf.mxu0  ;;  %v1816_v55 = vadd.f32 %v5530_v7, %v1777_v30  ;;  %v6751_v12 = vrot.slane %v5764_v50, 7  ;;  %v5786_v39 = vld [vmem:[#allocation3] sm:$0xff] }
 0x213   : > { %2234 = vst.msk [vmem:[#allocation3 + $0x158] sm:$0x7f] %vm2215_vm10, %v2162_v13  ;;  %v2161_v31 = vrot.slane %v5764_v50, 1  ;;  %1928 = vrot.lane.b32.xlu0 %v5764_v50, %s4325_s27  ;;  %v4189_v10 = vpop.f32.mrf.mxu1  ;;  %v1849_v18 = vmax.f32 %v1817_v14, 0.0  ;;  %3268 = vmatprep.subr.mxu0 %v5786_v39 }
 0x214   : > { %v1779_v0 = vadd.f32 %v1708_v51, %v1472_v37  ;;  %v1487_v59 = vadd.f32 %v4189_v10, %v5489_v16  ;;  %v1718_v30 = vpop.f32.mrf.mxu0  ;;  %v5790_v27 = vmax.f32 %v1816_v55, 0.0  ;;  %v1819_v58 = vadd.f32 %v5530_v7, %v1780_v48 }
 0x215   : > { %v2163_v49 = vsel %vm484_vm4, %v2161_v31, %v2162_v13  ;;  %1934 = vrot.lane.b32.xlu1 %v1849_v18, %s4325_s27  ;;  %v2165_v5 = vrot.slane %v1849_v18, 1  ;;  %v1481_v33 = vpop.f32.mrf.mxu1  ;;  %v5798_v14 = vsel %vm1057_vm5, %v6751_v12, %v2049_v40  ;;  %v2052_v13 = vrot.slane %v1849_v18, 7 }
 0x216   : > { %2233 = vst.msk [vmem:[#allocation3 + $0x148] sm:$0xff] %vm269_vm8, %v2163_v49  ;;  %v1782_v51 = vadd.f32 %v4241_v2, %v1487_v59  ;;  %v1482_v16 = vadd.f32 %v1481_v33, %v5499_v28  ;;  %v4244_v37 = vpop.f32.mrf.mxu0  ;;  %v6752_v55 = vrot.slane %v5790_v27, 7  ;;  %v2164_v48 = vrot.slane %v5790_v27, 1  ;;  %v5811_v2 = vld [vmem:[%s6746_s3 + $0x1b8] sm:$0xff] }
 0x217   : > { %2236 = vst.msk [vmem:[#allocation3 + $0x178] sm:$0x7f] %vm2215_vm10, %v2165_v5  ;;  %1932 = vrot.lane.b32.xlu0 %v5790_v27, %s4325_s27  ;;  %v4192_v31 = vpop.f32.mrf.mxu1  ;;  %v1851_v10 = vmax.f32 %v1819_v58, 0.0  ;;  %v1818_v40 = vadd.f32 %v5530_v7, %v1779_v0  ;;  %3269 = vmatpush1.msra.mxu0 %v5811_v2 }
 0x218   : > { %v1781_v28 = vadd.f32 %v1718_v30, %v1482_v16  ;;  %v2166_v33 = vsel %vm484_vm4, %v2164_v48, %v2165_v5  ;;  %v1497_v59 = vadd.f32 %v4192_v31, %v5505_v38  ;;  %v1728_v18 = vpop.f32.mrf.mxu0  ;;  %v1821_v49 = vadd.f32 %v5530_v7, %v1782_v51  ;;  %3270 = vmatprep.subr.mxu0 %v5786_v39 }
 0x219   : > { %2235 = vst.msk [vmem:[#allocation3 + $0x168] sm:$0xff] %vm269_vm8, %v2166_v33  ;;  %1938 = vrot.lane.b32.xlu1 %v1851_v10, %s4325_s27  ;;  %v2168_v0 = vrot.slane %v1851_v10, 1  ;;  %v1491_v58 = vpop.f32.mrf.mxu1  ;;  %v5819_v12 = vmax.f32 %v1818_v40, 0.0  ;;  %v5824_v30 = vsel %vm1057_vm5, %v6752_v55, %v2052_v13  ;;  %v2055_v31 = vrot.slane %v1851_v10, 7 }
 0x21a   : > { %v1784_v38 = vadd.f32 %v4244_v37, %v1497_v59  ;;  %v1492_v5 = vadd.f32 %v1491_v58, %v5509_v46  ;;  %v4247_v51 = vpop.f32.mrf.mxu0  ;;  %v1853_v16 = vmax.f32 %v1821_v49, 0.0  ;;  %v1820_v48 = vadd.f32 %v5530_v7, %v1781_v28 }
 0x21b   : > { %2238 = vst.msk [vmem:[#allocation3 + $0x198] sm:$0x7f] %vm2215_vm10, %v2168_v0  ;;  %v6754_v40 = vrot.slane %v5819_v12, 7  ;;  %v2167_v33 = vrot.slane %v5819_v12, 1  ;;  %1936 = vrot.lane.b32.xlu0 %v5819_v12, %s4325_s27  ;;  %v4195_v13 = vpop.f32.mrf.mxu1 }
 0x21c   : > { %v1823_v55 = vadd.f32 %v5530_v7, %v1784_v38  ;;  %v1783_v37 = vadd.f32 %v1728_v18, %v1492_v5  ;;  %v1507_v46 = vadd.f32 %v4195_v13, %v5511_v63  ;;  %v1738_v59 = vpop.f32.mrf.mxu0  ;;  %v2171_v10 = vrot.slane %v1853_v16, 1  ;;  %v5848_v18 = vld [vmem:[%s6746_s3 + $0x1b0] sm:$0xff] }
 0x21d   : > { %v2169_v49 = vsel %vm484_vm4, %v2167_v33, %v2168_v0  ;;  %1942 = vrot.lane.b32.xlu1 %v1853_v16, %s4325_s27  ;;  %v1501_v28 = vpop.f32.mrf.mxu1  ;;  %v5838_v58 = vmax.f32 %v1820_v48, 0.0  ;;  %v5843_v45 = vsel %vm1057_vm5, %v6754_v40, %v2055_v31  ;;  %3271 = vmatpush1.msra.mxu0 %v5848_v18  ;;  %v2058_v33 = vrot.slane %v1853_v16, 7  ;;  %v5866_v16 = vld [vmem:[%s6746_s3 + $0x1a8] sm:$0xff] }
 0x21e   : > { %v1855_v63 = vmax.f32 %v1823_v55, 0.0  ;;  %v1822_v38 = vadd.f32 %v5530_v7, %v1783_v37  ;;  %2237 = vst.msk [vmem:[#allocation3 + $0x188] sm:$0xff] %vm269_vm8, %v2169_v49  ;;  %v1786_v0 = vadd.f32 %v4247_v51, %v1507_v46  ;;  %v1502_v5 = vadd.f32 %v1501_v28, %v5513_v11  ;;  %v4250_v48 = vpop.f32.mrf.mxu0  ;;  %3272 = vmatprep.subr.mxu0 %v5786_v39 }
 0x21f   : > { %2240 = vst.msk [vmem:[#allocation3 + $0x1b8] sm:$0x7f] %vm2215_vm10, %v2171_v10  ;;  %v6756_v31 = vrot.slane %v5838_v58, 7  ;;  %v2170_v13 = vrot.slane %v5838_v58, 1  ;;  %1940 = vrot.lane.b32.xlu0 %v5838_v58, %s4325_s27  ;;  %v4198_v55 = vpop.f32.mrf.mxu1  ;;  %3273 = vmatpush1.msra.mxu0 %v5866_v16 }
 0x220   : > { %v2174_v37 = vrot.slane %v1855_v63, 1  ;;  %v5860_v51 = vmax.f32 %v1822_v38, 0.0  ;;  %v1825_v11 = vadd.f32 %v5530_v7, %v1786_v0  ;;  %v1785_v46 = vadd.f32 %v1738_v59, %v1502_v5  ;;  %v1748_v29 = vpop.f32.mrf.mxu0  ;;  %3274 = vmatprep.subr.mxu0 %v5786_v39 }
 0x221   : > { %v2172_v49 = vsel %vm484_vm4, %v2170_v13, %v2171_v10  ;;  %v1517_v28 = vadd.f32 %v4198_v55, %v5515_v22  ;;  %1946 = vrot.lane.b32.xlu1 %v1855_v63, %s4325_s27  ;;  %v1511_v40 = vpop.f32.mrf.mxu1  ;;  %v5874_v38 = vsel %vm1057_vm5, %v6756_v31, %v2058_v33  ;;  %v2061_v13 = vrot.slane %v1855_v63, 7 }
 0x222   : > { %2242 = vst.msk [vmem:[#allocation3 + $0x1d8] sm:$0x7f] %vm2215_vm10, %v2174_v37  ;;  %v2173_v59 = vrot.slane %v5860_v51, 1  ;;  %v1857_v0 = vmax.f32 %v1825_v11, 0.0  ;;  %v1824_v10 = vadd.f32 %v5530_v7, %v1785_v46  ;;  %v1512_v22 = vadd.f32 %v1511_v40, %v5517_v24  ;;  %v5892_v46 = vld [vmem:[%s6746_s3 + $0x1a0] sm:$0xff] }
 0x223   : > { %2239 = vst.msk [vmem:[#allocation3 + $0x1a8] sm:$0xff] %vm269_vm8, %v2172_v49  ;;  %v1788_v5 = vadd.f32 %v4250_v48, %v1517_v28  ;;  %1944 = vrot.lane.b32.xlu0 %v5860_v51, %s4325_s27  ;;  %v2060_v33 = vrot.slane %v5860_v51, 7  ;;  %3275 = vmatpush1.msra.mxu0 %v5892_v46 }
 0x224   : > { %v2175_v55 = vsel %vm484_vm4, %v2173_v59, %v2174_v37  ;;  %v2177_v31 = vrot.slane %v1857_v0, 1  ;;  %v5887_v9 = vmax.f32 %v1824_v10, 0.0  ;;  %v1787_v11 = vadd.f32 %v1748_v29, %v1512_v22  ;;  %3276 = vmatprep.subr.mxu0 %v5786_v39 }
 0x225   : > { %2241 = vst.msk [vmem:[#allocation3 + $0x1c8] sm:$0xff] %vm269_vm8, %v2175_v55  ;;  %v1827_v24 = vadd.f32 %v5530_v7, %v1788_v5  ;;  %1950 = vrot.lane.b32.xlu1 %v1857_v0, %s4325_s27  ;;  %v5900_v40 = vsel %vm1057_vm5, %v2060_v33, %v2061_v13  ;;  %v2064_v37 = vrot.slane %v1857_v0, 7 }
 0x226   : > { %2244 = vst.msk [vmem:[#allocation3 + $0x1f8] sm:$0x7f] %vm2215_vm10, %v2177_v31  ;;  %v2176_v29 = vrot.slane %v5887_v9, 1  ;;  %v1826_v63 = vadd.f32 %v5530_v7, %v1787_v11  ;;  %v6759_v48 = vrot.slane %v5887_v9, 7  ;;  %v5942_v11 = vld [vmem:[%s6746_s3 + $0x190] sm:$0xff] }
 0x227   : > { %v1859_v49 = vmax.f32 %v1827_v24, 0.0  ;;  %1948 = vrot.lane.b32.xlu0 %v5887_v9, %s4325_s27  ;;  %v5949_v24 = vld [vmem:[%s6746_s3 + $0x188] sm:$0xff] }
 0x228   : > { %v2178_v28 = vsel %vm484_vm4, %v2176_v29, %v2177_v31  ;;  %v5911_v59 = vmax.f32 %v1826_v63, 0.0  ;;  %v5916_v10 = vsel %vm1057_vm5, %v6759_v48, %v2064_v37  ;;  %v5928_v31 = vld [vmem:[%s6746_s3 + $0x198] sm:$0xff]  ;;  %v5956_v29 = vld [vmem:[%s6746_s3 + $0x180] sm:$0xff]  ;;  %v5970_v37 = vld [vmem:[%s6746_s3 + $0x230] sm:$0xff] }
 0x229   : > { %2243 = vst.msk [vmem:[#allocation3 + $0x1e8] sm:$0xff] %vm269_vm8, %v2178_v28  ;;  %v2180_v7 = vrot.slane %v1859_v49, 1  ;;  %1954 = vrot.lane.b32.xlu1 %v1859_v49, %s4325_s27  ;;  %v2067_v0 = vrot.slane %v1859_v49, 7  ;;  %3277 = vmatpush1.msra.mxu0 %v5928_v31  ;;  %v5963_v63 = vld [vmem:[%s6746_s3 + $0x238] sm:$0xff]  ;;  %v5977_v49 = vld [vmem:[%s6746_s3 + $0x228] sm:$0xff]  ;;  %v5984_v28 = vld [vmem:[%s6746_s3 + $0x220] sm:$0xff] }
 0x22a   : > { %v6758_v22 = vrot.slane %v5911_v59, 7  ;;  %v2179_v5 = vrot.slane %v5911_v59, 1  ;;  %3278 = vmatprep.subr.mxu0 %v5786_v39 }
 0x22b   : > { %2246 = vst.msk [vmem:[#allocation3 + $0x218] sm:$0x7f] %vm2215_vm10, %v2180_v7  ;;  %1952 = vrot.lane.b32.xlu0 %v5911_v59, %s4325_s27  ;;  %3279 = vmatpush1.msra.mxu0 %v5942_v11 }
 0x22c   : > { %v2181_v13 = vsel %vm484_vm4, %v2179_v5, %v2180_v7  ;;  %v5934_v55 = vsel %vm1057_vm5, %v6758_v22, %v2067_v0  ;;  %3280 = vmatprep.subr.mxu0 %v5786_v39  ;;  %v5991_v7 = vld [vmem:[%s6746_s3 + $0x218] sm:$0xff]  ;;  %v5998_v0 = vld [vmem:[%s6746_s3 + $0x210] sm:$0xff]  ;;  %v6013_v22 = vld [vmem:[%s6746_s3 + $0x200] sm:$0xff] }
 0x22d   : > { %2245 = vst.msk [vmem:[#allocation3 + $0x208] sm:$0xff] %vm269_vm8, %v2181_v13  ;;  %3281 = vmatpush1.msra.mxu0 %v5949_v24  ;;  %v6008_v13 = vld [vmem:[%s6746_s3 + $0x208] sm:$0xff] }
 0x22e   : > { %3282 = vmatprep.subr.mxu0 %v5786_v39 }
 0x22f   : > { %3283 = vmatpush1.msra.mxu0 %v5956_v29 }
 0x230   : > { %3300 = vmatprep.subr.mxu0 %v5786_v39 }
 0x231   : > { %3301 = vmatpush2.msra.mxu0 %v5963_v63 }
 0x232   : > { %3302 = vmatprep.subr.mxu0 %v5786_v39 }
 0x233   : > { %3303 = vmatpush2.msra.mxu0 %v5970_v37 }
 0x234   : > { %3304 = vmatprep.subr.mxu0 %v5786_v39 }
 0x235   : > { %3305 = vmatpush2.msra.mxu0 %v5977_v49 }
 0x236   : > { %3306 = vmatprep.subr.mxu0 %v5786_v39 }
 0x237   : > { %3307 = vmatpush2.msra.mxu0 %v5984_v28 }
 0x238   : > { %3308 = vmatprep.subr.mxu0 %v5786_v39 }
 0x239   : > { %3309 = vmatpush2.msra.mxu0 %v5991_v7 }
 0x23a   : > { %3310 = vmatprep.subr.mxu0 %v5786_v39 }
 0x23b   : > { %3311 = vmatpush2.msra.mxu0 %v5998_v0 }
 0x23c   : > { %3312 = vmatprep.subr.mxu0 %v5786_v39 }
 0x23d   : > { %3313 = vmatpush2.msra.mxu0 %v6008_v13 }
 0x23e   : > { %3314 = vmatprep.subr.mxu0 %v5786_v39 }
 0x23f   : > { %3315 = vmatpush2.msra.mxu0 %v6013_v22 }
 0x25e   : > { %v1895_v5 = vpop.permute.xlu1 %1894 }
 0x25f   : > { %1990 = vst.msk [vmem:[#allocation3 + $0x30] sm:$0xff] %vm1988_vm11, %v1895_v5 }
 0x260   : > { %2103 = vst.msk [vmem:[#allocation3 + $0x30] sm:$0xff] %vm269_vm8, %v5574_v26  ;;  %v1893_v48 = vpop.permute.xlu0 %1892 }
 0x261   : > { %1989 = vst.msk [vmem:[#allocation3 + $0x20] sm:$0xff] %vm1988_vm11, %v1893_v48 }
 0x262   : > { %2102 = vst.msk [vmem:[#allocation3 + $0x20] sm:$0xfe] %vm2101_vm12, %v2021_v54 }
 0x263   : > { %v1899_v26 = vpop.permute.xlu1 %1898 }
 0x264   : > { %1992 = vst.msk [vmem:[#allocation3 + $0x50] sm:$0xff] %vm1988_vm11, %v1899_v26  ;;  %v1897_v5 = vpop.permute.xlu0 %1896 }
 0x265   : > { %2105 = vst.msk [vmem:[#allocation3 + $0x50] sm:$0xff] %vm269_vm8, %v5601_v1 }
 0x266   : > { %1991 = vst.msk [vmem:[#allocation3 + $0x40] sm:$0xff] %vm1988_vm11, %v1897_v5  ;;  %v6086_v5 = vld [vmem:[#allocation3 + $0x68] sm:$0xff] }
 0x267   : > { %2104 = vst.msk [vmem:[#allocation3 + $0x40] sm:$0xfe] %vm2101_vm12, %v2024_v32  ;;  %v1903_v48 = vpop.permute.xlu1 %1902  ;;  %v2337_v19 = vld [vmem:[#allocation3 + $0x30] sm:$0xff] }
 0x268   : > { %1994 = vst.msk [vmem:[#allocation3 + $0x70] sm:$0xff] %vm1988_vm11, %v1903_v48 }
 0x269   : > { %2107 = vst.msk [vmem:[#allocation3 + $0x70] sm:$0xff] %vm269_vm8, %v5625_v42  ;;  %v1901_v4 = vpop.permute.xlu0 %1900  ;;  %v2335_v54 = vld [vmem:[#allocation3 + $0x20] sm:$0xff]  ;;  %v6761_v42 = vrot.slane %v5639_v61, 7 }
 0x26a   : > { %1993 = vst.msk [vmem:[#allocation3 + $0x60] sm:$0xff] %vm1988_vm11, %v1901_v4  ;;  %2585 = vmatmul.mubr.f32.vlgmr.msra.gmra.mxu1 %v2335_v54  ;;  %2916 = vmatmul.mubr.f32.gmra.mxu0 %v2335_v54  ;;  %v6105_v4 = vld [vmem:[#allocation3 + $0x78] sm:$0xff] }
 0x26b   : > { %2106 = vst.msk [vmem:[#allocation3 + $0x60] sm:$0xfe] %vm2101_vm12, %v2027_v47  ;;  %v1907_v1 = vpop.permute.xlu1 %1906  ;;  %4275 = vmatpush1.msra.mxu1 %v5554_v17  ;;  %3869 = vmatprep.mubr.msk.f32.mxu1 %vm269_vm8, %v2338_v25  ;;  %v6048_v47 = vld [vmem:[#allocation3 + $0x48] sm:$0xff] }
 0x26c   : > { %1996 = vst.msk [vmem:[#allocation3 + $0x90] sm:$0xff] %vm1988_vm11, %v1907_v1  ;;  %3903 = vmatprep.mubr.msk.f32.mxu0 %vm269_vm8, %v2338_v25  ;;  %4252 = vmatprep.subr.mxu1 %v5786_v39  ;;  %v6078_v61 = vld [vmem:[#allocation3 + $0x50] sm:$0xff]  ;;  %v6124_v1 = vld [vmem:[#allocation3 + $0x88] sm:$0xff] }
 0x26d   : > { %2109 = vst.msk [vmem:[#allocation3 + $0x90] sm:$0xff] %vm269_vm8, %v5647_v41  ;;  %v1905_v32 = vpop.permute.xlu0 %1904  ;;  %4276 = vmatpush1.msra.mxu1 %v5579_v8  ;;  %v6067_v41 = vld [vmem:[#allocation3 + $0x58] sm:$0xff] }
 0x26e   : > { %1995 = vst.msk [vmem:[#allocation3 + $0x80] sm:$0xff] %vm1988_vm11, %v1905_v32  ;;  %2590 = vmatmul.mubr.f32.gmra.mxu1 %v2337_v19  ;;  %2921 = vmatmul.mubr.f32.gmra.mxu0 %v2337_v19  ;;  %v6059_v60 = vld [vmem:[#allocation3 + $0x40] sm:$0xff]  ;;  %v6143_v32 = vld [vmem:[#allocation3 + $0x98] sm:$0xff] }
 0x26f   : > { %2108 = vst.msk [vmem:[#allocation3 + $0x80] sm:$0xfe] %vm2101_vm12, %v2030_v53  ;;  %v1911_v17 = vpop.permute.xlu1 %1910  ;;  %3870 = vmatprep.mubr.msk.f32.mxu1 %vm269_vm8, %v6048_v47  ;;  %3904 = vmatprep.mubr.msk.f32.mxu0 %vm269_vm8, %v6048_v47 }
 0x270   : > { %1998 = vst.msk [vmem:[#allocation3 + $0xb0] sm:$0xff] %vm1988_vm11, %v1911_v17  ;;  %4253 = vmatprep.subr.mxu1 %v5786_v39  ;;  %v6162_v17 = vld [vmem:[#allocation3 + $0xa8] sm:$0xff] }
 0x271   : > { %2111 = vst.msk [vmem:[#allocation3 + $0xb0] sm:$0xff] %vm269_vm8, %v5674_v36  ;;  %v1909_v8 = vpop.permute.xlu0 %1908  ;;  %4277 = vmatpush1.msra.mxu1 %v5613_v6  ;;  %v6762_v36 = vrot.slane %v5669_v62, 7 }
 0x272   : > { %1997 = vst.msk [vmem:[#allocation3 + $0xa0] sm:$0xff] %vm1988_vm11, %v1909_v8  ;;  %2595 = vmatmul.mubr.f32.gmra.mxu1 %v6059_v60  ;;  %2926 = vmatmul.mubr.f32.gmra.mxu0 %v6059_v60  ;;  %v6097_v62 = vld [vmem:[#allocation3 + $0x60] sm:$0xff] }
 0x273   : > { %2110 = vst.msk [vmem:[#allocation3 + $0xa0] sm:$0xfe] %vm2101_vm12, %v6761_v42  ;;  %v1915_v53 = vpop.permute.xlu1 %1914  ;;  %3871 = vmatprep.mubr.msk.f32.mxu1 %vm269_vm8, %v6067_v41  ;;  %3905 = vmatprep.mubr.msk.f32.mxu0 %vm269_vm8, %v6067_v41  ;;  %v6181_v42 = vld [vmem:[#allocation3 + $0xb8] sm:$0xff] }
 0x274   : > { %2000 = vst.msk [vmem:[#allocation3 + $0xd0] sm:$0xff] %vm1988_vm11, %v1915_v53  ;;  %4254 = vmatprep.subr.mxu1 %v5786_v39 }
 0x275   : > { %2113 = vst.msk [vmem:[#allocation3 + $0xd0] sm:$0xff] %vm269_vm8, %v5699_v35  ;;  %v1913_v6 = vpop.permute.xlu0 %1912  ;;  %4278 = vmatpush1.msra.mxu1 %v5652_v43  ;;  %v6763_v35 = vrot.slane %v5693_v23, 7  ;;  %v6116_v23 = vld [vmem:[#allocation3 + $0x70] sm:$0xff] }
 0x276   : > { %1999 = vst.msk [vmem:[#allocation3 + $0xc0] sm:$0xff] %vm1988_vm11, %v1913_v6  ;;  %2600 = vmatmul.mubr.f32.gmra.mxu1 %v6078_v61  ;;  %2931 = vmatmul.mubr.f32.gmra.mxu0 %v6078_v61  ;;  %v6200_v6 = vld [vmem:[#allocation3 + $0xc8] sm:$0xff] }
 0x277   : > { %2112 = vst.msk [vmem:[#allocation3 + $0xc0] sm:$0xfe] %vm2101_vm12, %v6762_v36  ;;  %v1919_v26 = vpop.permute.xlu1 %1918  ;;  %3872 = vmatprep.mubr.msk.f32.mxu1 %vm269_vm8, %v6086_v5  ;;  %3906 = vmatprep.mubr.msk.f32.mxu0 %vm269_vm8, %v6086_v5 }
 0x278   : > { %2002 = vst.msk [vmem:[#allocation3 + $0xf0] sm:$0xff] %vm1988_vm11, %v1919_v26  ;;  %4255 = vmatprep.subr.mxu1 %v5786_v39  ;;  %v6219_v26 = vld [vmem:[#allocation3 + $0xd8] sm:$0xff] }
 0x279   : > { %2115 = vst.msk [vmem:[#allocation3 + $0xf0] sm:$0xff] %vm269_vm8, %v5724_v56  ;;  %v1917_v43 = vpop.permute.xlu0 %1916  ;;  %4279 = vmatpush1.msra.mxu1 %v5679_v15  ;;  %v6764_v56 = vrot.slane %v5715_v21, 7  ;;  %v6135_v21 = vld [vmem:[#allocation3 + $0x80] sm:$0xff] }
 0x27a   : > { %2001 = vst.msk [vmem:[#allocation3 + $0xe0] sm:$0xff] %vm1988_vm11, %v1917_v43  ;;  %2605 = vmatmul.mubr.f32.gmra.mxu1 %v6097_v62  ;;  %2936 = vmatmul.mubr.f32.gmra.mxu0 %v6097_v62  ;;  %v6238_v43 = vld [vmem:[#allocation3 + $0xe8] sm:$0xff] }
 0x27b   : > { %2114 = vst.msk [vmem:[#allocation3 + $0xe0] sm:$0xfe] %vm2101_vm12, %v6763_v35  ;;  %v1923_v48 = vpop.permute.xlu1 %1922  ;;  %3873 = vmatprep.mubr.msk.f32.mxu1 %vm269_vm8, %v6105_v4  ;;  %3907 = vmatprep.mubr.msk.f32.mxu0 %vm269_vm8, %v6105_v4  ;;  %v6257_v35 = vld [vmem:[#allocation3 + $0xf8] sm:$0xff] }
 0x27c   : > { %2004 = vst.msk [vmem:[#allocation3 + $0x110] sm:$0xff] %vm1988_vm11, %v1923_v48  ;;  %4256 = vmatprep.subr.mxu1 %v5786_v39  ;;  %v6276_v48 = vld [vmem:[#allocation3 + $0x108] sm:$0xff] }
 0x27d   : > { %2117 = vst.msk [vmem:[#allocation3 + $0x110] sm:$0xff] %vm269_vm8, %v5745_v34  ;;  %v1921_v15 = vpop.permute.xlu0 %1920  ;;  %4280 = vmatpush1.msra.mxu1 %v5712_v3  ;;  %v6765_v34 = vrot.slane %v5740_v57, 7 }
 0x27e   : > { %2003 = vst.msk [vmem:[#allocation3 + $0x100] sm:$0xff] %vm1988_vm11, %v1921_v15  ;;  %2610 = vmatmul.mubr.f32.gmra.mxu1 %v6116_v23  ;;  %2941 = vmatmul.mubr.f32.gmra.mxu0 %v6116_v23  ;;  %v6290_v15 = vld [vmem:[#allocation3 + $0x118] sm:$0xff] }
 0x27f   : > { %2116 = vst.msk [vmem:[#allocation3 + $0x100] sm:$0xfe] %vm2101_vm12, %v6764_v56  ;;  %v1927_v54 = vpop.permute.xlu1 %1926  ;;  %3874 = vmatprep.mubr.msk.f32.mxu1 %vm269_vm8, %v6124_v1  ;;  %3908 = vmatprep.mubr.msk.f32.mxu0 %vm269_vm8, %v6124_v1 }
 0x280   : > { %2006 = vst.msk [vmem:[#allocation3 + $0x130] sm:$0xff] %vm1988_vm11, %v1927_v54  ;;  %4257 = vmatprep.subr.mxu1 %v5786_v39 }
 0x281   : > { %2119 = vst.msk [vmem:[#allocation3 + $0x130] sm:$0xff] %vm269_vm8, %v5770_v44  ;;  %v1925_v3 = vpop.permute.xlu0 %1924  ;;  %4281 = vmatpush1.msra.mxu1 %v5750_v20  ;;  %v6154_v20 = vld [vmem:[#allocation3 + $0x90] sm:$0xff]  ;;  %v6766_v44 = vrot.slane %v5764_v50, 7 }
 0x282   : > { %2005 = vst.msk [vmem:[#allocation3 + $0x120] sm:$0xff] %vm1988_vm11, %v1925_v3  ;;  %2615 = vmatmul.mubr.f32.gmra.mxu1 %v6135_v21  ;;  %2946 = vmatmul.mubr.f32.gmra.mxu0 %v6135_v21  ;;  %v6304_v3 = vld [vmem:[#allocation3 + $0x128] sm:$0xff] }
 0x283   : > { %2118 = vst.msk [vmem:[#allocation3 + $0x120] sm:$0xfe] %vm2101_vm12, %v6765_v34  ;;  %v1931_v25 = vpop.permute.xlu1 %1930  ;;  %3875 = vmatprep.mubr.msk.f32.mxu1 %vm269_vm8, %v6143_v32  ;;  %3909 = vmatprep.mubr.msk.f32.mxu0 %vm269_vm8, %v6143_v32 }
 0x284   : > { %2008 = vst.msk [vmem:[#allocation3 + $0x150] sm:$0xff] %vm1988_vm11, %v1931_v25  ;;  %4258 = vmatprep.subr.mxu1 %v5786_v39  ;;  %v6299_v54 = vld [vmem:[#allocation3 + $0x110] sm:$0xff] }
 0x285   : > { %2121 = vst.msk [vmem:[#allocation3 + $0x150] sm:$0xff] %vm269_vm8, %v5798_v14  ;;  %v1929_v57 = vpop.permute.xlu0 %1928  ;;  %4282 = vmatpush1.msra.mxu1 %v5775_v52  ;;  %v6173_v52 = vld [vmem:[#allocation3 + $0xa0] sm:$0xff]  ;;  %v6767_v14 = vrot.slane %v5790_v27, 7 }
 0x286   : > { %2007 = vst.msk [vmem:[#allocation3 + $0x140] sm:$0xff] %vm1988_vm11, %v1929_v57  ;;  %2620 = vmatmul.mubr.f32.gmra.mxu1 %v6154_v20  ;;  %2951 = vmatmul.mubr.f32.gmra.mxu0 %v6154_v20 }
 0x287   : > { %2120 = vst.msk [vmem:[#allocation3 + $0x140] sm:$0xfe] %vm2101_vm12, %v6766_v44  ;;  %v1935_v19 = vpop.permute.xlu1 %1934  ;;  %3876 = vmatprep.mubr.msk.f32.mxu1 %vm269_vm8, %v6162_v17  ;;  %3910 = vmatprep.mubr.msk.f32.mxu0 %vm269_vm8, %v6162_v17 }
 0x288   : > { %2010 = vst.msk [vmem:[#allocation3 + $0x170] sm:$0xff] %vm1988_vm11, %v1935_v19  ;;  %4259 = vmatprep.subr.mxu1 %v5786_v39  ;;  %v6323_v25 = vld [vmem:[#allocation3 + $0x130] sm:$0xff] }
 0x289   : > { %2123 = vst.msk [vmem:[#allocation3 + $0x170] sm:$0xff] %vm269_vm8, %v5824_v30  ;;  %v1933_v50 = vpop.permute.xlu0 %1932  ;;  %4283 = vmatpush1.msra.mxu1 %v5811_v2  ;;  %v6192_v2 = vld [vmem:[#allocation3 + $0xb0] sm:$0xff]  ;;  %v6768_v30 = vrot.slane %v5819_v12, 7  ;;  %v6211_v12 = vld [vmem:[#allocation3 + $0xc0] sm:$0xff] }
 0x28a   : > { %2009 = vst.msk [vmem:[#allocation3 + $0x160] sm:$0xff] %vm1988_vm11, %v1933_v50  ;;  %2625 = vmatmul.mubr.f32.gmra.mxu1 %v6173_v52  ;;  %2956 = vmatmul.mubr.f32.gmra.mxu0 %v6173_v52  ;;  %v6311_v34 = vld [vmem:[#allocation3 + $0x120] sm:$0xff] }
 0x28b   : > { %2122 = vst.msk [vmem:[#allocation3 + $0x160] sm:$0xfe] %vm2101_vm12, %v6767_v14  ;;  %v1939_v8 = vpop.permute.xlu1 %1938  ;;  %3877 = vmatprep.mubr.msk.f32.mxu1 %vm269_vm8, %v6181_v42  ;;  %3911 = vmatprep.mubr.msk.f32.mxu0 %vm269_vm8, %v6181_v42 }
 0x28c   : > { %2012 = vst.msk [vmem:[#allocation3 + $0x190] sm:$0xff] %vm1988_vm11, %v1939_v8  ;;  %4260 = vmatprep.subr.mxu1 %v5786_v39  ;;  %v6347_v44 = vld [vmem:[#allocation3 + $0x150] sm:$0xff] }
 0x28d   : > { %2125 = vst.msk [vmem:[#allocation3 + $0x190] sm:$0xff] %vm269_vm8, %v5843_v45  ;;  %v1937_v27 = vpop.permute.xlu0 %1936  ;;  %4284 = vmatpush1.msra.mxu1 %v5848_v18  ;;  %v6769_v18 = vrot.slane %v5838_v58, 7 }
 0x28e   : > { %2011 = vst.msk [vmem:[#allocation3 + $0x180] sm:$0xff] %vm1988_vm11, %v1937_v27  ;;  %2630 = vmatmul.mubr.f32.gmra.mxu1 %v6192_v2  ;;  %2961 = vmatmul.mubr.f32.gmra.mxu0 %v6192_v2  ;;  %v6335_v57 = vld [vmem:[#allocation3 + $0x140] sm:$0xff] }
 0x28f   : > { %2124 = vst.msk [vmem:[#allocation3 + $0x180] sm:$0xfe] %vm2101_vm12, %v6768_v30  ;;  %v1943_v53 = vpop.permute.xlu1 %1942  ;;  %3878 = vmatprep.mubr.msk.f32.mxu1 %vm269_vm8, %v6200_v6  ;;  %3912 = vmatprep.mubr.msk.f32.mxu0 %vm269_vm8, %v6200_v6  ;;  %v6420_v30 = vld [vmem:[#allocation3 + $0x1c8] sm:$0xff] }
 0x290   : > { %2014 = vst.msk [vmem:[#allocation3 + $0x1b0] sm:$0xff] %vm1988_vm11, %v1943_v53  ;;  %4261 = vmatprep.subr.mxu1 %v5786_v39  ;;  %v6371_v50 = vld [vmem:[#allocation3 + $0x170] sm:$0xff] }
 0x291   : > { %2127 = vst.msk [vmem:[#allocation3 + $0x1b0] sm:$0xff] %vm269_vm8, %v5874_v38  ;;  %v1941_v45 = vpop.permute.xlu0 %1940  ;;  %4285 = vmatpush1.msra.mxu1 %v5866_v16  ;;  %v6230_v16 = vld [vmem:[#allocation3 + $0xd0] sm:$0xff] }
 0x292   : > { %2013 = vst.msk [vmem:[#allocation3 + $0x1a0] sm:$0xff] %vm1988_vm11, %v1941_v45  ;;  %2635 = vmatmul.mubr.f32.gmra.mxu1 %v6211_v12  ;;  %2966 = vmatmul.mubr.f32.gmra.mxu0 %v6211_v12  ;;  %v6359_v19 = vld [vmem:[#allocation3 + $0x160] sm:$0xff]  ;;  %v6430_v45 = vld [vmem:[#allocation3 + $0x1d8] sm:$0xff] }
 0x293   : > { %2126 = vst.msk [vmem:[#allocation3 + $0x1a0] sm:$0xfe] %vm2101_vm12, %v6769_v18  ;;  %v1947_v36 = vpop.permute.xlu1 %1946  ;;  %3879 = vmatprep.mubr.msk.f32.mxu1 %vm269_vm8, %v6219_v26  ;;  %3913 = vmatprep.mubr.msk.f32.mxu0 %vm269_vm8, %v6219_v26 }
 0x294   : > { %2016 = vst.msk [vmem:[#allocation3 + $0x1d0] sm:$0xff] %vm1988_vm11, %v1947_v36  ;;  %4262 = vmatprep.subr.mxu1 %v5786_v39  ;;  %v6395_v8 = vld [vmem:[#allocation3 + $0x190] sm:$0xff]  ;;  %v6440_v36 = vld [vmem:[#allocation3 + $0x1e8] sm:$0xff] }
 0x295   : > { %2129 = vst.msk [vmem:[#allocation3 + $0x1d0] sm:$0xff] %vm269_vm8, %v5900_v40  ;;  %v1945_v58 = vpop.permute.xlu0 %1944  ;;  %4286 = vmatpush1.msra.mxu1 %v5892_v46  ;;  %v6770_v46 = vrot.slane %v5887_v9, 7 }
 0x296   : > { %2015 = vst.msk [vmem:[#allocation3 + $0x1c0] sm:$0xff] %vm1988_vm11, %v1945_v58  ;;  %2640 = vmatmul.mubr.f32.gmra.mxu1 %v6230_v16  ;;  %2971 = vmatmul.mubr.f32.gmra.mxu0 %v6230_v16  ;;  %v6383_v14 = vld [vmem:[#allocation3 + $0x180] sm:$0xff] }
 0x297   : > { %2128 = vst.msk [vmem:[#allocation3 + $0x1c0] sm:$0xfe] %vm2101_vm12, %v2060_v33  ;;  %v1951_v38 = vpop.permute.xlu1 %1950  ;;  %3880 = vmatprep.mubr.msk.f32.mxu1 %vm269_vm8, %v6238_v43  ;;  %3914 = vmatprep.mubr.msk.f32.mxu0 %vm269_vm8, %v6238_v43  ;;  %v6249_v33 = vld [vmem:[#allocation3 + $0xe0] sm:$0xff] }
 0x298   : > { %2018 = vst.msk [vmem:[#allocation3 + $0x1f0] sm:$0xff] %vm1988_vm11, %v1951_v38  ;;  %4263 = vmatprep.subr.mxu1 %v5786_v39  ;;  %v6450_v38 = vld [vmem:[#allocation3 + $0x1f8] sm:$0xff] }
 0x299   : > { %2131 = vst.msk [vmem:[#allocation3 + $0x1f0] sm:$0xff] %vm269_vm8, %v5916_v10  ;;  %v1949_v51 = vpop.permute.xlu0 %1948  ;;  %4287 = vmatpush1.msra.mxu1 %v5928_v31  ;;  %v6268_v10 = vld [vmem:[#allocation3 + $0xf0] sm:$0xff]  ;;  %v6771_v31 = vrot.slane %v5911_v59, 7 }
 0x29a   : > { %2017 = vst.msk [vmem:[#allocation3 + $0x1e0] sm:$0xff] %vm1988_vm11, %v1949_v51  ;;  %2645 = vmatmul.mubr.f32.gmra.mxu1 %v6249_v33  ;;  %2976 = vmatmul.mubr.f32.gmra.mxu0 %v6249_v33  ;;  %v6406_v27 = vld [vmem:[#allocation3 + $0x1a0] sm:$0xff] }
 0x29b   : > { %2130 = vst.msk [vmem:[#allocation3 + $0x1e0] sm:$0xfe] %vm2101_vm12, %v6770_v46  ;;  %v1955_v40 = vpop.permute.xlu1 %1954  ;;  %3881 = vmatprep.mubr.msk.f32.mxu1 %vm269_vm8, %v6257_v35  ;;  %3915 = vmatprep.mubr.msk.f32.mxu0 %vm269_vm8, %v6257_v35  ;;  %v6460_v46 = vld [vmem:[#allocation3 + $0x208] sm:$0xff] }
 0x29c   : > { %2020 = vst.msk [vmem:[#allocation3 + $0x210] sm:$0xff] %vm1988_vm11, %v1955_v40  ;;  %4264 = vmatprep.subr.mxu1 %v5786_v39  ;;  %v6436_v18 = vld [vmem:[#allocation3 + $0x1d0] sm:$0xff] }
 0x29d   : > { %2133 = vst.msk [vmem:[#allocation3 + $0x210] sm:$0xff] %vm269_vm8, %v5934_v55  ;;  %v1953_v9 = vpop.permute.xlu0 %1952  ;;  %4288 = vmatpush1.msra.mxu1 %v5942_v11  ;;  %v6282_v55 = vpop.f32.mrf.mxu0  ;;  %v6285_v11 = vld [vmem:[#allocation3 + $0x100] sm:$0xff] }
 0x29e   : > { %2019 = vst.msk [vmem:[#allocation3 + $0x200] sm:$0xff] %vm1988_vm11, %v1953_v9  ;;  %2650 = vmatmul.mubr.f32.gmra.mxu1 %v6268_v10  ;;  %2981 = vmatmul.mubr.f32.gmra.mxu0 %v6268_v10  ;;  %v6426_v53 = vld [vmem:[#allocation3 + $0x1c0] sm:$0xff]  ;;  %v6470_v9 = vld [vmem:[#allocation3 + $0x218] sm:$0xff] }
 0x29f   : > { %2132 = vst.msk [vmem:[#allocation3 + $0x200] sm:$0xfe] %vm2101_vm12, %v6771_v31  ;;  %3882 = vmatprep.mubr.msk.f32.mxu1 %vm269_vm8, %v6276_v48  ;;  %3916 = vmatprep.mubr.msk.f32.mxu0 %vm269_vm8, %v6276_v48  ;;  %v2909_v59 = vpop.f32.mrf.mxu0 }
 0x2a0   : > { %4265 = vmatprep.subr.mxu1 %v5786_v39  ;;  %v6456_v51 = vld [vmem:[#allocation3 + $0x1f0] sm:$0xff] }
 0x2a1   : > { %4289 = vmatpush1.msra.mxu1 %v5949_v24  ;;  %v6296_v56 = vpop.f32.mrf.mxu0 }
 0x2a2   : > { %2655 = vmatmul.mubr.f32.gmra.mxu1 %v6285_v11  ;;  %2986 = vmatmul.mubr.f32.gmra.mxu0 %v6285_v11  ;;  %v6446_v58 = vld [vmem:[#allocation3 + $0x1e0] sm:$0xff] }
 0x2a3   : > { %3883 = vmatprep.mubr.msk.f32.mxu1 %vm269_vm8, %v6290_v15  ;;  %3917 = vmatprep.mubr.msk.f32.mxu0 %vm269_vm8, %v6290_v15  ;;  %v2914_v24 = vpop.f32.mrf.mxu0 }
 0x2a4   : > { %4266 = vmatprep.subr.mxu1 %v5786_v39  ;;  %v6476_v31 = vld [vmem:[#allocation3 + $0x210] sm:$0xff]  ;;  %v3130_v24 = vld [vmem:[#allocation3 + $0x238] sm:$0xff] }
 0x2a5   : > { %4290 = vmatpush1.msra.mxu1 %v5956_v29  ;;  %v6316_v29 = vld [vmem:[#allocation3 + $0x138] sm:$0xff] }
 0x2a6   : > { %2660 = vmatmul.mubr.f32.gmra.mxu1 %v6299_v54  ;;  %2991 = vmatmul.mubr.f32.gmra.mxu0 %v6299_v54  ;;  %v6466_v40 = vld [vmem:[#allocation3 + $0x200] sm:$0xff] }
 0x2a7   : > { %3884 = vmatprep.mubr.msk.f32.mxu1 %vm269_vm8, %v6304_v3  ;;  %3918 = vmatprep.mubr.msk.f32.mxu0 %vm269_vm8, %v6304_v3 }
 0x2a8   : > { %4267 = vmatprep.subr.mxu1 %v5786_v39 }
 0x2a9   : > { %4291 = vmatpush2.msra.mxu1 %v5963_v63  ;;  %v6328_v63 = vld [vmem:[#allocation3 + $0x148] sm:$0xff] }
 0x2aa   : > { %2665 = vmatmul.mubr.f32.gmra.mxu1 %v6311_v34  ;;  %2996 = vmatmul.mubr.f32.gmra.mxu0 %v6311_v34 }
 0x2ab   : > { %3885 = vmatprep.mubr.msk.f32.mxu1 %vm269_vm8, %v6316_v29  ;;  %3919 = vmatprep.mubr.msk.f32.mxu0 %vm269_vm8, %v6316_v29 }
 0x2ac   : > { %4268 = vmatprep.subr.mxu1 %v5786_v39 }
 0x2ad   : > { %4292 = vmatpush2.msra.mxu1 %v5970_v37  ;;  %v6340_v37 = vld [vmem:[#allocation3 + $0x158] sm:$0xff] }
 0x2ae   : > { %2670 = vmatmul.mubr.f32.gmra.mxu1 %v6323_v25  ;;  %3001 = vmatmul.mubr.f32.gmra.mxu0 %v6323_v25 }
 0x2af   : > { %3886 = vmatprep.mubr.msk.f32.mxu1 %vm269_vm8, %v6328_v63  ;;  %3920 = vmatprep.mubr.msk.f32.mxu0 %vm269_vm8, %v6328_v63 }
 0x2b0   : > { %4269 = vmatprep.subr.mxu1 %v5786_v39 }
 0x2b1   : > { %4293 = vmatpush2.msra.mxu1 %v5977_v49  ;;  %v6352_v49 = vld [vmem:[#allocation3 + $0x168] sm:$0xff] }
 0x2b2   : > { %2675 = vmatmul.mubr.f32.gmra.mxu1 %v6335_v57  ;;  %3006 = vmatmul.mubr.f32.gmra.mxu0 %v6335_v57 }
 0x2b3   : > { %3887 = vmatprep.mubr.msk.f32.mxu1 %vm269_vm8, %v6340_v37  ;;  %3921 = vmatprep.mubr.msk.f32.mxu0 %vm269_vm8, %v6340_v37 }
 0x2b4   : > { %4270 = vmatprep.subr.mxu1 %v5786_v39 }
 0x2b5   : > { %4294 = vmatpush2.msra.mxu1 %v5984_v28  ;;  %v6364_v28 = vld [vmem:[#allocation3 + $0x178] sm:$0xff] }
 0x2b6   : > { %2680 = vmatmul.mubr.f32.gmra.mxu1 %v6347_v44  ;;  %3011 = vmatmul.mubr.f32.gmra.mxu0 %v6347_v44 }
 0x2b7   : > { %3888 = vmatprep.mubr.msk.f32.mxu1 %vm269_vm8, %v6352_v49  ;;  %3922 = vmatprep.mubr.msk.f32.mxu0 %vm269_vm8, %v6352_v49 }
 0x2b8   : > { %4271 = vmatprep.subr.mxu1 %v5786_v39 }
 0x2b9   : > { %4295 = vmatpush2.msra.mxu1 %v5991_v7  ;;  %v6376_v7 = vld [vmem:[#allocation3 + $0x188] sm:$0xff] }
 0x2ba   : > { %2685 = vmatmul.mubr.f32.gmra.mxu1 %v6359_v19  ;;  %3016 = vmatmul.mubr.f32.gmra.mxu0 %v6359_v19 }
 0x2bb   : > { %3889 = vmatprep.mubr.msk.f32.mxu1 %vm269_vm8, %v6364_v28  ;;  %3923 = vmatprep.mubr.msk.f32.mxu0 %vm269_vm8, %v6364_v28 }
 0x2bc   : > { %4272 = vmatprep.subr.mxu1 %v5786_v39 }
 0x2bd   : > { %4296 = vmatpush2.msra.mxu1 %v5998_v0  ;;  %v6388_v0 = vld [vmem:[#allocation3 + $0x198] sm:$0xff] }
 0x2be   : > { %2690 = vmatmul.mubr.f32.gmra.mxu1 %v6371_v50  ;;  %3021 = vmatmul.mubr.f32.gmra.mxu0 %v6371_v50 }
 0x2bf   : > { %3890 = vmatprep.mubr.msk.f32.mxu1 %vm269_vm8, %v6376_v7  ;;  %3924 = vmatprep.mubr.msk.f32.mxu0 %vm269_vm8, %v6376_v7 }
 0x2c0   : > { %4273 = vmatprep.subr.mxu1 %v5786_v39 }
 0x2c1   : > { %4297 = vmatpush2.msra.mxu1 %v6008_v13  ;;  %v6400_v13 = vld [vmem:[#allocation3 + $0x1a8] sm:$0xff] }
 0x2c2   : > { %2695 = vmatmul.mubr.f32.gmra.mxu1 %v6383_v14  ;;  %3026 = vmatmul.mubr.f32.gmra.mxu0 %v6383_v14 }
 0x2c3   : > { %3891 = vmatprep.mubr.msk.f32.mxu1 %vm269_vm8, %v6388_v0  ;;  %3925 = vmatprep.mubr.msk.f32.mxu0 %vm269_vm8, %v6388_v0 }
 0x2c4   : > { %4274 = vmatprep.subr.mxu1 %v5786_v39  ;;  %v6410_v39 = vld [vmem:[#allocation3 + $0x1b8] sm:$0xff] }
 0x2c5   : > { %4298 = vmatpush2.msra.mxu1 %v6013_v22  ;;  %v6416_v22 = vld [vmem:[#allocation3 + $0x1b0] sm:$0xff] }
 0x2c6   : > { %2700 = vmatmul.mubr.f32.gmra.mxu1 %v6395_v8  ;;  %3031 = vmatmul.mubr.f32.gmra.mxu0 %v6395_v8 }
 0x2c7   : > { %3892 = vmatprep.mubr.msk.f32.mxu1 %vm269_vm8, %v6400_v13  ;;  %3926 = vmatprep.mubr.msk.f32.mxu0 %vm269_vm8, %v6400_v13 }
 0x2ca   : > { %2705 = vmatmul.mubr.f32.gmra.mxu1 %v6406_v27  ;;  %3036 = vmatmul.mubr.f32.gmra.mxu0 %v6406_v27 }
 0x2cb   : > { %3893 = vmatprep.mubr.msk.f32.mxu1 %vm269_vm8, %v6410_v39  ;;  %3927 = vmatprep.mubr.msk.f32.mxu0 %vm269_vm8, %v6410_v39 }
 0x2ce   : > { %2710 = vmatmul.mubr.f32.gmra.mxu1 %v6416_v22  ;;  %3041 = vmatmul.mubr.f32.gmra.mxu0 %v6416_v22 }
 0x2cf   : > { %3894 = vmatprep.mubr.msk.f32.mxu1 %vm269_vm8, %v6420_v30  ;;  %3928 = vmatprep.mubr.msk.f32.mxu0 %vm269_vm8, %v6420_v30 }
 0x2d2   : > { %2715 = vmatmul.mubr.f32.gmra.mxu1 %v6426_v53  ;;  %3046 = vmatmul.mubr.f32.gmra.mxu0 %v6426_v53 }
 0x2d3   : > { %3895 = vmatprep.mubr.msk.f32.mxu1 %vm269_vm8, %v6430_v45  ;;  %3929 = vmatprep.mubr.msk.f32.mxu0 %vm269_vm8, %v6430_v45 }
 0x2d6   : > { %2720 = vmatmul.mubr.f32.gmra.mxu1 %v6436_v18  ;;  %3051 = vmatmul.mubr.f32.gmra.mxu0 %v6436_v18 }
 0x2d7   : > { %3896 = vmatprep.mubr.msk.f32.mxu1 %vm269_vm8, %v6440_v36  ;;  %3930 = vmatprep.mubr.msk.f32.mxu0 %vm269_vm8, %v6440_v36 }
 0x2da   : > { %2725 = vmatmul.mubr.f32.gmra.mxu1 %v6446_v58  ;;  %3056 = vmatmul.mubr.f32.gmra.mxu0 %v6446_v58 }
 0x2db   : > { %3897 = vmatprep.mubr.msk.f32.mxu1 %vm269_vm8, %v6450_v38  ;;  %3931 = vmatprep.mubr.msk.f32.mxu0 %vm269_vm8, %v6450_v38 }
 0x2de   : > { %2730 = vmatmul.mubr.f32.gmra.mxu1 %v6456_v51  ;;  %3061 = vmatmul.mubr.f32.gmra.mxu0 %v6456_v51 }
 0x2df   : > { %3898 = vmatprep.mubr.msk.f32.mxu1 %vm269_vm8, %v6460_v46  ;;  %3956 = vmatprep.mubr.msk.f32.mxu0 %vm269_vm8, %v6048_v47 }
 0x2e2   : > { %2735 = vmatmul.mubr.f32.gmra.mxu1 %v6466_v40  ;;  %3317 = vmatmul.mubr.f32.vlgmr.msra.gmra.mxu0 %v6059_v60 }
 0x2e3   : > { %3899 = vmatprep.mubr.msk.f32.mxu1 %vm269_vm8, %v6470_v9  ;;  %3957 = vmatprep.mubr.msk.f32.mxu0 %vm269_vm8, %v6067_v41 }
 0x2e6   : > { %2740 = vmatmul.mubr.f32.gmra.mxu1 %v6476_v31  ;;  %3322 = vmatmul.mubr.f32.gmra.mxu0 %v6078_v61 }
 0x2e7   : > { %3958 = vmatprep.mubr.msk.f32.mxu0 %vm269_vm8, %v6086_v5  ;;  %3964 = vmatprep.mubr.msk.f32.mxu1 %vm269_vm8, %v6200_v6 }
 0x2ea   : > { %3327 = vmatmul.mubr.f32.gmra.mxu0 %v6097_v62  ;;  %3357 = vmatmul.mubr.f32.vlgmr.msra.gmra.mxu1 %v6211_v12 }
 0x2eb   : > { %3959 = vmatprep.mubr.msk.f32.mxu0 %vm269_vm8, %v6105_v4  ;;  %3965 = vmatprep.mubr.msk.f32.mxu1 %vm269_vm8, %v6219_v26 }
 0x2ee   : > { %3332 = vmatmul.mubr.f32.gmra.mxu0 %v6116_v23  ;;  %3362 = vmatmul.mubr.f32.gmra.mxu1 %v6230_v16 }
 0x2ef   : > { %3960 = vmatprep.mubr.msk.f32.mxu0 %vm269_vm8, %v6124_v1  ;;  %3966 = vmatprep.mubr.msk.f32.mxu1 %vm269_vm8, %v6238_v43 }
 0x2f2   : > { %3337 = vmatmul.mubr.f32.gmra.mxu0 %v6135_v21  ;;  %3367 = vmatmul.mubr.f32.gmra.mxu1 %v6249_v33 }
 0x2f3   : > { %3961 = vmatprep.mubr.msk.f32.mxu0 %vm269_vm8, %v6143_v32  ;;  %3967 = vmatprep.mubr.msk.f32.mxu1 %vm269_vm8, %v6257_v35 }
 0x2f6   : > { %3342 = vmatmul.mubr.f32.gmra.mxu0 %v6154_v20  ;;  %3372 = vmatmul.mubr.f32.gmra.mxu1 %v6268_v10  ;;  %v3128_v10 = vld [vmem:[#allocation3 + $0x228] sm:$0xff] }
 0x2f7   : > { %3962 = vmatprep.mubr.msk.f32.mxu0 %vm269_vm8, %v6162_v17  ;;  %3968 = vmatprep.mubr.msk.f32.mxu1 %vm269_vm8, %v6276_v48 }
 0x2fa   : > { %3347 = vmatmul.mubr.f32.gmra.mxu0 %v6173_v52  ;;  %3377 = vmatmul.mubr.f32.gmra.mxu1 %v6285_v11 }
 0x2fb   : > { %3963 = vmatprep.mubr.msk.f32.mxu0 %vm269_vm8, %v6181_v42  ;;  %3969 = vmatprep.mubr.msk.f32.mxu1 %vm269_vm8, %v6290_v15 }
 0x2fe   : > { %3352 = vmatmul.mubr.f32.gmra.mxu0 %v6192_v2  ;;  %3382 = vmatmul.mubr.f32.gmra.mxu1 %v6299_v54 }
 0x2ff   : > { %3970 = vmatprep.mubr.msk.f32.mxu1 %vm269_vm8, %v6304_v3 }
 0x302   : > { %3387 = vmatmul.mubr.f32.gmra.mxu1 %v6311_v34 }
 0x303   : > { %3971 = vmatprep.mubr.msk.f32.mxu1 %vm269_vm8, %v6316_v29  ;;  %v4313_v29 = vld [vmem:[#allocation3] sm:$0xff] }
 0x306   : > { %3392 = vmatmul.mubr.f32.gmra.mxu1 %v6323_v25 }
 0x307   : > { %3972 = vmatprep.mubr.msk.f32.mxu1 %vm269_vm8, %v6328_v63 }
 0x30a   : > { %3397 = vmatmul.mubr.f32.gmra.mxu1 %v6335_v57 }
 0x30b   : > { %3973 = vmatprep.mubr.msk.f32.mxu1 %vm269_vm8, %v6340_v37 }
 0x30e   : > { %3402 = vmatmul.mubr.f32.gmra.mxu1 %v6347_v44 }
 0x30f   : > { %3974 = vmatprep.mubr.msk.f32.mxu1 %vm269_vm8, %v6352_v49 }
 0x312   : > { %3407 = vmatmul.mubr.f32.gmra.mxu1 %v6359_v19 }
 0x313   : > { %3975 = vmatprep.mubr.msk.f32.mxu1 %vm269_vm8, %v6364_v28 }
 0x316   : > { %3412 = vmatmul.mubr.f32.gmra.mxu1 %v6371_v50 }
 0x317   : > { %3976 = vmatprep.mubr.msk.f32.mxu1 %vm269_vm8, %v6376_v7 }
 0x31a   : > { %3417 = vmatmul.mubr.f32.gmra.mxu1 %v6383_v14 }
 0x31b   : > { %3977 = vmatprep.mubr.msk.f32.mxu1 %vm269_vm8, %v6388_v0 }
 0x31e   : > { %3422 = vmatmul.mubr.f32.gmra.mxu1 %v6395_v8 }
 0x31f   : > { %3978 = vmatprep.mubr.msk.f32.mxu1 %vm269_vm8, %v6400_v13 }
 0x322   : > { %3427 = vmatmul.mubr.f32.gmra.mxu1 %v6406_v27 }
 0x323   : > { %3979 = vmatprep.mubr.msk.f32.mxu1 %vm269_vm8, %v6410_v39 }
 0x326   : > { %3432 = vmatmul.mubr.f32.gmra.mxu1 %v6416_v22 }
 0x327   : > { %3980 = vmatprep.mubr.msk.f32.mxu1 %vm269_vm8, %v6420_v30 }
 0x32a   : > { %v6548_v47 = vpop.f32.mrf.mxu1  ;;  %v2917_v60 = vpop.f32.mrf.mxu0  ;;  %3437 = vmatmul.mubr.f32.gmra.mxu1 %v6426_v53 }
 0x32b   : > { %3981 = vmatprep.mubr.msk.f32.mxu1 %vm269_vm8, %v6430_v45 }
 0x32c   : > { %v2588_v41 = vpop.f32.mrf.mxu1  ;;  %v2919_v61 = vpop.f32.mrf.mxu0 }
 0x32e   : > { %v6553_v5 = vpop.f32.mrf.mxu1  ;;  %v2922_v62 = vpop.f32.mrf.mxu0  ;;  %3442 = vmatmul.mubr.f32.gmra.mxu1 %v6436_v18 }
 0x32f   : > { %3982 = vmatprep.mubr.msk.f32.mxu1 %vm269_vm8, %v6440_v36 }
 0x330   : > { %v2593_v4 = vpop.f32.mrf.mxu1  ;;  %v2924_v23 = vpop.f32.mrf.mxu0 }
 0x332   : > { %v2596_v1 = vpop.f32.mrf.mxu1  ;;  %v2927_v21 = vpop.f32.mrf.mxu0  ;;  %3447 = vmatmul.mubr.f32.gmra.mxu1 %v6446_v58 }
 0x333   : > { %v6559_v32 = vadd.f32 %v2917_v60, %v2596_v1  ;;  %3983 = vmatprep.mubr.msk.f32.mxu1 %vm269_vm8, %v6450_v38 }
 0x334   : > { %v2598_v20 = vpop.f32.mrf.mxu1  ;;  %v2929_v17 = vpop.f32.mrf.mxu0 }
 0x336   : > { %v2601_v52 = vpop.f32.mrf.mxu1  ;;  %v2932_v42 = vpop.f32.mrf.mxu0  ;;  %3452 = vmatmul.mubr.f32.gmra.mxu1 %v6456_v51 }
 0x337   : > { %v6564_v2 = vadd.f32 %v2922_v62, %v2601_v52  ;;  %3984 = vmatprep.mubr.msk.f32.mxu1 %vm269_vm8, %v6460_v46 }
 0x338   : > { %v2603_v6 = vpop.f32.mrf.mxu1  ;;  %v2934_v12 = vpop.f32.mrf.mxu0 }
 0x33a   : > { %v2606_v26 = vpop.f32.mrf.mxu1  ;;  %v2937_v16 = vpop.f32.mrf.mxu0  ;;  %3457 = vmatmul.mubr.f32.gmra.mxu1 %v6466_v40 }
 0x33b   : > { %v6569_v43 = vadd.f32 %v2927_v21, %v2606_v26  ;;  %3985 = vmatprep.mubr.msk.f32.mxu1 %vm269_vm8, %v6470_v9 }
 0x33c   : > { %v2608_v33 = vpop.f32.mrf.mxu1  ;;  %v2939_v35 = vpop.f32.mrf.mxu0 }
 0x33e   : > { %v2611_v48 = vpop.f32.mrf.mxu1  ;;  %v2942_v11 = vpop.f32.mrf.mxu0  ;;  %3462 = vmatmul.mubr.f32.gmra.mxu1 %v6476_v31 }
 0x33f   : > { %v6574_v59 = vadd.f32 %v2932_v42, %v2611_v48  ;;  %3986 = vmatprep.mubr.msk.f32.mxu1 %vm269_vm8, %v3128_v10 }
 0x340   : > { %v2613_v15 = vpop.f32.mrf.mxu1  ;;  %v2944_v54 = vpop.f32.mrf.mxu0 }
 0x342   : > { %v2616_v3 = vpop.f32.mrf.mxu1  ;;  %v2947_v34 = vpop.f32.mrf.mxu0  ;;  %3467 = vmatmul.mubr.f32.gmra.mxu1 %v4313_v29 }
 0x343   : > { %v6577_v25 = vadd.f32 %v2937_v16, %v2616_v3  ;;  %3987 = vmatprep.mubr.msk.f32.mxu1 %vm269_vm8, %v3130_v24 }
 0x344   : > { %v2618_v63 = vpop.f32.mrf.mxu1  ;;  %v2949_v57 = vpop.f32.mrf.mxu0 }
 0x346   : > { %v2621_v37 = vpop.f32.mrf.mxu1  ;;  %v2952_v44 = vpop.f32.mrf.mxu0  ;;  %3472 = vmatmul.mubr.f32.gmra.mxu1 %v4313_v29 }
 0x347   : > { %v6580_v49 = vadd.f32 %v2942_v11, %v2621_v37 }
 0x348   : > { %v2623_v19 = vpop.f32.mrf.mxu1  ;;  %v2954_v28 = vpop.f32.mrf.mxu0 }
 0x34a   : > { %v2626_v50 = vpop.f32.mrf.mxu1  ;;  %v2957_v7 = vpop.f32.mrf.mxu0 }
 0x34b   : > { %v6582_v14 = vadd.f32 %v2947_v34, %v2626_v50 }
 0x34c   : > { %v2628_v0 = vpop.f32.mrf.mxu1  ;;  %v2959_v8 = vpop.f32.mrf.mxu0 }
 0x34e   : > { %v2631_v13 = vpop.f32.mrf.mxu1  ;;  %v2962_v27 = vpop.f32.mrf.mxu0 }
 0x34f   : > { %v6584_v39 = vadd.f32 %v2952_v44, %v2631_v13 }
 0x350   : > { %v2633_v22 = vpop.f32.mrf.mxu1  ;;  %v2964_v30 = vpop.f32.mrf.mxu0 }
 0x352   : > { %v2636_v53 = vpop.f32.mrf.mxu1  ;;  %v2967_v45 = vpop.f32.mrf.mxu0 }
 0x353   : > { %v6586_v18 = vadd.f32 %v2957_v7, %v2636_v53 }
 0x354   : > { %v2638_v36 = vpop.f32.mrf.mxu1  ;;  %v2969_v58 = vpop.f32.mrf.mxu0 }
 0x356   : > { %v2641_v38 = vpop.f32.mrf.mxu1  ;;  %v2972_v51 = vpop.f32.mrf.mxu0 }
 0x357   : > { %v6588_v46 = vadd.f32 %v2962_v27, %v2641_v38 }
 0x358   : > { %v2643_v40 = vpop.f32.mrf.mxu1  ;;  %v2974_v9 = vpop.f32.mrf.mxu0 }
 0x35a   : > { %v2646_v31 = vpop.f32.mrf.mxu1  ;;  %v2977_v60 = vpop.f32.mrf.mxu0 }
 0x35b   : > { %v6590_v41 = vadd.f32 %v2967_v45, %v2646_v31 }
 0x35c   : > { %v2648_v61 = vpop.f32.mrf.mxu1  ;;  %v2979_v62 = vpop.f32.mrf.mxu0 }
 0x35e   : > { %v2651_v4 = vpop.f32.mrf.mxu1  ;;  %v2982_v23 = vpop.f32.mrf.mxu0 }
 0x35f   : > { %v6592_v1 = vadd.f32 %v2972_v51, %v2651_v4 }
 0x360   : > { %v2653_v21 = vpop.f32.mrf.mxu1  ;;  %v2984_v20 = vpop.f32.mrf.mxu0 }
 0x362   : > { %v2656_v17 = vpop.f32.mrf.mxu1  ;;  %v2987_v52 = vpop.f32.mrf.mxu0 }
 0x363   : > { %v6594_v42 = vadd.f32 %v2977_v60, %v2656_v17 }
 0x364   : > { %v2658_v6 = vpop.f32.mrf.mxu1  ;;  %v2989_v12 = vpop.f32.mrf.mxu0 }
 0x366   : > { %v2661_v26 = vpop.f32.mrf.mxu1  ;;  %v2992_v16 = vpop.f32.mrf.mxu0 }
 0x367   : > { %v6596_v33 = vadd.f32 %v2982_v23, %v2661_v26 }
 0x368   : > { %v2663_v35 = vpop.f32.mrf.mxu1  ;;  %v2994_v10 = vpop.f32.mrf.mxu0 }
 0x36a   : > { %v2666_v48 = vpop.f32.mrf.mxu1  ;;  %v2997_v11 = vpop.f32.mrf.mxu0 }
 0x36b   : > { %v6598_v15 = vadd.f32 %v2987_v52, %v2666_v48 }
 0x36c   : > { %v2668_v54 = vpop.f32.mrf.mxu1  ;;  %v2999_v24 = vpop.f32.mrf.mxu0 }
 0x36e   : > { %v2671_v3 = vpop.f32.mrf.mxu1  ;;  %v3002_v34 = vpop.f32.mrf.mxu0 }
 0x36f   : > { %v6600_v29 = vadd.f32 %v2992_v16, %v2671_v3 }
 0x370   : > { %v2673_v63 = vpop.f32.mrf.mxu1  ;;  %v3004_v57 = vpop.f32.mrf.mxu0 }
 0x372   : > { %v2676_v37 = vpop.f32.mrf.mxu1  ;;  %v3007_v44 = vpop.f32.mrf.mxu0 }
 0x373   : > { %v6602_v19 = vadd.f32 %v2997_v11, %v2676_v37 }
 0x374   : > { %v2678_v28 = vpop.f32.mrf.mxu1  ;;  %v3009_v50 = vpop.f32.mrf.mxu0 }
 0x376   : > { %v2681_v7 = vpop.f32.mrf.mxu1  ;;  %v3012_v0 = vpop.f32.mrf.mxu0 }
 0x377   : > { %v6604_v8 = vadd.f32 %v3002_v34, %v2681_v7 }
 0x378   : > { %v2683_v13 = vpop.f32.mrf.mxu1  ;;  %v3014_v27 = vpop.f32.mrf.mxu0 }
 0x37a   : > { %v2686_v22 = vpop.f32.mrf.mxu1  ;;  %v3017_v30 = vpop.f32.mrf.mxu0 }
 0x37b   : > { %v6606_v53 = vadd.f32 %v3007_v44, %v2686_v22 }
 0x37c   : > { %v2688_v45 = vpop.f32.mrf.mxu1  ;;  %v3019_v36 = vpop.f32.mrf.mxu0 }
 0x37e   : > { %v2691_v58 = vpop.f32.mrf.mxu1  ;;  %v3022_v38 = vpop.f32.mrf.mxu0 }
 0x37f   : > { %v6608_v51 = vadd.f32 %v3012_v0, %v2691_v58 }
 0x380   : > { %v2693_v40 = vpop.f32.mrf.mxu1  ;;  %v3024_v9 = vpop.f32.mrf.mxu0 }
 0x382   : > { %v2696_v31 = vpop.f32.mrf.mxu1  ;;  %v3027_v60 = vpop.f32.mrf.mxu0 }
 0x383   : > { %v6610_v61 = vadd.f32 %v3017_v30, %v2696_v31  ;;  %v2908_v31 = vadd.f32 %v6282_v55, %v6548_v47 }
 0x384   : > { %v2698_v62 = vpop.f32.mrf.mxu1  ;;  %v3029_v4 = vpop.f32.mrf.mxu0 }
 0x385   : > { %v6631_v4 = vld [vmem:[%s6747_s4] ss:$0 sm:$0xff] }
 0x386   : > { %v2701_v23 = vpop.f32.mrf.mxu1  ;;  %v3032_v21 = vpop.f32.mrf.mxu0 }
 0x387   : > { %v6612_v20 = vadd.f32 %v3022_v38, %v2701_v23 }
 0x388   : > { %v2703_v17 = vpop.f32.mrf.mxu1  ;;  %v3034_v52 = vpop.f32.mrf.mxu0 }
 0x38a   : > { %v2706_v6 = vpop.f32.mrf.mxu1  ;;  %v3037_v12 = vpop.f32.mrf.mxu0 }
 0x38b   : > { %v6614_v26 = vadd.f32 %v3027_v60, %v2706_v6  ;;  %v2913_v6 = vadd.f32 %v6296_v56, %v6553_v5 }
 0x38c   : > { %v2708_v16 = vpop.f32.mrf.mxu1  ;;  %v3039_v35 = vpop.f32.mrf.mxu0 }
 0x38e   : > { %v2711_v10 = vpop.f32.mrf.mxu1  ;;  %v3042_v48 = vpop.f32.mrf.mxu0 }
 0x38f   : > { %v6616_v11 = vadd.f32 %v3032_v21, %v2711_v10 }
 0x390   : > { %v2713_v54 = vpop.f32.mrf.mxu1  ;;  %v3044_v24 = vpop.f32.mrf.mxu0 }
 0x392   : > { %v2716_v3 = vpop.f32.mrf.mxu1  ;;  %v3047_v34 = vpop.f32.mrf.mxu0 }
 0x393   : > { %v6618_v63 = vadd.f32 %v3037_v12, %v2716_v3 }
 0x394   : > { %v2718_v57 = vpop.f32.mrf.mxu1  ;;  %v3049_v37 = vpop.f32.mrf.mxu0 }
 0x396   : > { %v2721_v44 = vpop.f32.mrf.mxu1  ;;  %v3052_v28 = vpop.f32.mrf.mxu0 }
 0x397   : > { %v6620_v50 = vadd.f32 %v3042_v48, %v2721_v44 }
 0x398   : > { %v2723_v7 = vpop.f32.mrf.mxu1  ;;  %v3054_v0 = vpop.f32.mrf.mxu0 }
 0x39a   : > { %v2726_v13 = vpop.f32.mrf.mxu1  ;;  %v3057_v27 = vpop.f32.mrf.mxu0 }
 0x39b   : > { %v6622_v22 = vadd.f32 %v3047_v34, %v2726_v13 }
 0x39c   : > { %v2728_v30 = vpop.f32.mrf.mxu1  ;;  %v3059_v45 = vpop.f32.mrf.mxu0 }
 0x39e   : > { %v2731_v36 = vpop.f32.mrf.mxu1  ;;  %v3062_v58 = vpop.f32.mrf.mxu0 }
 0x39f   : > { %v6624_v38 = vadd.f32 %v3052_v28, %v2731_v36 }
 0x3a0   : > { %v2733_v40 = vpop.f32.mrf.mxu1  ;;  %v3064_v9 = vpop.f32.mrf.mxu0 }
 0x3a2   : > { %v2736_v60 = vpop.f32.mrf.mxu1  ;;  %v3318_v62 = vpop.f32.mrf.mxu0 }
 0x3a3   : > { %v6633_v23 = vadd.f32 %v3057_v27, %v2736_v60  ;;  %v3477_v21 = vadd.f32 %v3318_v62, %v2908_v31 }
 0x3a4   : > { %v2738_v17 = vpop.f32.mrf.mxu1  ;;  %v3320_v52 = vpop.f32.mrf.mxu0 }
 0x3a5   : > { %v3516_v12 = vadd.f32 %v6631_v4, %v3477_v21 }
 0x3a6   : > { %v2741_v16 = vpop.f32.mrf.mxu1  ;;  %v3323_v35 = vpop.f32.mrf.mxu0 }
 0x3a7   : > { %v3548_v55 = vmax.f32 %v3516_v12, 0.0  ;;  %v6638_v47 = vadd.f32 %v3062_v58, %v2741_v16  ;;  %v3478_v10 = vadd.f32 %v3323_v35, %v2913_v6 }
 0x3a8   : > { %v2743_v48 = vpop.f32.mrf.mxu1  ;;  %v3325_v54 = vpop.f32.mrf.mxu0 }
 0x3a9   : > { %v3517_v24 = vadd.f32 %v6631_v4, %v3478_v10  ;;  %3580 = vxpose.xlu0.b32.start [1/16] %v3548_v55, 128 }
 0x3aa   : > { %v3328_v3 = vpop.f32.mrf.mxu0  ;;  %v3358_v34 = vpop.f32.mrf.mxu1 }
 0x3ab   : > { %v3549_v57 = vmax.f32 %v3517_v24, 0.0  ;;  %v3479_v37 = vadd.f32 %v3328_v3, %v6559_v32 }
 0x3ac   : > { %v3330_v44 = vpop.f32.mrf.mxu0  ;;  %v3360_v56 = vpop.f32.mrf.mxu1 }
 0x3ad   : > { %v3518_v5 = vadd.f32 %v6631_v4, %v3479_v37  ;;  %3581 = vxpose.xlu0.b32.cont [2/16] %v3549_v57, 128  ;;  %v3485_v57 = vadd.f32 %v3358_v34, %v6582_v14 }
 0x3ae   : > { %v3333_v28 = vpop.f32.mrf.mxu0  ;;  %v3363_v7 = vpop.f32.mrf.mxu1 }
 0x3af   : > { %v3550_v0 = vmax.f32 %v3518_v5, 0.0  ;;  %v3480_v13 = vadd.f32 %v3333_v28, %v6564_v2 }
 0x3b0   : > { %v3335_v27 = vpop.f32.mrf.mxu0  ;;  %v3365_v30 = vpop.f32.mrf.mxu1 }
 0x3b1   : > { %v3519_v45 = vadd.f32 %v6631_v4, %v3480_v13  ;;  %3582 = vxpose.xlu0.b32.cont [3/16] %v3550_v0, 128  ;;  %v3486_v0 = vadd.f32 %v3363_v7, %v6584_v39 }
 0x3b2   : > { %v3338_v36 = vpop.f32.mrf.mxu0  ;;  %v3368_v58 = vpop.f32.mrf.mxu1 }
 0x3b3   : > { %v3551_v40 = vmax.f32 %v3519_v45, 0.0  ;;  %v3481_v32 = vadd.f32 %v3338_v36, %v6569_v43  ;;  %v3487_v30 = vadd.f32 %v3368_v58, %v6586_v18  ;;  %v3525_v34 = vadd.f32 %v6631_v4, %v3486_v0 }
 0x3b4   : > { %v3340_v9 = vpop.f32.mrf.mxu0  ;;  %v3370_v31 = vpop.f32.mrf.mxu1 }
 0x3b5   : > { %v3520_v60 = vadd.f32 %v6631_v4, %v3481_v32  ;;  %3583 = vxpose.xlu0.b32.cont [4/16] %v3551_v40, 128  ;;  %v3526_v36 = vadd.f32 %v6631_v4, %v3487_v30  ;;  %v3557_v32 = vmax.f32 %v3525_v34, 0.0 }
 0x3b6   : > { %v3343_v62 = vpop.f32.mrf.mxu0  ;;  %v3373_v21 = vpop.f32.mrf.mxu1 }
 0x3b7   : > { %v3552_v17 = vmax.f32 %v3520_v60, 0.0  ;;  %v3482_v2 = vadd.f32 %v3343_v62, %v6574_v59  ;;  %v3488_v9 = vadd.f32 %v3373_v21, %v6588_v46  ;;  %v3558_v60 = vmax.f32 %v3526_v36, 0.0 }
 0x3b8   : > { %v3345_v52 = vpop.f32.mrf.mxu0  ;;  %v3375_v6 = vpop.f32.mrf.mxu1 }
 0x3b9   : > { %v3521_v12 = vadd.f32 %v6631_v4, %v3482_v2  ;;  %3584 = vxpose.xlu0.b32.cont [5/16] %v3552_v17, 128  ;;  %v3527_v58 = vadd.f32 %v6631_v4, %v3488_v9 }
 0x3ba   : > { %v3348_v16 = vpop.f32.mrf.mxu0  ;;  %v3378_v35 = vpop.f32.mrf.mxu1 }
 0x3bb   : > { %v3553_v55 = vmax.f32 %v3521_v12, 0.0  ;;  %v3483_v43 = vadd.f32 %v3348_v16, %v6577_v25  ;;  %v3524_v25 = vadd.f32 %v6631_v4, %v3485_v57  ;;  %v3489_v62 = vadd.f32 %v3378_v35, %v6590_v41 }
 0x3bc   : > { %v3350_v10 = vpop.f32.mrf.mxu0  ;;  %v3380_v48 = vpop.f32.mrf.mxu1  ;;  %v3559_v21 = vmax.f32 %v3527_v58, 0.0 }
 0x3bd   : > { %v3522_v54 = vadd.f32 %v6631_v4, %v3483_v43  ;;  %3585 = vxpose.xlu0.b32.cont [6/16] %v3553_v55, 128  ;;  %v3556_v14 = vmax.f32 %v3524_v25, 0.0  ;;  %v3528_v12 = vadd.f32 %v6631_v4, %v3489_v62 }
 0x3be   : > { %v3353_v24 = vpop.f32.mrf.mxu0  ;;  %v3383_v3 = vpop.f32.mrf.mxu1 }
 0x3bf   : > { %v3554_v59 = vmax.f32 %v3522_v54, 0.0  ;;  %v3484_v37 = vadd.f32 %v3353_v24, %v6580_v49  ;;  %v3490_v46 = vadd.f32 %v3383_v3, %v6592_v1  ;;  %v3560_v10 = vmax.f32 %v3528_v12, 0.0 }
 0x3c0   : > { %v3355_v44 = vpop.f32.mrf.mxu0  ;;  %v3385_v56 = vpop.f32.mrf.mxu1 }
 0x3c1   : > { %v3523_v5 = vadd.f32 %v6631_v4, %v3484_v37  ;;  %3586 = vxpose.xlu0.b32.cont [7/16] %v3554_v59, 128 }
 0x3c2   : > { %v3388_v28 = vpop.f32.mrf.mxu1 }
 0x3c3   : > { %v3555_v13 = vmax.f32 %v3523_v5, 0.0  ;;  %v3491_v48 = vadd.f32 %v3388_v28, %v6594_v42 }
 0x3c4   : > { %v3390_v27 = vpop.f32.mrf.mxu1 }
 0x3c5   : > { %3587 = vxpose.xlu0.b32.cont [8/16] %v3555_v13, 128  ;;  %v3530_v59 = vadd.f32 %v6631_v4, %v3491_v48 }
 0x3c6   : > { %v3393_v45 = vpop.f32.mrf.mxu1 }
 0x3c7   : > { %v3492_v37 = vadd.f32 %v3393_v45, %v6596_v33  ;;  %v3562_v28 = vmax.f32 %v3530_v59, 0.0 }
 0x3c8   : > { %v3395_v49 = vpop.f32.mrf.mxu1 }
 0x3c9   : > { %3588 = vxpose.xlu0.b32.cont [9/16] %v3556_v14, 128  ;;  %v3531_v25 = vadd.f32 %v6631_v4, %v3492_v37 }
 0x3ca   : > { %v3398_v40 = vpop.f32.mrf.mxu1 }
 0x3cb   : > { %v3493_v31 = vadd.f32 %v3398_v40, %v6598_v15  ;;  %v3563_v45 = vmax.f32 %v3531_v25, 0.0 }
 0x3cc   : > { %v3400_v39 = vpop.f32.mrf.mxu1 }
 0x3cd   : > { %v3532_v7 = vadd.f32 %v6631_v4, %v3493_v31  ;;  %3589 = vxpose.xlu0.b32.cont [10/16] %v3557_v32, 128 }
 0x3ce   : > { %v3403_v18 = vpop.f32.mrf.mxu1 }
 0x3cf   : > { %v3564_v17 = vmax.f32 %v3532_v7, 0.0  ;;  %v3494_v2 = vadd.f32 %v3403_v18, %v6600_v29  ;;  %v3529_v29 = vadd.f32 %v6631_v4, %v3490_v46 }
 0x3d0   : > { %v3405_v52 = vpop.f32.mrf.mxu1 }
 0x3d1   : > { %v3533_v6 = vadd.f32 %v6631_v4, %v3494_v2  ;;  %3590 = vxpose.xlu0.b32.cont [11/16] %v3558_v60, 128  ;;  %3612 = vxpose.xlu1.b32.start [1/16] %v3564_v17, 128 }
 0x3d2   : > { %v3408_v15 = vpop.f32.mrf.mxu1 }
 0x3d3   : > { %v3565_v16 = vmax.f32 %v3533_v6, 0.0  ;;  %v3495_v55 = vadd.f32 %v3408_v15, %v6602_v19  ;;  %v3561_v19 = vmax.f32 %v3529_v29, 0.0 }
 0x3d4   : > { %v3410_v43 = vpop.f32.mrf.mxu1 }
 0x3d5   : > { %v3534_v41 = vadd.f32 %v6631_v4, %v3495_v55  ;;  %3591 = vxpose.xlu0.b32.cont [12/16] %v3559_v21, 128  ;;  %3613 = vxpose.xlu1.b32.cont [2/16] %v3565_v16, 128 }
 0x3d6   : > { %v3413_v35 = vpop.f32.mrf.mxu1 }
 0x3d7   : > { %v3566_v54 = vmax.f32 %v3534_v41, 0.0  ;;  %v3496_v1 = vadd.f32 %v3413_v35, %v6604_v8 }
 0x3d8   : > { %v3415_v24 = vpop.f32.mrf.mxu1 }
 0x3d9   : > { %v3535_v3 = vadd.f32 %v6631_v4, %v3496_v1  ;;  %3592 = vxpose.xlu0.b32.cont [13/16] %v3560_v10, 128  ;;  %3614 = vxpose.xlu1.b32.cont [3/16] %v3566_v54, 128 }
 0x3da   : > { %v3418_v57 = vpop.f32.mrf.mxu1 }
 0x3db   : > { %v3567_v44 = vmax.f32 %v3535_v3, 0.0  ;;  %v3497_v56 = vadd.f32 %v3418_v57, %v6606_v53 }
 0x3dc   : > { %v3420_v5 = vpop.f32.mrf.mxu1 }
 0x3dd   : > { %v3536_v42 = vadd.f32 %v6631_v4, %v3497_v56  ;;  %3593 = vxpose.xlu0.b32.cont [14/16] %v3561_v19, 128  ;;  %3615 = vxpose.xlu1.b32.cont [4/16] %v3567_v44, 128 }
 0x3de   : > { %v3423_v8 = vpop.f32.mrf.mxu1 }
 0x3df   : > { %v3568_v0 = vmax.f32 %v3536_v42, 0.0  ;;  %v3498_v13 = vadd.f32 %v3423_v8, %v6608_v51 }
 0x3e0   : > { %v3425_v27 = vpop.f32.mrf.mxu1 }
 0x3e1   : > { %v3537_v30 = vadd.f32 %v6631_v4, %v3498_v13  ;;  %3594 = vxpose.xlu0.b32.cont [15/16] %v3562_v28, 128  ;;  %3616 = vxpose.xlu1.b32.cont [5/16] %v3568_v0, 128 }
 0x3e2   : > { %v3428_v33 = vpop.f32.mrf.mxu1 }
 0x3e3   : > { %v3569_v53 = vmax.f32 %v3537_v30, 0.0  ;;  %v3499_v14 = vadd.f32 %v3428_v33, %v6610_v61 }
 0x3e4   : > { %v3430_v34 = vpop.f32.mrf.mxu1 }
 0x3e5   : > { %v3538_v49 = vadd.f32 %v6631_v4, %v3499_v14  ;;  %3595 = vxpose.xlu0.b32.end [16/16] %v3563_v45, 128  ;;  %3617 = vxpose.xlu1.b32.cont [6/16] %v3569_v53, 128 }
 0x3e6   : > { %v3433_v36 = vpop.f32.mrf.mxu1 }
 0x3e7   : > { %v3570_v40 = vmax.f32 %v3538_v49, 0.0  ;;  %v3500_v32 = vadd.f32 %v3433_v36, %v6612_v20 }
 0x3e8   : > { %v3435_v51 = vpop.f32.mrf.mxu1 }
 0x3e9   : > { %v3539_v9 = vadd.f32 %v6631_v4, %v3500_v32  ;;  %3618 = vxpose.xlu1.b32.cont [7/16] %v3570_v40, 128 }
 0x3ea   : > { %v3438_v31 = vpop.f32.mrf.mxu1 }
 0x3eb   : > { %v3571_v39 = vmax.f32 %v3539_v9, 0.0  ;;  %v3501_v7 = vadd.f32 %v3438_v31, %v6614_v26 }
 0x3ec   : > { %v3440_v60 = vpop.f32.mrf.mxu1 }
 0x3ed   : > { %v3540_v61 = vadd.f32 %v6631_v4, %v3501_v7  ;;  %3619 = vxpose.xlu1.b32.cont [8/16] %v3571_v39, 128 }
 0x3ee   : > { %v3443_v18 = vpop.f32.mrf.mxu1 }
 0x3ef   : > { %v3572_v58 = vmax.f32 %v3540_v61, 0.0  ;;  %v3502_v62 = vadd.f32 %v3443_v18, %v6616_v11 }
 0x3f0   : > { %v3445_v17 = vpop.f32.mrf.mxu1 }
 0x3f1   : > { %v3541_v2 = vadd.f32 %v6631_v4, %v3502_v62  ;;  %3620 = vxpose.xlu1.b32.cont [9/16] %v3572_v58, 128 }
 0x3f2   : > { %v3448_v20 = vpop.f32.mrf.mxu1 }
 0x3f3   : > { %v3573_v52 = vmax.f32 %v3541_v2, 0.0  ;;  %v3503_v6 = vadd.f32 %v3448_v20, %v6618_v63 }
 0x3f4   : > { %v3450_v46 = vpop.f32.mrf.mxu1 }
 0x3f5   : > { %v3542_v15 = vadd.f32 %v6631_v4, %v3503_v6  ;;  %3621 = vxpose.xlu1.b32.cont [10/16] %v3573_v52, 128 }
 0x3f6   : > { %v3453_v26 = vpop.f32.mrf.mxu1 }
 0x3f7   : > { %v3574_v21 = vmax.f32 %v3542_v15, 0.0  ;;  %v3504_v12 = vadd.f32 %v3453_v26, %v6620_v50 }
 0x3f8   : > { %v3455_v16 = vpop.f32.mrf.mxu1 }
 0x3f9   : > { %v3543_v55 = vadd.f32 %v6631_v4, %v3504_v12  ;;  %3622 = vxpose.xlu1.b32.cont [11/16] %v3574_v21, 128 }
 0x3fa   : > { %v3458_v11 = vpop.f32.mrf.mxu1 }
 0x3fb   : > { %v3575_v43 = vmax.f32 %v3543_v55, 0.0  ;;  %v3505_v41 = vadd.f32 %v3458_v11, %v6622_v22 }
 0x3fc   : > { %v3460_v29 = vpop.f32.mrf.mxu1 }
 0x3fd   : > { %v3544_v35 = vadd.f32 %v6631_v4, %v3505_v41  ;;  %3623 = vxpose.xlu1.b32.cont [12/16] %v3575_v43, 128 }
 0x3fe   : > { %v3463_v63 = vpop.f32.mrf.mxu1 }
 0x3ff   : > { %v3576_v10 = vmax.f32 %v3544_v35, 0.0  ;;  %v3506_v48 = vadd.f32 %v3463_v63, %v6624_v38 }
 0x400   : > { %v3465_v54 = vpop.f32.mrf.mxu1 }
 0x401   : > { %v3545_v1 = vadd.f32 %v6631_v4, %v3506_v48  ;;  %3624 = vxpose.xlu1.b32.cont [13/16] %v3576_v10, 128 }
 0x402   : > { %v3468_v50 = vpop.f32.mrf.mxu1 }
 0x403   : > { %v3577_v24 = vmax.f32 %v3545_v1, 0.0  ;;  %v3507_v3 = vadd.f32 %v3468_v50, %v6633_v23 }
 0x404   : > { %v3470_v19 = vpop.f32.mrf.mxu1 }
 0x405   : > { %v3546_v22 = vadd.f32 %v6631_v4, %v3507_v3  ;;  %3625 = vxpose.xlu1.b32.cont [14/16] %v3577_v24, 128 }
 0x406   : > { %v3473_v57 = vpop.f32.mrf.mxu1 }
 0x407   : > { %v3578_v59 = vmax.f32 %v3546_v22, 0.0  ;;  %v3508_v37 = vadd.f32 %v3473_v57, %v6638_v47 }
 0x408   : > { %v3475_v44 = vpop.f32.mrf.mxu1 }
 0x409   : > { %v3547_v38 = vadd.f32 %v6631_v4, %v3508_v37  ;;  %3626 = vxpose.xlu1.b32.cont [15/16] %v3578_v59, 128 }
 0x40b   : > { %v3579_v56 = vmax.f32 %v3547_v38, 0.0 }
 0x40d   : > { %3627 = vxpose.xlu1.b32.end [16/16] %v3579_v56, 128 }
 0x425   : > { %v3596_v23 = vpop.trf.xlu0 }
 0x426   : > { %3644 = vst [vmem:[%s6706_s11] sm:$0xff] %v3596_v23 }
 0x429   : > { %v3597_v4 = vpop.trf.xlu0 }
 0x42a   : > { %3646 = vst [vmem:[%s6706_s11 + $0x10] sm:$0xff] %v3597_v4 }
 0x42d   : > { %v3598_v47 = vpop.trf.xlu0 }
 0x42e   : > { %3648 = vst [vmem:[%s6706_s11 + $0x20] sm:$0xff] %v3598_v47 }
 0x431   : > { %v3599_v5 = vpop.trf.xlu0 }
 0x432   : > { %3650 = vst [vmem:[%s6706_s11 + $0x30] sm:$0xff] %v3599_v5 }
 0x435   : > { %v3600_v42 = vpop.trf.xlu0 }
 0x436   : > { %3652 = vst [vmem:[%s6706_s11 + $0x40] sm:$0xff] %v3600_v42 }
 0x439   : > { %v3601_v8 = vpop.trf.xlu0 }
 0x43a   : > { %3654 = vst [vmem:[%s6706_s11 + $0x50] sm:$0xff] %v3601_v8 }
 0x43d   : > { %v3602_v28 = vpop.trf.xlu0 }
 0x43e   : > { %3656 = vst [vmem:[%s6706_s11 + $0x60] sm:$0xff] %v3602_v28 }
 0x441   : > { %v3603_v25 = vpop.trf.xlu0 }
 0x442   : > { %3658 = vst [vmem:[%s6706_s11 + $0x70] sm:$0xff] %v3603_v25 }
 0x445   : > { %v3604_v0 = vpop.trf.xlu0 }
 0x446   : > { %3660 = vst [vmem:[%s6706_s11 + $0x80] sm:$0xff] %v3604_v0 }
 0x449   : > { %v3605_v13 = vpop.trf.xlu0 }
 0x44a   : > { %3662 = vst [vmem:[%s6706_s11 + $0x90] sm:$0xff] %v3605_v13 }
 0x44d   : > { %v3628_v27 = vpop.trf.xlu1  ;;  %v3606_v30 = vpop.trf.xlu0 }
 0x44e   : > { %3645 = vst [vmem:[%s6706_s11 + $0x8] sm:$0xff] %v3628_v27  ;;  %3664 = vst [vmem:[%s6706_s11 + $0xa0] sm:$0xff] %v3606_v30 }
 0x451   : > { %v3629_v33 = vpop.trf.xlu1  ;;  %v3607_v45 = vpop.trf.xlu0 }
 0x452   : > { %3647 = vst [vmem:[%s6706_s11 + $0x18] sm:$0xff] %v3629_v33  ;;  %3666 = vst [vmem:[%s6706_s11 + $0xb0] sm:$0xff] %v3607_v45 }
 0x455   : > { %v3630_v53 = vpop.trf.xlu1  ;;  %v3608_v14 = vpop.trf.xlu0 }
 0x456   : > { %3649 = vst [vmem:[%s6706_s11 + $0x28] sm:$0xff] %v3630_v53  ;;  %3668 = vst [vmem:[%s6706_s11 + $0xc0] sm:$0xff] %v3608_v14 }
 0x459   : > { %v3631_v34 = vpop.trf.xlu1  ;;  %v3609_v49 = vpop.trf.xlu0 }
 0x45a   : > { %3651 = vst [vmem:[%s6706_s11 + $0x38] sm:$0xff] %v3631_v34  ;;  %3670 = vst [vmem:[%s6706_s11 + $0xd0] sm:$0xff] %v3609_v49 }
 0x45d   : > { %v3632_v36 = vpop.trf.xlu1  ;;  %v3610_v40 = vpop.trf.xlu0 }
 0x45e   : > { %3653 = vst [vmem:[%s6706_s11 + $0x48] sm:$0xff] %v3632_v36  ;;  %3672 = vst [vmem:[%s6706_s11 + $0xe0] sm:$0xff] %v3610_v40 }
 0x461   : > { %v3633_v32 = vpop.trf.xlu1  ;;  %v3611_v51 = vpop.trf.xlu0 }
 0x462   : > { %3655 = vst [vmem:[%s6706_s11 + $0x58] sm:$0xff] %v3633_v32  ;;  %3674 = vst [vmem:[%s6706_s11 + $0xf0] sm:$0xff] %v3611_v51 }
 0x465   : > { %v3634_v9 = vpop.trf.xlu1 }
 0x466   : > { %3657 = vst [vmem:[%s6706_s11 + $0x68] sm:$0xff] %v3634_v9 }
 0x469   : > { %v3635_v31 = vpop.trf.xlu1 }
 0x46a   : > { %3659 = vst [vmem:[%s6706_s11 + $0x78] sm:$0xff] %v3635_v31 }
 0x46d   : > { %v3636_v39 = vpop.trf.xlu1 }
 0x46e   : > { %3661 = vst [vmem:[%s6706_s11 + $0x88] sm:$0xff] %v3636_v39 }
 0x471   : > { %v3637_v7 = vpop.trf.xlu1 }
 0x472   : > { %3663 = vst [vmem:[%s6706_s11 + $0x98] sm:$0xff] %v3637_v7 }
 0x475   : > { %v3638_v60 = vpop.trf.xlu1 }
 0x476   : > { %3665 = vst [vmem:[%s6706_s11 + $0xa8] sm:$0xff] %v3638_v60 }
 0x479   : > { %v3639_v61 = vpop.trf.xlu1 }
 0x47a   : > { %3667 = vst [vmem:[%s6706_s11 + $0xb8] sm:$0xff] %v3639_v61 }
 0x47d   : > { %v3640_v18 = vpop.trf.xlu1 }
 0x47e   : > { %3669 = vst [vmem:[%s6706_s11 + $0xc8] sm:$0xff] %v3640_v18 }
 0x481   : > { %v3641_v58 = vpop.trf.xlu1 }
 0x482   : > { %3671 = vst [vmem:[%s6706_s11 + $0xd8] sm:$0xff] %v3641_v58 }
 0x485   : > { %v3642_v62 = vpop.trf.xlu1 }
 0x486   : > { %3673 = vst [vmem:[%s6706_s11 + $0xe8] sm:$0xff] %v3642_v62 }
 0x489   : > { %v3643_v17 = vpop.trf.xlu1 }
 0x48a   : > { %3675 = vst [vmem:[%s6706_s11 + $0xf8] sm:$0xff] %v3643_v17 }
 0x48b PF: > { %s15_s18 = sadd.s32 1, %s4320_s18  }
 0x48c   : > { %p12_p4 = scmp.ge.s32.totalorder %s15_s18, 4  }
 0x48e   :  { %14 = sbr.rel (!%p12_p4) target bundleno = 1 (0x1), region = 79 }

</bundles_post_ra>
